<compile_context>
chip_gen: v6e
topology: v6e:2x2x1
jax: 0.10.0
libtpu: 0.0.40
codegen_flags: <defaults>
</compile_context>

<pallas_src>
import functools

import jax
import jax.numpy as jnp
from jax.experimental import pallas as pl
from jax.experimental.pallas import tpu as pltpu

GRID_SIZE = 5
SPLINE_ORDER = 3
GRID_RANGE = (-1.0, 1.0)
LANE = 128


def _round_up(n, m):
    return (n + m - 1) // m * m


def _default_spline_dtype():
    """bf16 spline recursion on chips with a bf16 VPU (v6e/v7x); f32 otherwise."""
    try:
        kind = jax.devices()[0].device_kind.lower()
    except Exception:
        return jnp.float32
    if any(tag in kind for tag in ("v6", "v7", "tpu7", "trillium")):
        return jnp.bfloat16
    return jnp.float32


# ----------------------------------------------------------------------------
# Pallas kernel: full multi-layer KAN forward, one batch tile per grid step.
# ----------------------------------------------------------------------------
def _kan_fused_kernel(x_ref, *rest, knots, spline_order, num_layers,
                      compute_dtype):
    """rest = (w_fused_0, ..., w_fused_{L-1}, o_ref).

    Per layer: act <- [SiLU(act) | B_0(act) | ... | B_{C-1}(act)] @ W_fused,
    where W_fused = [base_w.T ; spline_w_0.T ; ... ; spline_w_{C-1}.T]
    (pre-scaled by spline_scaler, zero-padded lane-dense, bf16).
    """
    w_refs = rest[:num_layers]
    o_ref = rest[num_layers]

    act = x_ref[...].astype(jnp.float32)                       # (TB, In_pad)

    for layer in range(num_layers):
        kn = knots[layer]                                       # python floats (uniform)
        n_knots = len(kn)
        h = kn[1] - kn[0]                                       # uniform spacing
        w = w_refs[layer][...]                                  # ((C+1)*In_pad, Out_pad) bf16

        # ---- base branch: SiLU with the reciprocal on the EUP (f32) ---------
        sig = pl.reciprocal(1.0 + jnp.exp(-act), approx=True)
        planes = [(act * sig).astype(jnp.bfloat16)]             # slab plane 0

        # ---- spline branch: VALU-lean, division-free Cox–de Boor ------------
        # Order-0 from one-sided step functions; per level a single shared
        # t = act/(k*h); right_j = 1 - left_{j+1} (uniform grid).
        a = act.astype(compute_dtype)
        steps = [(a >= kn[j]).astype(compute_dtype) for j in range(n_knots)]
        bases = [steps[j] - steps[j + 1] for j in range(n_knots - 1)]
        for k in range(1, spline_order + 1):
            inv = 1.0 / (k * h)                                 # compile-time constant
            t = a * inv
            m = len(bases)
            left = [t - (kn[j] * inv) for j in range(m)]
            bases = [left[j] * bases[j] + (1.0 - left[j + 1]) * bases[j + 1]
                     for j in range(m - 1)]
        planes += [b.astype(jnp.bfloat16) for b in bases]       # bf16 per plane

        # ---- one fused MXU matmul (bf16 operands, f32 accumulation) ---------
        slab = jnp.concatenate(planes, axis=-1)                 # (TB, (C+1)*In_pad) bf16
        act = jnp.dot(slab, w, preferred_element_type=jnp.float32)

    o_ref[...] = act.astype(o_ref.dtype)


# ----------------------------------------------------------------------------
# One-time parameter preparation (outside the per-call path)
# ----------------------------------------------------------------------------
def prepare_kan_params(params, spline_order=SPLINE_ORDER):
    layers, knots = [], []
    for p in params:
        base_w = p["base_weight"]                               # (Out, In)
        spl_w = p["spline_weight"]                              # (Out, In, C)
        spl_s = p["spline_scaler"]                              # (Out, In)
        grid = p["grid"]                                        # (In, n_knots)
        out_f, in_f = base_w.shape
        n_coef = spl_w.shape[-1]
        in_pad = _round_up(in_f, LANE)
        out_pad = _round_up(out_f, LANE)

        scaled = spl_w * spl_s[:, :, None]                      # (Out, In, C)
        planes = [base_w.T] + [scaled[:, :, j].T for j in range(n_coef)]
        # Zero-padded weight rows guarantee padded input lanes contribute 0.
        planes = [jnp.pad(w2, ((0, in_pad - in_f), (0, out_pad - out_f)))
                  for w2 in planes]
        w_fused = jnp.concatenate(planes, axis=0).astype(jnp.bfloat16)

        # Knot row 0 (uniform, identical across features) baked as constants.
        knots.append(tuple(float(v) for v in jax.device_get(grid[0]).tolist()))
        layers.append(dict(w=w_fused, in_f=in_f, out_f=out_f,
                           in_pad=in_pad, out_pad=out_pad))
    return dict(layers=layers, knots=tuple(knots), spline_order=spline_order)


# ----------------------------------------------------------------------------
# Wrapper: one pallas_call for the entire KAN forward
# ----------------------------------------------------------------------------
def kan_forward_fused(prepped, x, block_b=128, spline_dtype=None):
    layers = prepped["layers"]
    num_layers = len(layers)
    b, in0 = x.shape
    in0_pad = layers[0]["in_pad"]
    out_f = layers[-1]["out_f"]
    out_pad = layers[-1]["out_pad"]

    if spline_dtype is None:
        spline_dtype = _default_spline_dtype()

    # Batch tile: default 128 (fills MXU rows, amortizes per-step overhead);
    # force >=2 grid steps when the batch allows it (megacore on v7x, overlap).
    b8 = _round_up(b, 8)
    tb = min(block_b, b8)
    if b8 > 8 and b8 // tb < 2:
        tb = _round_up(pl.cdiv(b8, 2), 8)
    b_pad = _round_up(b, tb)

    x_p = jnp.pad(x.astype(jnp.float32), ((0, b_pad - b), (0, in0_pad - in0)))

    kernel = functools.partial(
        _kan_fused_kernel, knots=prepped["knots"],
        spline_order=prepped["spline_order"], num_layers=num_layers,
        compute_dtype=spline_dtype)

    # Explicit VMEM budget: weight slabs (worst case double-buffered), i/o
    # tiles, live basis planes + bf16 slab, plus headroom.  Clamped so the
    # request stays inside every generation's physical VMEM for small nets.
    act_bytes = 2 if spline_dtype == jnp.bfloat16 else 4
    w_bytes = sum(int(l["w"].size) * 2 for l in layers)
    max_in_pad = max(l["in_pad"] for l in layers)
    max_k = max(int(l["w"].shape[0]) for l in layers)
    need = (2 * w_bytes
            + 2 * tb * in0_pad * 4 + 2 * tb * out_pad * 4
            + 14 * tb * max_in_pad * act_bytes
            + tb * max_k * 2)
    vmem_limit = int(min(max(need + (8 << 20), 32 << 20), 96 << 20))

    def _run(single_buffer_weights):
        in_specs = [pl.BlockSpec((tb, in0_pad), lambda i: (i, 0))]
        for lyr in layers:
            if single_buffer_weights:
                # Loop-invariant slab: constant index_map, keep ONE copy resident.
                spec = pl.BlockSpec(lyr["w"].shape, lambda i: (0, 0),
                                    pipeline_mode=pl.Buffered(1))
            else:
                spec = pl.BlockSpec(lyr["w"].shape, lambda i: (0, 0))
            in_specs.append(spec)
        return pl.pallas_call(
            kernel,
            grid=(pl.cdiv(b_pad, tb),),
            in_specs=in_specs,
            out_specs=pl.BlockSpec((tb, out_pad), lambda i: (i, 0)),
            out_shape=jax.ShapeDtypeStruct((b_pad, out_pad), jnp.float32),
            compiler_params=pltpu.CompilerParams(
                dimension_semantics=("parallel",),
                vmem_limit_bytes=vmem_limit),
        )(x_p, *[lyr["w"] for lyr in layers])

    try:
        out = _run(True)
    except Exception:
        # pipeline_mode / Buffered(1) not supported by this jax build:
        # fall back to default double-buffered weight slabs.
        out = _run(False)

    return out[:b, :out_f].astype(x.dtype)


# ----------------------------------------------------------------------------
# Parameter setup (deterministic, synthetic)
# ----------------------------------------------------------------------------
def init_kan_params(key, layers_hidden, grid_size=GRID_SIZE,
                    spline_order=SPLINE_ORDER, grid_range=GRID_RANGE):
    h = (grid_range[1] - grid_range[0]) / grid_size
    kn = (jnp.arange(-spline_order, grid_size + spline_order + 1,
                     dtype=jnp.float32) * h + grid_range[0])
    params = []
    for in_f, out_f in zip(layers_hidden[:-1], layers_hidden[1:]):
        key, k1, k2, k3 = jax.random.split(key, 4)
        grid = jnp.broadcast_to(kn, (in_f, kn.shape[0]))        # (In, G+2k+1)
        base_w = (jax.random.uniform(k1, (out_f, in_f), jnp.float32,
                                     -1.0, 1.0) / jnp.sqrt(in_f))
        spline_w = (jax.random.uniform(k2, (out_f, in_f, grid_size + spline_order),
                                       jnp.float32, -1.0, 1.0) * 0.1)
        spline_sc = (jax.random.uniform(k3, (out_f, in_f), jnp.float32,
                                        -1.0, 1.0) / jnp.sqrt(in_f))
        params.append(dict(grid=grid, base_weight=base_w,
                           spline_weight=spline_w, spline_scaler=spline_sc))
    return params


# ----------------------------------------------------------------------------
# Pure-JAX f32 reference (mirrors the PyTorch math) for the correctness check
# ----------------------------------------------------------------------------
def _b_splines_ref(x, grid, spline_order):
    xe = x[:, :, None]
    bases = ((xe >= grid[None, :, :-1]) & (xe < grid[None, :, 1:])).astype(x.dtype)
    for k in range(1, spline_order + 1):
        bases = ((xe - grid[None, :, :-(k + 1)])
                 / (grid[None, :, k:-1] - grid[None, :, :-(k + 1)]) * bases[:, :, :-1]
                 + (grid[None, :, k + 1:] - xe)
                 / (grid[None, :, k + 1:] - grid[None, :, 1:-k]) * bases[:, :, 1:])
    return bases


def kan_linear_ref(x, grid, base_w, spline_w, spline_sc,
                   spline_order=SPLINE_ORDER):
    base_out = (x * jax.nn.sigmoid(x)) @ base_w.T
    bases = _b_splines_ref(x, grid, spline_order).reshape(x.shape[0], -1)
    scaled = (spline_w * spline_sc[:, :, None]).reshape(base_w.shape[0], -1)
    return base_out + bases @ scaled.T


def kan_forward_ref(params, x):
    for p in params:
        x = kan_linear_ref(x, p["grid"], p["base_weight"],
                           p["spline_weight"], p["spline_scaler"])
    return x


# ----------------------------------------------------------------------------
if __name__ == "__main__":
    layers_hidden = [32, 64, 16]   # KAN([32, 64, 16])
    batch = 16                      # small; still exercises the 2-step grid path

    key = jax.random.PRNGKey(0)
    key, kx = jax.random.split(key)
    params = init_kan_params(key, layers_hidden)
    # keep inputs mostly inside grid_range so the splines are active
    x = 0.5 * jax.random.normal(kx, (batch, layers_hidden[0]), jnp.float32)

    prepped = prepare_kan_params(params)
    out = jax.block_until_ready(kan_forward_fused(prepped, x))
    ref = jax.block_until_ready(kan_forward_ref(params, x))

    assert out.shape == (batch, layers_hidden[-1])
    # bf16 matmul operands (+ bf16 spline recursion on v6e/v7x) with f32
    # accumulation -> relaxed but meaningful bound.
    assert jnp.allclose(out, ref, atol=4e-2, rtol=4e-2), (
        f"max abs err = {jnp.max(jnp.abs(out - ref))}")

    print("KERNEL_OK")
</pallas_src>

<mosaic_0001>
module attributes {stable_mosaic.version = 11 : i64} {
  func.func @_kan_fused_kernel(%arg0: i32, %arg1: memref<8x128xf32, #tpu.memory_space<vmem>>, %arg2: memref<1152x128xbf16, #tpu.memory_space<vmem>>, %arg3: memref<1152x128xbf16, #tpu.memory_space<vmem>>, %arg4: memref<8x128xf32, #tpu.memory_space<vmem>>) attributes {dimension_semantics = [#tpu.dimension_semantics<parallel>], iteration_bounds = array<i64: 2>, scalar_prefetch = 0 : i64, scratch_operands = 0 : i64, tpu.core_type = #tpu.core_type<tc>, window_params = [{transform_indices = @transform_0, window_bounds = array<i64: 8, 128>}, {pipeline_mode = #tpu.pipeline_mode<synchronous>, transform_indices = @transform_1, window_bounds = array<i64: 1152, 128>}, {pipeline_mode = #tpu.pipeline_mode<synchronous>, transform_indices = @transform_2, window_bounds = array<i64: 1152, 128>}, {transform_indices = @transform_3, window_bounds = array<i64: 8, 128>}]} {
    %c0 = arith.constant 0 : index
    %c0_0 = arith.constant 0 : index
    %0 = vector.load %arg1[%c0, %c0_0] : memref<8x128xf32, #tpu.memory_space<vmem>>, vector<8x128xf32>
    %c0_1 = arith.constant 0 : index
    %c0_2 = arith.constant 0 : index
    %1 = vector.load %arg2[%c0_1, %c0_2] : memref<1152x128xbf16, #tpu.memory_space<vmem>>, vector<1152x128xbf16>
    %cst = arith.constant 0.000000e+00 : f32
    %2 = vector.broadcast %cst : f32 to vector<8x128xf32>
    %3 = arith.subf %2, %0 : vector<8x128xf32>
    %4 = math.exp %3 : vector<8x128xf32>
    %cst_3 = arith.constant 1.000000e+00 : f32
    %5 = vector.broadcast %cst_3 : f32 to vector<8x128xf32>
    %6 = arith.addf %5, %4 : vector<8x128xf32>
    %7 = tpu.reciprocal %6 {approx = true} : vector<8x128xf32> -> vector<8x128xf32>
    %8 = arith.mulf %0, %7 : vector<8x128xf32>
    %9 = arith.truncf %8 : vector<8x128xf32> to vector<8x128xbf16>
    %cst_4 = arith.constant -2.200000e+00 : f32
    %10 = vector.broadcast %cst_4 : f32 to vector<8x128xf32>
    %11 = arith.cmpf oge, %0, %10 : vector<8x128xf32>
    %12 = arith.extui %11 : vector<8x128xi1> to vector<8x128xi32>
    %13 = arith.sitofp %12 : vector<8x128xi32> to vector<8x128xf32>
    %cst_5 = arith.constant -1.800000e+00 : f32
    %14 = vector.broadcast %cst_5 : f32 to vector<8x128xf32>
    %15 = arith.cmpf oge, %0, %14 : vector<8x128xf32>
    %16 = arith.extui %15 : vector<8x128xi1> to vector<8x128xi32>
    %17 = arith.sitofp %16 : vector<8x128xi32> to vector<8x128xf32>
    %cst_6 = arith.constant -1.400000e+00 : f32
    %18 = vector.broadcast %cst_6 : f32 to vector<8x128xf32>
    %19 = arith.cmpf oge, %0, %18 : vector<8x128xf32>
    %20 = arith.extui %19 : vector<8x128xi1> to vector<8x128xi32>
    %21 = arith.sitofp %20 : vector<8x128xi32> to vector<8x128xf32>
    %cst_7 = arith.constant -1.000000e+00 : f32
    %22 = vector.broadcast %cst_7 : f32 to vector<8x128xf32>
    %23 = arith.cmpf oge, %0, %22 : vector<8x128xf32>
    %24 = arith.extui %23 : vector<8x128xi1> to vector<8x128xi32>
    %25 = arith.sitofp %24 : vector<8x128xi32> to vector<8x128xf32>
    %cst_8 = arith.constant -6.000000e-01 : f32
    %26 = vector.broadcast %cst_8 : f32 to vector<8x128xf32>
    %27 = arith.cmpf oge, %0, %26 : vector<8x128xf32>
    %28 = arith.extui %27 : vector<8x128xi1> to vector<8x128xi32>
    %29 = arith.sitofp %28 : vector<8x128xi32> to vector<8x128xf32>
    %cst_9 = arith.constant -0.199999988 : f32
    %30 = vector.broadcast %cst_9 : f32 to vector<8x128xf32>
    %31 = arith.cmpf oge, %0, %30 : vector<8x128xf32>
    %32 = arith.extui %31 : vector<8x128xi1> to vector<8x128xi32>
    %33 = arith.sitofp %32 : vector<8x128xi32> to vector<8x128xf32>
    %cst_10 = arith.constant 0.200000048 : f32
    %34 = vector.broadcast %cst_10 : f32 to vector<8x128xf32>
    %35 = arith.cmpf oge, %0, %34 : vector<8x128xf32>
    %36 = arith.extui %35 : vector<8x128xi1> to vector<8x128xi32>
    %37 = arith.sitofp %36 : vector<8x128xi32> to vector<8x128xf32>
    %cst_11 = arith.constant 6.000000e-01 : f32
    %38 = vector.broadcast %cst_11 : f32 to vector<8x128xf32>
    %39 = arith.cmpf oge, %0, %38 : vector<8x128xf32>
    %40 = arith.extui %39 : vector<8x128xi1> to vector<8x128xi32>
    %41 = arith.sitofp %40 : vector<8x128xi32> to vector<8x128xf32>
    %cst_12 = arith.constant 1.000000e+00 : f32
    %42 = vector.broadcast %cst_12 : f32 to vector<8x128xf32>
    %43 = arith.cmpf oge, %0, %42 : vector<8x128xf32>
    %44 = arith.extui %43 : vector<8x128xi1> to vector<8x128xi32>
    %45 = arith.sitofp %44 : vector<8x128xi32> to vector<8x128xf32>
    %cst_13 = arith.constant 1.4000001 : f32
    %46 = vector.broadcast %cst_13 : f32 to vector<8x128xf32>
    %47 = arith.cmpf oge, %0, %46 : vector<8x128xf32>
    %48 = arith.extui %47 : vector<8x128xi1> to vector<8x128xi32>
    %49 = arith.sitofp %48 : vector<8x128xi32> to vector<8x128xf32>
    %cst_14 = arith.constant 1.800000e+00 : f32
    %50 = vector.broadcast %cst_14 : f32 to vector<8x128xf32>
    %51 = arith.cmpf oge, %0, %50 : vector<8x128xf32>
    %52 = arith.extui %51 : vector<8x128xi1> to vector<8x128xi32>
    %53 = arith.sitofp %52 : vector<8x128xi32> to vector<8x128xf32>
    %cst_15 = arith.constant 2.200000e+00 : f32
    %54 = vector.broadcast %cst_15 : f32 to vector<8x128xf32>
    %55 = arith.cmpf oge, %0, %54 : vector<8x128xf32>
    %56 = arith.extui %55 : vector<8x128xi1> to vector<8x128xi32>
    %57 = arith.sitofp %56 : vector<8x128xi32> to vector<8x128xf32>
    %58 = arith.subf %13, %17 : vector<8x128xf32>
    %59 = arith.subf %17, %21 : vector<8x128xf32>
    %60 = arith.subf %21, %25 : vector<8x128xf32>
    %61 = arith.subf %25, %29 : vector<8x128xf32>
    %62 = arith.subf %29, %33 : vector<8x128xf32>
    %63 = arith.subf %33, %37 : vector<8x128xf32>
    %64 = arith.subf %37, %41 : vector<8x128xf32>
    %65 = arith.subf %41, %45 : vector<8x128xf32>
    %66 = arith.subf %45, %49 : vector<8x128xf32>
    %67 = arith.subf %49, %53 : vector<8x128xf32>
    %68 = arith.subf %53, %57 : vector<8x128xf32>
    %cst_16 = arith.constant 2.49999952 : f32
    %69 = vector.broadcast %cst_16 : f32 to vector<8x128xf32>
    %70 = arith.mulf %0, %69 : vector<8x128xf32>
    %cst_17 = arith.constant -5.49999905 : f32
    %71 = vector.broadcast %cst_17 : f32 to vector<8x128xf32>
    %72 = arith.subf %70, %71 : vector<8x128xf32>
    %cst_18 = arith.constant -4.49999905 : f32
    %73 = vector.broadcast %cst_18 : f32 to vector<8x128xf32>
    %74 = arith.subf %70, %73 : vector<8x128xf32>
    %cst_19 = arith.constant -3.49999905 : f32
    %75 = vector.broadcast %cst_19 : f32 to vector<8x128xf32>
    %76 = arith.subf %70, %75 : vector<8x128xf32>
    %cst_20 = arith.constant -2.49999952 : f32
    %77 = vector.broadcast %cst_20 : f32 to vector<8x128xf32>
    %78 = arith.subf %70, %77 : vector<8x128xf32>
    %cst_21 = arith.constant -1.49999976 : f32
    %79 = vector.broadcast %cst_21 : f32 to vector<8x128xf32>
    %80 = arith.subf %70, %79 : vector<8x128xf32>
    %cst_22 = arith.constant -0.499999851 : f32
    %81 = vector.broadcast %cst_22 : f32 to vector<8x128xf32>
    %82 = arith.subf %70, %81 : vector<8x128xf32>
    %cst_23 = arith.constant 5.000000e-01 : f32
    %83 = vector.broadcast %cst_23 : f32 to vector<8x128xf32>
    %84 = arith.subf %70, %83 : vector<8x128xf32>
    %cst_24 = arith.constant 1.49999976 : f32
    %85 = vector.broadcast %cst_24 : f32 to vector<8x128xf32>
    %86 = arith.subf %70, %85 : vector<8x128xf32>
    %cst_25 = arith.constant 2.49999952 : f32
    %87 = vector.broadcast %cst_25 : f32 to vector<8x128xf32>
    %88 = arith.subf %70, %87 : vector<8x128xf32>
    %cst_26 = arith.constant 3.49999952 : f32
    %89 = vector.broadcast %cst_26 : f32 to vector<8x128xf32>
    %90 = arith.subf %70, %89 : vector<8x128xf32>
    %cst_27 = arith.constant 4.49999905 : f32
    %91 = vector.broadcast %cst_27 : f32 to vector<8x128xf32>
    %92 = arith.subf %70, %91 : vector<8x128xf32>
    %93 = arith.mulf %72, %58 : vector<8x128xf32>
    %cst_28 = arith.constant 1.000000e+00 : f32
    %94 = vector.broadcast %cst_28 : f32 to vector<8x128xf32>
    %95 = arith.subf %94, %74 : vector<8x128xf32>
    %96 = arith.mulf %95, %59 : vector<8x128xf32>
    %97 = arith.addf %93, %96 : vector<8x128xf32>
    %98 = arith.mulf %74, %59 : vector<8x128xf32>
    %cst_29 = arith.constant 1.000000e+00 : f32
    %99 = vector.broadcast %cst_29 : f32 to vector<8x128xf32>
    %100 = arith.subf %99, %76 : vector<8x128xf32>
    %101 = arith.mulf %100, %60 : vector<8x128xf32>
    %102 = arith.addf %98, %101 : vector<8x128xf32>
    %103 = arith.mulf %76, %60 : vector<8x128xf32>
    %cst_30 = arith.constant 1.000000e+00 : f32
    %104 = vector.broadcast %cst_30 : f32 to vector<8x128xf32>
    %105 = arith.subf %104, %78 : vector<8x128xf32>
    %106 = arith.mulf %105, %61 : vector<8x128xf32>
    %107 = arith.addf %103, %106 : vector<8x128xf32>
    %108 = arith.mulf %78, %61 : vector<8x128xf32>
    %cst_31 = arith.constant 1.000000e+00 : f32
    %109 = vector.broadcast %cst_31 : f32 to vector<8x128xf32>
    %110 = arith.subf %109, %80 : vector<8x128xf32>
    %111 = arith.mulf %110, %62 : vector<8x128xf32>
    %112 = arith.addf %108, %111 : vector<8x128xf32>
    %113 = arith.mulf %80, %62 : vector<8x128xf32>
    %cst_32 = arith.constant 1.000000e+00 : f32
    %114 = vector.broadcast %cst_32 : f32 to vector<8x128xf32>
    %115 = arith.subf %114, %82 : vector<8x128xf32>
    %116 = arith.mulf %115, %63 : vector<8x128xf32>
    %117 = arith.addf %113, %116 : vector<8x128xf32>
    %118 = arith.mulf %82, %63 : vector<8x128xf32>
    %cst_33 = arith.constant 1.000000e+00 : f32
    %119 = vector.broadcast %cst_33 : f32 to vector<8x128xf32>
    %120 = arith.subf %119, %84 : vector<8x128xf32>
    %121 = arith.mulf %120, %64 : vector<8x128xf32>
    %122 = arith.addf %118, %121 : vector<8x128xf32>
    %123 = arith.mulf %84, %64 : vector<8x128xf32>
    %cst_34 = arith.constant 1.000000e+00 : f32
    %124 = vector.broadcast %cst_34 : f32 to vector<8x128xf32>
    %125 = arith.subf %124, %86 : vector<8x128xf32>
    %126 = arith.mulf %125, %65 : vector<8x128xf32>
    %127 = arith.addf %123, %126 : vector<8x128xf32>
    %128 = arith.mulf %86, %65 : vector<8x128xf32>
    %cst_35 = arith.constant 1.000000e+00 : f32
    %129 = vector.broadcast %cst_35 : f32 to vector<8x128xf32>
    %130 = arith.subf %129, %88 : vector<8x128xf32>
    %131 = arith.mulf %130, %66 : vector<8x128xf32>
    %132 = arith.addf %128, %131 : vector<8x128xf32>
    %133 = arith.mulf %88, %66 : vector<8x128xf32>
    %cst_36 = arith.constant 1.000000e+00 : f32
    %134 = vector.broadcast %cst_36 : f32 to vector<8x128xf32>
    %135 = arith.subf %134, %90 : vector<8x128xf32>
    %136 = arith.mulf %135, %67 : vector<8x128xf32>
    %137 = arith.addf %133, %136 : vector<8x128xf32>
    %138 = arith.mulf %90, %67 : vector<8x128xf32>
    %cst_37 = arith.constant 1.000000e+00 : f32
    %139 = vector.broadcast %cst_37 : f32 to vector<8x128xf32>
    %140 = arith.subf %139, %92 : vector<8x128xf32>
    %141 = arith.mulf %140, %68 : vector<8x128xf32>
    %142 = arith.addf %138, %141 : vector<8x128xf32>
    %cst_38 = arith.constant 1.24999976 : f32
    %143 = vector.broadcast %cst_38 : f32 to vector<8x128xf32>
    %144 = arith.mulf %0, %143 : vector<8x128xf32>
    %cst_39 = arith.constant -2.74999952 : f32
    %145 = vector.broadcast %cst_39 : f32 to vector<8x128xf32>
    %146 = arith.subf %144, %145 : vector<8x128xf32>
    %cst_40 = arith.constant -2.24999952 : f32
    %147 = vector.broadcast %cst_40 : f32 to vector<8x128xf32>
    %148 = arith.subf %144, %147 : vector<8x128xf32>
    %cst_41 = arith.constant -1.74999952 : f32
    %149 = vector.broadcast %cst_41 : f32 to vector<8x128xf32>
    %150 = arith.subf %144, %149 : vector<8x128xf32>
    %cst_42 = arith.constant -1.24999976 : f32
    %151 = vector.broadcast %cst_42 : f32 to vector<8x128xf32>
    %152 = arith.subf %144, %151 : vector<8x128xf32>
    %cst_43 = arith.constant -0.749999881 : f32
    %153 = vector.broadcast %cst_43 : f32 to vector<8x128xf32>
    %154 = arith.subf %144, %153 : vector<8x128xf32>
    %cst_44 = arith.constant -0.249999925 : f32
    %155 = vector.broadcast %cst_44 : f32 to vector<8x128xf32>
    %156 = arith.subf %144, %155 : vector<8x128xf32>
    %cst_45 = arith.constant 2.500000e-01 : f32
    %157 = vector.broadcast %cst_45 : f32 to vector<8x128xf32>
    %158 = arith.subf %144, %157 : vector<8x128xf32>
    %cst_46 = arith.constant 0.749999881 : f32
    %159 = vector.broadcast %cst_46 : f32 to vector<8x128xf32>
    %160 = arith.subf %144, %159 : vector<8x128xf32>
    %cst_47 = arith.constant 1.24999976 : f32
    %161 = vector.broadcast %cst_47 : f32 to vector<8x128xf32>
    %162 = arith.subf %144, %161 : vector<8x128xf32>
    %cst_48 = arith.constant 1.74999976 : f32
    %163 = vector.broadcast %cst_48 : f32 to vector<8x128xf32>
    %164 = arith.subf %144, %163 : vector<8x128xf32>
    %165 = arith.mulf %146, %97 : vector<8x128xf32>
    %cst_49 = arith.constant 1.000000e+00 : f32
    %166 = vector.broadcast %cst_49 : f32 to vector<8x128xf32>
    %167 = arith.subf %166, %148 : vector<8x128xf32>
    %168 = arith.mulf %167, %102 : vector<8x128xf32>
    %169 = arith.addf %165, %168 : vector<8x128xf32>
    %170 = arith.mulf %148, %102 : vector<8x128xf32>
    %cst_50 = arith.constant 1.000000e+00 : f32
    %171 = vector.broadcast %cst_50 : f32 to vector<8x128xf32>
    %172 = arith.subf %171, %150 : vector<8x128xf32>
    %173 = arith.mulf %172, %107 : vector<8x128xf32>
    %174 = arith.addf %170, %173 : vector<8x128xf32>
    %175 = arith.mulf %150, %107 : vector<8x128xf32>
    %cst_51 = arith.constant 1.000000e+00 : f32
    %176 = vector.broadcast %cst_51 : f32 to vector<8x128xf32>
    %177 = arith.subf %176, %152 : vector<8x128xf32>
    %178 = arith.mulf %177, %112 : vector<8x128xf32>
    %179 = arith.addf %175, %178 : vector<8x128xf32>
    %180 = arith.mulf %152, %112 : vector<8x128xf32>
    %cst_52 = arith.constant 1.000000e+00 : f32
    %181 = vector.broadcast %cst_52 : f32 to vector<8x128xf32>
    %182 = arith.subf %181, %154 : vector<8x128xf32>
    %183 = arith.mulf %182, %117 : vector<8x128xf32>
    %184 = arith.addf %180, %183 : vector<8x128xf32>
    %185 = arith.mulf %154, %117 : vector<8x128xf32>
    %cst_53 = arith.constant 1.000000e+00 : f32
    %186 = vector.broadcast %cst_53 : f32 to vector<8x128xf32>
    %187 = arith.subf %186, %156 : vector<8x128xf32>
    %188 = arith.mulf %187, %122 : vector<8x128xf32>
    %189 = arith.addf %185, %188 : vector<8x128xf32>
    %190 = arith.mulf %156, %122 : vector<8x128xf32>
    %cst_54 = arith.constant 1.000000e+00 : f32
    %191 = vector.broadcast %cst_54 : f32 to vector<8x128xf32>
    %192 = arith.subf %191, %158 : vector<8x128xf32>
    %193 = arith.mulf %192, %127 : vector<8x128xf32>
    %194 = arith.addf %190, %193 : vector<8x128xf32>
    %195 = arith.mulf %158, %127 : vector<8x128xf32>
    %cst_55 = arith.constant 1.000000e+00 : f32
    %196 = vector.broadcast %cst_55 : f32 to vector<8x128xf32>
    %197 = arith.subf %196, %160 : vector<8x128xf32>
    %198 = arith.mulf %197, %132 : vector<8x128xf32>
    %199 = arith.addf %195, %198 : vector<8x128xf32>
    %200 = arith.mulf %160, %132 : vector<8x128xf32>
    %cst_56 = arith.constant 1.000000e+00 : f32
    %201 = vector.broadcast %cst_56 : f32 to vector<8x128xf32>
    %202 = arith.subf %201, %162 : vector<8x128xf32>
    %203 = arith.mulf %202, %137 : vector<8x128xf32>
    %204 = arith.addf %200, %203 : vector<8x128xf32>
    %205 = arith.mulf %162, %137 : vector<8x128xf32>
    %cst_57 = arith.constant 1.000000e+00 : f32
    %206 = vector.broadcast %cst_57 : f32 to vector<8x128xf32>
    %207 = arith.subf %206, %164 : vector<8x128xf32>
    %208 = arith.mulf %207, %142 : vector<8x128xf32>
    %209 = arith.addf %205, %208 : vector<8x128xf32>
    %cst_58 = arith.constant 0.833333134 : f32
    %210 = vector.broadcast %cst_58 : f32 to vector<8x128xf32>
    %211 = arith.mulf %0, %210 : vector<8x128xf32>
    %cst_59 = arith.constant -1.8333329 : f32
    %212 = vector.broadcast %cst_59 : f32 to vector<8x128xf32>
    %213 = arith.subf %211, %212 : vector<8x128xf32>
    %cst_60 = arith.constant -1.49999964 : f32
    %214 = vector.broadcast %cst_60 : f32 to vector<8x128xf32>
    %215 = arith.subf %211, %214 : vector<8x128xf32>
    %cst_61 = arith.constant -1.16666639 : f32
    %216 = vector.broadcast %cst_61 : f32 to vector<8x128xf32>
    %217 = arith.subf %211, %216 : vector<8x128xf32>
    %cst_62 = arith.constant -0.833333134 : f32
    %218 = vector.broadcast %cst_62 : f32 to vector<8x128xf32>
    %219 = arith.subf %211, %218 : vector<8x128xf32>
    %cst_63 = arith.constant -0.499999911 : f32
    %220 = vector.broadcast %cst_63 : f32 to vector<8x128xf32>
    %221 = arith.subf %211, %220 : vector<8x128xf32>
    %cst_64 = arith.constant -0.166666612 : f32
    %222 = vector.broadcast %cst_64 : f32 to vector<8x128xf32>
    %223 = arith.subf %211, %222 : vector<8x128xf32>
    %cst_65 = arith.constant 0.166666672 : f32
    %224 = vector.broadcast %cst_65 : f32 to vector<8x128xf32>
    %225 = arith.subf %211, %224 : vector<8x128xf32>
    %cst_66 = arith.constant 0.499999911 : f32
    %226 = vector.broadcast %cst_66 : f32 to vector<8x128xf32>
    %227 = arith.subf %211, %226 : vector<8x128xf32>
    %cst_67 = arith.constant 0.833333134 : f32
    %228 = vector.broadcast %cst_67 : f32 to vector<8x128xf32>
    %229 = arith.subf %211, %228 : vector<8x128xf32>
    %230 = arith.mulf %213, %169 : vector<8x128xf32>
    %cst_68 = arith.constant 1.000000e+00 : f32
    %231 = vector.broadcast %cst_68 : f32 to vector<8x128xf32>
    %232 = arith.subf %231, %215 : vector<8x128xf32>
    %233 = arith.mulf %232, %174 : vector<8x128xf32>
    %234 = arith.addf %230, %233 : vector<8x128xf32>
    %235 = arith.mulf %215, %174 : vector<8x128xf32>
    %cst_69 = arith.constant 1.000000e+00 : f32
    %236 = vector.broadcast %cst_69 : f32 to vector<8x128xf32>
    %237 = arith.subf %236, %217 : vector<8x128xf32>
    %238 = arith.mulf %237, %179 : vector<8x128xf32>
    %239 = arith.addf %235, %238 : vector<8x128xf32>
    %240 = arith.mulf %217, %179 : vector<8x128xf32>
    %cst_70 = arith.constant 1.000000e+00 : f32
    %241 = vector.broadcast %cst_70 : f32 to vector<8x128xf32>
    %242 = arith.subf %241, %219 : vector<8x128xf32>
    %243 = arith.mulf %242, %184 : vector<8x128xf32>
    %244 = arith.addf %240, %243 : vector<8x128xf32>
    %245 = arith.mulf %219, %184 : vector<8x128xf32>
    %cst_71 = arith.constant 1.000000e+00 : f32
    %246 = vector.broadcast %cst_71 : f32 to vector<8x128xf32>
    %247 = arith.subf %246, %221 : vector<8x128xf32>
    %248 = arith.mulf %247, %189 : vector<8x128xf32>
    %249 = arith.addf %245, %248 : vector<8x128xf32>
    %250 = arith.mulf %221, %189 : vector<8x128xf32>
    %cst_72 = arith.constant 1.000000e+00 : f32
    %251 = vector.broadcast %cst_72 : f32 to vector<8x128xf32>
    %252 = arith.subf %251, %223 : vector<8x128xf32>
    %253 = arith.mulf %252, %194 : vector<8x128xf32>
    %254 = arith.addf %250, %253 : vector<8x128xf32>
    %255 = arith.mulf %223, %194 : vector<8x128xf32>
    %cst_73 = arith.constant 1.000000e+00 : f32
    %256 = vector.broadcast %cst_73 : f32 to vector<8x128xf32>
    %257 = arith.subf %256, %225 : vector<8x128xf32>
    %258 = arith.mulf %257, %199 : vector<8x128xf32>
    %259 = arith.addf %255, %258 : vector<8x128xf32>
    %260 = arith.mulf %225, %199 : vector<8x128xf32>
    %cst_74 = arith.constant 1.000000e+00 : f32
    %261 = vector.broadcast %cst_74 : f32 to vector<8x128xf32>
    %262 = arith.subf %261, %227 : vector<8x128xf32>
    %263 = arith.mulf %262, %204 : vector<8x128xf32>
    %264 = arith.addf %260, %263 : vector<8x128xf32>
    %265 = arith.mulf %227, %204 : vector<8x128xf32>
    %cst_75 = arith.constant 1.000000e+00 : f32
    %266 = vector.broadcast %cst_75 : f32 to vector<8x128xf32>
    %267 = arith.subf %266, %229 : vector<8x128xf32>
    %268 = arith.mulf %267, %209 : vector<8x128xf32>
    %269 = arith.addf %265, %268 : vector<8x128xf32>
    %270 = arith.truncf %234 : vector<8x128xf32> to vector<8x128xbf16>
    %271 = arith.truncf %239 : vector<8x128xf32> to vector<8x128xbf16>
    %272 = arith.truncf %244 : vector<8x128xf32> to vector<8x128xbf16>
    %273 = arith.truncf %249 : vector<8x128xf32> to vector<8x128xbf16>
    %274 = arith.truncf %254 : vector<8x128xf32> to vector<8x128xbf16>
    %275 = arith.truncf %259 : vector<8x128xf32> to vector<8x128xbf16>
    %276 = arith.truncf %264 : vector<8x128xf32> to vector<8x128xbf16>
    %277 = arith.truncf %269 : vector<8x128xf32> to vector<8x128xbf16>
    %278 = tpu.concatenate %9, %270, %271, %272, %273, %274, %275, %276, %277 in 1 : vector<8x128xbf16>, vector<8x128xbf16>, vector<8x128xbf16>, vector<8x128xbf16>, vector<8x128xbf16>, vector<8x128xbf16>, vector<8x128xbf16>, vector<8x128xbf16>, vector<8x128xbf16> -> vector<8x1152xbf16>
    %cst_76 = arith.constant dense<0.000000e+00> : vector<8x128xf32>
    %279 = tpu.matmul %278, %1, %cst_76 {dimension_numbers = #tpu.dot_dimension_numbers<[1], [0], [0], [1], [0, 0, 1, 1], [], []>} : vector<8x1152xbf16>, vector<1152x128xbf16>, vector<8x128xf32> -> vector<8x128xf32>
    %c0_77 = arith.constant 0 : index
    %c0_78 = arith.constant 0 : index
    %280 = vector.load %arg3[%c0_77, %c0_78] : memref<1152x128xbf16, #tpu.memory_space<vmem>>, vector<1152x128xbf16>
    %cst_79 = arith.constant 0.000000e+00 : f32
    %281 = vector.broadcast %cst_79 : f32 to vector<8x128xf32>
    %282 = arith.subf %281, %279 : vector<8x128xf32>
    %283 = math.exp %282 : vector<8x128xf32>
    %cst_80 = arith.constant 1.000000e+00 : f32
    %284 = vector.broadcast %cst_80 : f32 to vector<8x128xf32>
    %285 = arith.addf %284, %283 : vector<8x128xf32>
    %286 = tpu.reciprocal %285 {approx = true} : vector<8x128xf32> -> vector<8x128xf32>
    %287 = arith.mulf %279, %286 : vector<8x128xf32>
    %288 = arith.truncf %287 : vector<8x128xf32> to vector<8x128xbf16>
    %cst_81 = arith.constant -2.200000e+00 : f32
    %289 = vector.broadcast %cst_81 : f32 to vector<8x128xf32>
    %290 = arith.cmpf oge, %279, %289 : vector<8x128xf32>
    %291 = arith.extui %290 : vector<8x128xi1> to vector<8x128xi32>
    %292 = arith.sitofp %291 : vector<8x128xi32> to vector<8x128xf32>
    %cst_82 = arith.constant -1.800000e+00 : f32
    %293 = vector.broadcast %cst_82 : f32 to vector<8x128xf32>
    %294 = arith.cmpf oge, %279, %293 : vector<8x128xf32>
    %295 = arith.extui %294 : vector<8x128xi1> to vector<8x128xi32>
    %296 = arith.sitofp %295 : vector<8x128xi32> to vector<8x128xf32>
    %cst_83 = arith.constant -1.400000e+00 : f32
    %297 = vector.broadcast %cst_83 : f32 to vector<8x128xf32>
    %298 = arith.cmpf oge, %279, %297 : vector<8x128xf32>
    %299 = arith.extui %298 : vector<8x128xi1> to vector<8x128xi32>
    %300 = arith.sitofp %299 : vector<8x128xi32> to vector<8x128xf32>
    %cst_84 = arith.constant -1.000000e+00 : f32
    %301 = vector.broadcast %cst_84 : f32 to vector<8x128xf32>
    %302 = arith.cmpf oge, %279, %301 : vector<8x128xf32>
    %303 = arith.extui %302 : vector<8x128xi1> to vector<8x128xi32>
    %304 = arith.sitofp %303 : vector<8x128xi32> to vector<8x128xf32>
    %cst_85 = arith.constant -6.000000e-01 : f32
    %305 = vector.broadcast %cst_85 : f32 to vector<8x128xf32>
    %306 = arith.cmpf oge, %279, %305 : vector<8x128xf32>
    %307 = arith.extui %306 : vector<8x128xi1> to vector<8x128xi32>
    %308 = arith.sitofp %307 : vector<8x128xi32> to vector<8x128xf32>
    %cst_86 = arith.constant -0.199999988 : f32
    %309 = vector.broadcast %cst_86 : f32 to vector<8x128xf32>
    %310 = arith.cmpf oge, %279, %309 : vector<8x128xf32>
    %311 = arith.extui %310 : vector<8x128xi1> to vector<8x128xi32>
    %312 = arith.sitofp %311 : vector<8x128xi32> to vector<8x128xf32>
    %cst_87 = arith.constant 0.200000048 : f32
    %313 = vector.broadcast %cst_87 : f32 to vector<8x128xf32>
    %314 = arith.cmpf oge, %279, %313 : vector<8x128xf32>
    %315 = arith.extui %314 : vector<8x128xi1> to vector<8x128xi32>
    %316 = arith.sitofp %315 : vector<8x128xi32> to vector<8x128xf32>
    %cst_88 = arith.constant 6.000000e-01 : f32
    %317 = vector.broadcast %cst_88 : f32 to vector<8x128xf32>
    %318 = arith.cmpf oge, %279, %317 : vector<8x128xf32>
    %319 = arith.extui %318 : vector<8x128xi1> to vector<8x128xi32>
    %320 = arith.sitofp %319 : vector<8x128xi32> to vector<8x128xf32>
    %cst_89 = arith.constant 1.000000e+00 : f32
    %321 = vector.broadcast %cst_89 : f32 to vector<8x128xf32>
    %322 = arith.cmpf oge, %279, %321 : vector<8x128xf32>
    %323 = arith.extui %322 : vector<8x128xi1> to vector<8x128xi32>
    %324 = arith.sitofp %323 : vector<8x128xi32> to vector<8x128xf32>
    %cst_90 = arith.constant 1.4000001 : f32
    %325 = vector.broadcast %cst_90 : f32 to vector<8x128xf32>
    %326 = arith.cmpf oge, %279, %325 : vector<8x128xf32>
    %327 = arith.extui %326 : vector<8x128xi1> to vector<8x128xi32>
    %328 = arith.sitofp %327 : vector<8x128xi32> to vector<8x128xf32>
    %cst_91 = arith.constant 1.800000e+00 : f32
    %329 = vector.broadcast %cst_91 : f32 to vector<8x128xf32>
    %330 = arith.cmpf oge, %279, %329 : vector<8x128xf32>
    %331 = arith.extui %330 : vector<8x128xi1> to vector<8x128xi32>
    %332 = arith.sitofp %331 : vector<8x128xi32> to vector<8x128xf32>
    %cst_92 = arith.constant 2.200000e+00 : f32
    %333 = vector.broadcast %cst_92 : f32 to vector<8x128xf32>
    %334 = arith.cmpf oge, %279, %333 : vector<8x128xf32>
    %335 = arith.extui %334 : vector<8x128xi1> to vector<8x128xi32>
    %336 = arith.sitofp %335 : vector<8x128xi32> to vector<8x128xf32>
    %337 = arith.subf %292, %296 : vector<8x128xf32>
    %338 = arith.subf %296, %300 : vector<8x128xf32>
    %339 = arith.subf %300, %304 : vector<8x128xf32>
    %340 = arith.subf %304, %308 : vector<8x128xf32>
    %341 = arith.subf %308, %312 : vector<8x128xf32>
    %342 = arith.subf %312, %316 : vector<8x128xf32>
    %343 = arith.subf %316, %320 : vector<8x128xf32>
    %344 = arith.subf %320, %324 : vector<8x128xf32>
    %345 = arith.subf %324, %328 : vector<8x128xf32>
    %346 = arith.subf %328, %332 : vector<8x128xf32>
    %347 = arith.subf %332, %336 : vector<8x128xf32>
    %cst_93 = arith.constant 2.49999952 : f32
    %348 = vector.broadcast %cst_93 : f32 to vector<8x128xf32>
    %349 = arith.mulf %279, %348 : vector<8x128xf32>
    %cst_94 = arith.constant -5.49999905 : f32
    %350 = vector.broadcast %cst_94 : f32 to vector<8x128xf32>
    %351 = arith.subf %349, %350 : vector<8x128xf32>
    %cst_95 = arith.constant -4.49999905 : f32
    %352 = vector.broadcast %cst_95 : f32 to vector<8x128xf32>
    %353 = arith.subf %349, %352 : vector<8x128xf32>
    %cst_96 = arith.constant -3.49999905 : f32
    %354 = vector.broadcast %cst_96 : f32 to vector<8x128xf32>
    %355 = arith.subf %349, %354 : vector<8x128xf32>
    %cst_97 = arith.constant -2.49999952 : f32
    %356 = vector.broadcast %cst_97 : f32 to vector<8x128xf32>
    %357 = arith.subf %349, %356 : vector<8x128xf32>
    %cst_98 = arith.constant -1.49999976 : f32
    %358 = vector.broadcast %cst_98 : f32 to vector<8x128xf32>
    %359 = arith.subf %349, %358 : vector<8x128xf32>
    %cst_99 = arith.constant -0.499999851 : f32
    %360 = vector.broadcast %cst_99 : f32 to vector<8x128xf32>
    %361 = arith.subf %349, %360 : vector<8x128xf32>
    %cst_100 = arith.constant 5.000000e-01 : f32
    %362 = vector.broadcast %cst_100 : f32 to vector<8x128xf32>
    %363 = arith.subf %349, %362 : vector<8x128xf32>
    %cst_101 = arith.constant 1.49999976 : f32
    %364 = vector.broadcast %cst_101 : f32 to vector<8x128xf32>
    %365 = arith.subf %349, %364 : vector<8x128xf32>
    %cst_102 = arith.constant 2.49999952 : f32
    %366 = vector.broadcast %cst_102 : f32 to vector<8x128xf32>
    %367 = arith.subf %349, %366 : vector<8x128xf32>
    %cst_103 = arith.constant 3.49999952 : f32
    %368 = vector.broadcast %cst_103 : f32 to vector<8x128xf32>
    %369 = arith.subf %349, %368 : vector<8x128xf32>
    %cst_104 = arith.constant 4.49999905 : f32
    %370 = vector.broadcast %cst_104 : f32 to vector<8x128xf32>
    %371 = arith.subf %349, %370 : vector<8x128xf32>
    %372 = arith.mulf %351, %337 : vector<8x128xf32>
    %cst_105 = arith.constant 1.000000e+00 : f32
    %373 = vector.broadcast %cst_105 : f32 to vector<8x128xf32>
    %374 = arith.subf %373, %353 : vector<8x128xf32>
    %375 = arith.mulf %374, %338 : vector<8x128xf32>
    %376 = arith.addf %372, %375 : vector<8x128xf32>
    %377 = arith.mulf %353, %338 : vector<8x128xf32>
    %cst_106 = arith.constant 1.000000e+00 : f32
    %378 = vector.broadcast %cst_106 : f32 to vector<8x128xf32>
    %379 = arith.subf %378, %355 : vector<8x128xf32>
    %380 = arith.mulf %379, %339 : vector<8x128xf32>
    %381 = arith.addf %377, %380 : vector<8x128xf32>
    %382 = arith.mulf %355, %339 : vector<8x128xf32>
    %cst_107 = arith.constant 1.000000e+00 : f32
    %383 = vector.broadcast %cst_107 : f32 to vector<8x128xf32>
    %384 = arith.subf %383, %357 : vector<8x128xf32>
    %385 = arith.mulf %384, %340 : vector<8x128xf32>
    %386 = arith.addf %382, %385 : vector<8x128xf32>
    %387 = arith.mulf %357, %340 : vector<8x128xf32>
    %cst_108 = arith.constant 1.000000e+00 : f32
    %388 = vector.broadcast %cst_108 : f32 to vector<8x128xf32>
    %389 = arith.subf %388, %359 : vector<8x128xf32>
    %390 = arith.mulf %389, %341 : vector<8x128xf32>
    %391 = arith.addf %387, %390 : vector<8x128xf32>
    %392 = arith.mulf %359, %341 : vector<8x128xf32>
    %cst_109 = arith.constant 1.000000e+00 : f32
    %393 = vector.broadcast %cst_109 : f32 to vector<8x128xf32>
    %394 = arith.subf %393, %361 : vector<8x128xf32>
    %395 = arith.mulf %394, %342 : vector<8x128xf32>
    %396 = arith.addf %392, %395 : vector<8x128xf32>
    %397 = arith.mulf %361, %342 : vector<8x128xf32>
    %cst_110 = arith.constant 1.000000e+00 : f32
    %398 = vector.broadcast %cst_110 : f32 to vector<8x128xf32>
    %399 = arith.subf %398, %363 : vector<8x128xf32>
    %400 = arith.mulf %399, %343 : vector<8x128xf32>
    %401 = arith.addf %397, %400 : vector<8x128xf32>
    %402 = arith.mulf %363, %343 : vector<8x128xf32>
    %cst_111 = arith.constant 1.000000e+00 : f32
    %403 = vector.broadcast %cst_111 : f32 to vector<8x128xf32>
    %404 = arith.subf %403, %365 : vector<8x128xf32>
    %405 = arith.mulf %404, %344 : vector<8x128xf32>
    %406 = arith.addf %402, %405 : vector<8x128xf32>
    %407 = arith.mulf %365, %344 : vector<8x128xf32>
    %cst_112 = arith.constant 1.000000e+00 : f32
    %408 = vector.broadcast %cst_112 : f32 to vector<8x128xf32>
    %409 = arith.subf %408, %367 : vector<8x128xf32>
    %410 = arith.mulf %409, %345 : vector<8x128xf32>
    %411 = arith.addf %407, %410 : vector<8x128xf32>
    %412 = arith.mulf %367, %345 : vector<8x128xf32>
    %cst_113 = arith.constant 1.000000e+00 : f32
    %413 = vector.broadcast %cst_113 : f32 to vector<8x128xf32>
    %414 = arith.subf %413, %369 : vector<8x128xf32>
    %415 = arith.mulf %414, %346 : vector<8x128xf32>
    %416 = arith.addf %412, %415 : vector<8x128xf32>
    %417 = arith.mulf %369, %346 : vector<8x128xf32>
    %cst_114 = arith.constant 1.000000e+00 : f32
    %418 = vector.broadcast %cst_114 : f32 to vector<8x128xf32>
    %419 = arith.subf %418, %371 : vector<8x128xf32>
    %420 = arith.mulf %419, %347 : vector<8x128xf32>
    %421 = arith.addf %417, %420 : vector<8x128xf32>
    %cst_115 = arith.constant 1.24999976 : f32
    %422 = vector.broadcast %cst_115 : f32 to vector<8x128xf32>
    %423 = arith.mulf %279, %422 : vector<8x128xf32>
    %cst_116 = arith.constant -2.74999952 : f32
    %424 = vector.broadcast %cst_116 : f32 to vector<8x128xf32>
    %425 = arith.subf %423, %424 : vector<8x128xf32>
    %cst_117 = arith.constant -2.24999952 : f32
    %426 = vector.broadcast %cst_117 : f32 to vector<8x128xf32>
    %427 = arith.subf %423, %426 : vector<8x128xf32>
    %cst_118 = arith.constant -1.74999952 : f32
    %428 = vector.broadcast %cst_118 : f32 to vector<8x128xf32>
    %429 = arith.subf %423, %428 : vector<8x128xf32>
    %cst_119 = arith.constant -1.24999976 : f32
    %430 = vector.broadcast %cst_119 : f32 to vector<8x128xf32>
    %431 = arith.subf %423, %430 : vector<8x128xf32>
    %cst_120 = arith.constant -0.749999881 : f32
    %432 = vector.broadcast %cst_120 : f32 to vector<8x128xf32>
    %433 = arith.subf %423, %432 : vector<8x128xf32>
    %cst_121 = arith.constant -0.249999925 : f32
    %434 = vector.broadcast %cst_121 : f32 to vector<8x128xf32>
    %435 = arith.subf %423, %434 : vector<8x128xf32>
    %cst_122 = arith.constant 2.500000e-01 : f32
    %436 = vector.broadcast %cst_122 : f32 to vector<8x128xf32>
    %437 = arith.subf %423, %436 : vector<8x128xf32>
    %cst_123 = arith.constant 0.749999881 : f32
    %438 = vector.broadcast %cst_123 : f32 to vector<8x128xf32>
    %439 = arith.subf %423, %438 : vector<8x128xf32>
    %cst_124 = arith.constant 1.24999976 : f32
    %440 = vector.broadcast %cst_124 : f32 to vector<8x128xf32>
    %441 = arith.subf %423, %440 : vector<8x128xf32>
    %cst_125 = arith.constant 1.74999976 : f32
    %442 = vector.broadcast %cst_125 : f32 to vector<8x128xf32>
    %443 = arith.subf %423, %442 : vector<8x128xf32>
    %444 = arith.mulf %425, %376 : vector<8x128xf32>
    %cst_126 = arith.constant 1.000000e+00 : f32
    %445 = vector.broadcast %cst_126 : f32 to vector<8x128xf32>
    %446 = arith.subf %445, %427 : vector<8x128xf32>
    %447 = arith.mulf %446, %381 : vector<8x128xf32>
    %448 = arith.addf %444, %447 : vector<8x128xf32>
    %449 = arith.mulf %427, %381 : vector<8x128xf32>
    %cst_127 = arith.constant 1.000000e+00 : f32
    %450 = vector.broadcast %cst_127 : f32 to vector<8x128xf32>
    %451 = arith.subf %450, %429 : vector<8x128xf32>
    %452 = arith.mulf %451, %386 : vector<8x128xf32>
    %453 = arith.addf %449, %452 : vector<8x128xf32>
    %454 = arith.mulf %429, %386 : vector<8x128xf32>
    %cst_128 = arith.constant 1.000000e+00 : f32
    %455 = vector.broadcast %cst_128 : f32 to vector<8x128xf32>
    %456 = arith.subf %455, %431 : vector<8x128xf32>
    %457 = arith.mulf %456, %391 : vector<8x128xf32>
    %458 = arith.addf %454, %457 : vector<8x128xf32>
    %459 = arith.mulf %431, %391 : vector<8x128xf32>
    %cst_129 = arith.constant 1.000000e+00 : f32
    %460 = vector.broadcast %cst_129 : f32 to vector<8x128xf32>
    %461 = arith.subf %460, %433 : vector<8x128xf32>
    %462 = arith.mulf %461, %396 : vector<8x128xf32>
    %463 = arith.addf %459, %462 : vector<8x128xf32>
    %464 = arith.mulf %433, %396 : vector<8x128xf32>
    %cst_130 = arith.constant 1.000000e+00 : f32
    %465 = vector.broadcast %cst_130 : f32 to vector<8x128xf32>
    %466 = arith.subf %465, %435 : vector<8x128xf32>
    %467 = arith.mulf %466, %401 : vector<8x128xf32>
    %468 = arith.addf %464, %467 : vector<8x128xf32>
    %469 = arith.mulf %435, %401 : vector<8x128xf32>
    %cst_131 = arith.constant 1.000000e+00 : f32
    %470 = vector.broadcast %cst_131 : f32 to vector<8x128xf32>
    %471 = arith.subf %470, %437 : vector<8x128xf32>
    %472 = arith.mulf %471, %406 : vector<8x128xf32>
    %473 = arith.addf %469, %472 : vector<8x128xf32>
    %474 = arith.mulf %437, %406 : vector<8x128xf32>
    %cst_132 = arith.constant 1.000000e+00 : f32
    %475 = vector.broadcast %cst_132 : f32 to vector<8x128xf32>
    %476 = arith.subf %475, %439 : vector<8x128xf32>
    %477 = arith.mulf %476, %411 : vector<8x128xf32>
    %478 = arith.addf %474, %477 : vector<8x128xf32>
    %479 = arith.mulf %439, %411 : vector<8x128xf32>
    %cst_133 = arith.constant 1.000000e+00 : f32
    %480 = vector.broadcast %cst_133 : f32 to vector<8x128xf32>
    %481 = arith.subf %480, %441 : vector<8x128xf32>
    %482 = arith.mulf %481, %416 : vector<8x128xf32>
    %483 = arith.addf %479, %482 : vector<8x128xf32>
    %484 = arith.mulf %441, %416 : vector<8x128xf32>
    %cst_134 = arith.constant 1.000000e+00 : f32
    %485 = vector.broadcast %cst_134 : f32 to vector<8x128xf32>
    %486 = arith.subf %485, %443 : vector<8x128xf32>
    %487 = arith.mulf %486, %421 : vector<8x128xf32>
    %488 = arith.addf %484, %487 : vector<8x128xf32>
    %cst_135 = arith.constant 0.833333134 : f32
    %489 = vector.broadcast %cst_135 : f32 to vector<8x128xf32>
    %490 = arith.mulf %279, %489 : vector<8x128xf32>
    %cst_136 = arith.constant -1.8333329 : f32
    %491 = vector.broadcast %cst_136 : f32 to vector<8x128xf32>
    %492 = arith.subf %490, %491 : vector<8x128xf32>
    %cst_137 = arith.constant -1.49999964 : f32
    %493 = vector.broadcast %cst_137 : f32 to vector<8x128xf32>
    %494 = arith.subf %490, %493 : vector<8x128xf32>
    %cst_138 = arith.constant -1.16666639 : f32
    %495 = vector.broadcast %cst_138 : f32 to vector<8x128xf32>
    %496 = arith.subf %490, %495 : vector<8x128xf32>
    %cst_139 = arith.constant -0.833333134 : f32
    %497 = vector.broadcast %cst_139 : f32 to vector<8x128xf32>
    %498 = arith.subf %490, %497 : vector<8x128xf32>
    %cst_140 = arith.constant -0.499999911 : f32
    %499 = vector.broadcast %cst_140 : f32 to vector<8x128xf32>
    %500 = arith.subf %490, %499 : vector<8x128xf32>
    %cst_141 = arith.constant -0.166666612 : f32
    %501 = vector.broadcast %cst_141 : f32 to vector<8x128xf32>
    %502 = arith.subf %490, %501 : vector<8x128xf32>
    %cst_142 = arith.constant 0.166666672 : f32
    %503 = vector.broadcast %cst_142 : f32 to vector<8x128xf32>
    %504 = arith.subf %490, %503 : vector<8x128xf32>
    %cst_143 = arith.constant 0.499999911 : f32
    %505 = vector.broadcast %cst_143 : f32 to vector<8x128xf32>
    %506 = arith.subf %490, %505 : vector<8x128xf32>
    %cst_144 = arith.constant 0.833333134 : f32
    %507 = vector.broadcast %cst_144 : f32 to vector<8x128xf32>
    %508 = arith.subf %490, %507 : vector<8x128xf32>
    %509 = arith.mulf %492, %448 : vector<8x128xf32>
    %cst_145 = arith.constant 1.000000e+00 : f32
    %510 = vector.broadcast %cst_145 : f32 to vector<8x128xf32>
    %511 = arith.subf %510, %494 : vector<8x128xf32>
    %512 = arith.mulf %511, %453 : vector<8x128xf32>
    %513 = arith.addf %509, %512 : vector<8x128xf32>
    %514 = arith.mulf %494, %453 : vector<8x128xf32>
    %cst_146 = arith.constant 1.000000e+00 : f32
    %515 = vector.broadcast %cst_146 : f32 to vector<8x128xf32>
    %516 = arith.subf %515, %496 : vector<8x128xf32>
    %517 = arith.mulf %516, %458 : vector<8x128xf32>
    %518 = arith.addf %514, %517 : vector<8x128xf32>
    %519 = arith.mulf %496, %458 : vector<8x128xf32>
    %cst_147 = arith.constant 1.000000e+00 : f32
    %520 = vector.broadcast %cst_147 : f32 to vector<8x128xf32>
    %521 = arith.subf %520, %498 : vector<8x128xf32>
    %522 = arith.mulf %521, %463 : vector<8x128xf32>
    %523 = arith.addf %519, %522 : vector<8x128xf32>
    %524 = arith.mulf %498, %463 : vector<8x128xf32>
    %cst_148 = arith.constant 1.000000e+00 : f32
    %525 = vector.broadcast %cst_148 : f32 to vector<8x128xf32>
    %526 = arith.subf %525, %500 : vector<8x128xf32>
    %527 = arith.mulf %526, %468 : vector<8x128xf32>
    %528 = arith.addf %524, %527 : vector<8x128xf32>
    %529 = arith.mulf %500, %468 : vector<8x128xf32>
    %cst_149 = arith.constant 1.000000e+00 : f32
    %530 = vector.broadcast %cst_149 : f32 to vector<8x128xf32>
    %531 = arith.subf %530, %502 : vector<8x128xf32>
    %532 = arith.mulf %531, %473 : vector<8x128xf32>
    %533 = arith.addf %529, %532 : vector<8x128xf32>
    %534 = arith.mulf %502, %473 : vector<8x128xf32>
    %cst_150 = arith.constant 1.000000e+00 : f32
    %535 = vector.broadcast %cst_150 : f32 to vector<8x128xf32>
    %536 = arith.subf %535, %504 : vector<8x128xf32>
    %537 = arith.mulf %536, %478 : vector<8x128xf32>
    %538 = arith.addf %534, %537 : vector<8x128xf32>
    %539 = arith.mulf %504, %478 : vector<8x128xf32>
    %cst_151 = arith.constant 1.000000e+00 : f32
    %540 = vector.broadcast %cst_151 : f32 to vector<8x128xf32>
    %541 = arith.subf %540, %506 : vector<8x128xf32>
    %542 = arith.mulf %541, %483 : vector<8x128xf32>
    %543 = arith.addf %539, %542 : vector<8x128xf32>
    %544 = arith.mulf %506, %483 : vector<8x128xf32>
    %cst_152 = arith.constant 1.000000e+00 : f32
    %545 = vector.broadcast %cst_152 : f32 to vector<8x128xf32>
    %546 = arith.subf %545, %508 : vector<8x128xf32>
    %547 = arith.mulf %546, %488 : vector<8x128xf32>
    %548 = arith.addf %544, %547 : vector<8x128xf32>
    %549 = arith.truncf %513 : vector<8x128xf32> to vector<8x128xbf16>
    %550 = arith.truncf %518 : vector<8x128xf32> to vector<8x128xbf16>
    %551 = arith.truncf %523 : vector<8x128xf32> to vector<8x128xbf16>
    %552 = arith.truncf %528 : vector<8x128xf32> to vector<8x128xbf16>
    %553 = arith.truncf %533 : vector<8x128xf32> to vector<8x128xbf16>
    %554 = arith.truncf %538 : vector<8x128xf32> to vector<8x128xbf16>
    %555 = arith.truncf %543 : vector<8x128xf32> to vector<8x128xbf16>
    %556 = arith.truncf %548 : vector<8x128xf32> to vector<8x128xbf16>
    %557 = tpu.concatenate %288, %549, %550, %551, %552, %553, %554, %555, %556 in 1 : vector<8x128xbf16>, vector<8x128xbf16>, vector<8x128xbf16>, vector<8x128xbf16>, vector<8x128xbf16>, vector<8x128xbf16>, vector<8x128xbf16>, vector<8x128xbf16>, vector<8x128xbf16> -> vector<8x1152xbf16>
    %cst_153 = arith.constant dense<0.000000e+00> : vector<8x128xf32>
    %558 = tpu.matmul %557, %280, %cst_153 {dimension_numbers = #tpu.dot_dimension_numbers<[1], [0], [0], [1], [0, 0, 1, 1], [], []>} : vector<8x1152xbf16>, vector<1152x128xbf16>, vector<8x128xf32> -> vector<8x128xf32>
    %c0_154 = arith.constant 0 : index
    %c0_155 = arith.constant 0 : index
    %559 = vector.load %arg4[%c0_154, %c0_155] : memref<8x128xf32, #tpu.memory_space<vmem>>, vector<8x128xf32>
    tpu.vector_store %arg4[%c0_154, %c0_155], %558 {strides = array<i32>} : memref<8x128xf32, #tpu.memory_space<vmem>>, vector<8x128xf32>,
    return
  }
  func.func @transform_0(%arg0: i32) -> (i32, i32) {
    %c0_i32 = arith.constant 0 : i32
    %c0_i32_0 = arith.constant 0 : i32
    return %arg0, %c0_i32 : i32, i32
  }
  func.func @transform_1(%arg0: i32) -> (i32, i32) {
    %c0_i32 = arith.constant 0 : i32
    %c0_i32_0 = arith.constant 0 : i32
    %c0_i32_1 = arith.constant 0 : i32
    return %c0_i32, %c0_i32_0 : i32, i32
  }
  func.func @transform_2(%arg0: i32) -> (i32, i32) {
    %c0_i32 = arith.constant 0 : i32
    %c0_i32_0 = arith.constant 0 : i32
    %c0_i32_1 = arith.constant 0 : i32
    return %c0_i32, %c0_i32_0 : i32, i32
  }
  func.func @transform_3(%arg0: i32) -> (i32, i32) {
    %c0_i32 = arith.constant 0 : i32
    %c0_i32_0 = arith.constant 0 : i32
    return %arg0, %c0_i32 : i32, i32
  }
}

module attributes {stable_mosaic.version = 11 : i64} {
  func.func @_kan_fused_kernel(%arg0: i32, %arg1: memref<8x128xf32, #tpu.memory_space<vmem>>, %arg2: memref<1152x128xbf16, #tpu.memory_space<vmem>>, %arg3: memref<1152x128xbf16, #tpu.memory_space<vmem>>, %arg4: memref<8x128xf32, #tpu.memory_space<vmem>>) attributes {dimension_semantics = [#tpu.dimension_semantics<parallel>], iteration_bounds = array<i64: 2>, scalar_prefetch = 0 : i64, scratch_operands = 0 : i64, tpu.core_type = #tpu.core_type<tc>, window_params = [{transform_indices = @transform_0, window_bounds = array<i64: 8, 128>}, {pipeline_mode = #tpu.pipeline_mode<synchronous>, transform_indices = @transform_1, window_bounds = array<i64: 1152, 128>}, {pipeline_mode = #tpu.pipeline_mode<synchronous>, transform_indices = @transform_2, window_bounds = array<i64: 1152, 128>}, {transform_indices = @transform_3, window_bounds = array<i64: 8, 128>}]} {
    %c0 = arith.constant 0 : index
    %c0_0 = arith.constant 0 : index
    %0 = vector.load %arg1[%c0, %c0_0] : memref<8x128xf32, #tpu.memory_space<vmem>>, vector<8x128xf32>
    %c0_1 = arith.constant 0 : index
    %c0_2 = arith.constant 0 : index
    %1 = vector.load %arg2[%c0_1, %c0_2] : memref<1152x128xbf16, #tpu.memory_space<vmem>>, vector<1152x128xbf16>
    %cst = arith.constant 0.000000e+00 : f32
    %2 = vector.broadcast %cst : f32 to vector<8x128xf32>
    %3 = arith.subf %2, %0 : vector<8x128xf32>
    %4 = math.exp %3 : vector<8x128xf32>
    %cst_3 = arith.constant 1.000000e+00 : f32
    %5 = vector.broadcast %cst_3 : f32 to vector<8x128xf32>
    %6 = arith.addf %5, %4 : vector<8x128xf32>
    %7 = tpu.reciprocal %6 {approx = true} : vector<8x128xf32> -> vector<8x128xf32>
    %8 = arith.mulf %0, %7 : vector<8x128xf32>
    %9 = arith.truncf %8 : vector<8x128xf32> to vector<8x128xbf16>
    %cst_4 = arith.constant -2.200000e+00 : f32
    %10 = vector.broadcast %cst_4 : f32 to vector<8x128xf32>
    %11 = arith.cmpf oge, %0, %10 : vector<8x128xf32>
    %12 = arith.extui %11 : vector<8x128xi1> to vector<8x128xi32>
    %13 = arith.sitofp %12 : vector<8x128xi32> to vector<8x128xf32>
    %cst_5 = arith.constant -1.800000e+00 : f32
    %14 = vector.broadcast %cst_5 : f32 to vector<8x128xf32>
    %15 = arith.cmpf oge, %0, %14 : vector<8x128xf32>
    %16 = arith.extui %15 : vector<8x128xi1> to vector<8x128xi32>
    %17 = arith.sitofp %16 : vector<8x128xi32> to vector<8x128xf32>
    %cst_6 = arith.constant -1.400000e+00 : f32
    %18 = vector.broadcast %cst_6 : f32 to vector<8x128xf32>
    %19 = arith.cmpf oge, %0, %18 : vector<8x128xf32>
    %20 = arith.extui %19 : vector<8x128xi1> to vector<8x128xi32>
    %21 = arith.sitofp %20 : vector<8x128xi32> to vector<8x128xf32>
    %cst_7 = arith.constant -1.000000e+00 : f32
    %22 = vector.broadcast %cst_7 : f32 to vector<8x128xf32>
    %23 = arith.cmpf oge, %0, %22 : vector<8x128xf32>
    %24 = arith.extui %23 : vector<8x128xi1> to vector<8x128xi32>
    %25 = arith.sitofp %24 : vector<8x128xi32> to vector<8x128xf32>
    %cst_8 = arith.constant -6.000000e-01 : f32
    %26 = vector.broadcast %cst_8 : f32 to vector<8x128xf32>
    %27 = arith.cmpf oge, %0, %26 : vector<8x128xf32>
    %28 = arith.extui %27 : vector<8x128xi1> to vector<8x128xi32>
    %29 = arith.sitofp %28 : vector<8x128xi32> to vector<8x128xf32>
    %cst_9 = arith.constant -0.199999988 : f32
    %30 = vector.broadcast %cst_9 : f32 to vector<8x128xf32>
    %31 = arith.cmpf oge, %0, %30 : vector<8x128xf32>
    %32 = arith.extui %31 : vector<8x128xi1> to vector<8x128xi32>
    %33 = arith.sitofp %32 : vector<8x128xi32> to vector<8x128xf32>
    %cst_10 = arith.constant 0.200000048 : f32
    %34 = vector.broadcast %cst_10 : f32 to vector<8x128xf32>
    %35 = arith.cmpf oge, %0, %34 : vector<8x128xf32>
    %36 = arith.extui %35 : vector<8x128xi1> to vector<8x128xi32>
    %37 = arith.sitofp %36 : vector<8x128xi32> to vector<8x128xf32>
    %cst_11 = arith.constant 6.000000e-01 : f32
    %38 = vector.broadcast %cst_11 : f32 to vector<8x128xf32>
    %39 = arith.cmpf oge, %0, %38 : vector<8x128xf32>
    %40 = arith.extui %39 : vector<8x128xi1> to vector<8x128xi32>
    %41 = arith.sitofp %40 : vector<8x128xi32> to vector<8x128xf32>
    %cst_12 = arith.constant 1.000000e+00 : f32
    %42 = vector.broadcast %cst_12 : f32 to vector<8x128xf32>
    %43 = arith.cmpf oge, %0, %42 : vector<8x128xf32>
    %44 = arith.extui %43 : vector<8x128xi1> to vector<8x128xi32>
    %45 = arith.sitofp %44 : vector<8x128xi32> to vector<8x128xf32>
    %cst_13 = arith.constant 1.4000001 : f32
    %46 = vector.broadcast %cst_13 : f32 to vector<8x128xf32>
    %47 = arith.cmpf oge, %0, %46 : vector<8x128xf32>
    %48 = arith.extui %47 : vector<8x128xi1> to vector<8x128xi32>
    %49 = arith.sitofp %48 : vector<8x128xi32> to vector<8x128xf32>
    %cst_14 = arith.constant 1.800000e+00 : f32
    %50 = vector.broadcast %cst_14 : f32 to vector<8x128xf32>
    %51 = arith.cmpf oge, %0, %50 : vector<8x128xf32>
    %52 = arith.extui %51 : vector<8x128xi1> to vector<8x128xi32>
    %53 = arith.sitofp %52 : vector<8x128xi32> to vector<8x128xf32>
    %cst_15 = arith.constant 2.200000e+00 : f32
    %54 = vector.broadcast %cst_15 : f32 to vector<8x128xf32>
    %55 = arith.cmpf oge, %0, %54 : vector<8x128xf32>
    %56 = arith.extui %55 : vector<8x128xi1> to vector<8x128xi32>
    %57 = arith.sitofp %56 : vector<8x128xi32> to vector<8x128xf32>
    %58 = arith.subf %13, %17 : vector<8x128xf32>
    %59 = arith.subf %17, %21 : vector<8x128xf32>
    %60 = arith.subf %21, %25 : vector<8x128xf32>
    %61 = arith.subf %25, %29 : vector<8x128xf32>
    %62 = arith.subf %29, %33 : vector<8x128xf32>
    %63 = arith.subf %33, %37 : vector<8x128xf32>
    %64 = arith.subf %37, %41 : vector<8x128xf32>
    %65 = arith.subf %41, %45 : vector<8x128xf32>
    %66 = arith.subf %45, %49 : vector<8x128xf32>
    %67 = arith.subf %49, %53 : vector<8x128xf32>
    %68 = arith.subf %53, %57 : vector<8x128xf32>
    %cst_16 = arith.constant 2.49999952 : f32
    %69 = vector.broadcast %cst_16 : f32 to vector<8x128xf32>
    %70 = arith.mulf %0, %69 : vector<8x128xf32>
    %cst_17 = arith.constant -5.49999905 : f32
    %71 = vector.broadcast %cst_17 : f32 to vector<8x128xf32>
    %72 = arith.subf %70, %71 : vector<8x128xf32>
    %cst_18 = arith.constant -4.49999905 : f32
    %73 = vector.broadcast %cst_18 : f32 to vector<8x128xf32>
    %74 = arith.subf %70, %73 : vector<8x128xf32>
    %cst_19 = arith.constant -3.49999905 : f32
    %75 = vector.broadcast %cst_19 : f32 to vector<8x128xf32>
    %76 = arith.subf %70, %75 : vector<8x128xf32>
    %cst_20 = arith.constant -2.49999952 : f32
    %77 = vector.broadcast %cst_20 : f32 to vector<8x128xf32>
    %78 = arith.subf %70, %77 : vector<8x128xf32>
    %cst_21 = arith.constant -1.49999976 : f32
    %79 = vector.broadcast %cst_21 : f32 to vector<8x128xf32>
    %80 = arith.subf %70, %79 : vector<8x128xf32>
    %cst_22 = arith.constant -0.499999851 : f32
    %81 = vector.broadcast %cst_22 : f32 to vector<8x128xf32>
    %82 = arith.subf %70, %81 : vector<8x128xf32>
    %cst_23 = arith.constant 5.000000e-01 : f32
    %83 = vector.broadcast %cst_23 : f32 to vector<8x128xf32>
    %84 = arith.subf %70, %83 : vector<8x128xf32>
    %cst_24 = arith.constant 1.49999976 : f32
    %85 = vector.broadcast %cst_24 : f32 to vector<8x128xf32>
    %86 = arith.subf %70, %85 : vector<8x128xf32>
    %cst_25 = arith.constant 2.49999952 : f32
    %87 = vector.broadcast %cst_25 : f32 to vector<8x128xf32>
    %88 = arith.subf %70, %87 : vector<8x128xf32>
    %cst_26 = arith.constant 3.49999952 : f32
    %89 = vector.broadcast %cst_26 : f32 to vector<8x128xf32>
    %90 = arith.subf %70, %89 : vector<8x128xf32>
    %cst_27 = arith.constant 4.49999905 : f32
    %91 = vector.broadcast %cst_27 : f32 to vector<8x128xf32>
    %92 = arith.subf %70, %91 : vector<8x128xf32>
    %93 = arith.mulf %72, %58 : vector<8x128xf32>
    %cst_28 = arith.constant 1.000000e+00 : f32
    %94 = vector.broadcast %cst_28 : f32 to vector<8x128xf32>
    %95 = arith.subf %94, %74 : vector<8x128xf32>
    %96 = arith.mulf %95, %59 : vector<8x128xf32>
    %97 = arith.addf %93, %96 : vector<8x128xf32>
    %98 = arith.mulf %74, %59 : vector<8x128xf32>
    %cst_29 = arith.constant 1.000000e+00 : f32
    %99 = vector.broadcast %cst_29 : f32 to vector<8x128xf32>
    %100 = arith.subf %99, %76 : vector<8x128xf32>
    %101 = arith.mulf %100, %60 : vector<8x128xf32>
    %102 = arith.addf %98, %101 : vector<8x128xf32>
    %103 = arith.mulf %76, %60 : vector<8x128xf32>
    %cst_30 = arith.constant 1.000000e+00 : f32
    %104 = vector.broadcast %cst_30 : f32 to vector<8x128xf32>
    %105 = arith.subf %104, %78 : vector<8x128xf32>
    %106 = arith.mulf %105, %61 : vector<8x128xf32>
    %107 = arith.addf %103, %106 : vector<8x128xf32>
    %108 = arith.mulf %78, %61 : vector<8x128xf32>
    %cst_31 = arith.constant 1.000000e+00 : f32
    %109 = vector.broadcast %cst_31 : f32 to vector<8x128xf32>
    %110 = arith.subf %109, %80 : vector<8x128xf32>
    %111 = arith.mulf %110, %62 : vector<8x128xf32>
    %112 = arith.addf %108, %111 : vector<8x128xf32>
    %113 = arith.mulf %80, %62 : vector<8x128xf32>
    %cst_32 = arith.constant 1.000000e+00 : f32
    %114 = vector.broadcast %cst_32 : f32 to vector<8x128xf32>
    %115 = arith.subf %114, %82 : vector<8x128xf32>
    %116 = arith.mulf %115, %63 : vector<8x128xf32>
    %117 = arith.addf %113, %116 : vector<8x128xf32>
    %118 = arith.mulf %82, %63 : vector<8x128xf32>
    %cst_33 = arith.constant 1.000000e+00 : f32
    %119 = vector.broadcast %cst_33 : f32 to vector<8x128xf32>
    %120 = arith.subf %119, %84 : vector<8x128xf32>
    %121 = arith.mulf %120, %64 : vector<8x128xf32>
    %122 = arith.addf %118, %121 : vector<8x128xf32>
    %123 = arith.mulf %84, %64 : vector<8x128xf32>
    %cst_34 = arith.constant 1.000000e+00 : f32
    %124 = vector.broadcast %cst_34 : f32 to vector<8x128xf32>
    %125 = arith.subf %124, %86 : vector<8x128xf32>
    %126 = arith.mulf %125, %65 : vector<8x128xf32>
    %127 = arith.addf %123, %126 : vector<8x128xf32>
    %128 = arith.mulf %86, %65 : vector<8x128xf32>
    %cst_35 = arith.constant 1.000000e+00 : f32
    %129 = vector.broadcast %cst_35 : f32 to vector<8x128xf32>
    %130 = arith.subf %129, %88 : vector<8x128xf32>
    %131 = arith.mulf %130, %66 : vector<8x128xf32>
    %132 = arith.addf %128, %131 : vector<8x128xf32>
    %133 = arith.mulf %88, %66 : vector<8x128xf32>
    %cst_36 = arith.constant 1.000000e+00 : f32
    %134 = vector.broadcast %cst_36 : f32 to vector<8x128xf32>
    %135 = arith.subf %134, %90 : vector<8x128xf32>
    %136 = arith.mulf %135, %67 : vector<8x128xf32>
    %137 = arith.addf %133, %136 : vector<8x128xf32>
    %138 = arith.mulf %90, %67 : vector<8x128xf32>
    %cst_37 = arith.constant 1.000000e+00 : f32
    %139 = vector.broadcast %cst_37 : f32 to vector<8x128xf32>
    %140 = arith.subf %139, %92 : vector<8x128xf32>
    %141 = arith.mulf %140, %68 : vector<8x128xf32>
    %142 = arith.addf %138, %141 : vector<8x128xf32>
    %cst_38 = arith.constant 1.24999976 : f32
    %143 = vector.broadcast %cst_38 : f32 to vector<8x128xf32>
    %144 = arith.mulf %0, %143 : vector<8x128xf32>
    %cst_39 = arith.constant -2.74999952 : f32
    %145 = vector.broadcast %cst_39 : f32 to vector<8x128xf32>
    %146 = arith.subf %144, %145 : vector<8x128xf32>
    %cst_40 = arith.constant -2.24999952 : f32
    %147 = vector.broadcast %cst_40 : f32 to vector<8x128xf32>
    %148 = arith.subf %144, %147 : vector<8x128xf32>
    %cst_41 = arith.constant -1.74999952 : f32
    %149 = vector.broadcast %cst_41 : f32 to vector<8x128xf32>
    %150 = arith.subf %144, %149 : vector<8x128xf32>
    %cst_42 = arith.constant -1.24999976 : f32
    %151 = vector.broadcast %cst_42 : f32 to vector<8x128xf32>
    %152 = arith.subf %144, %151 : vector<8x128xf32>
    %cst_43 = arith.constant -0.749999881 : f32
    %153 = vector.broadcast %cst_43 : f32 to vector<8x128xf32>
    %154 = arith.subf %144, %153 : vector<8x128xf32>
    %cst_44 = arith.constant -0.249999925 : f32
    %155 = vector.broadcast %cst_44 : f32 to vector<8x128xf32>
    %156 = arith.subf %144, %155 : vector<8x128xf32>
    %cst_45 = arith.constant 2.500000e-01 : f32
    %157 = vector.broadcast %cst_45 : f32 to vector<8x128xf32>
    %158 = arith.subf %144, %157 : vector<8x128xf32>
    %cst_46 = arith.constant 0.749999881 : f32
    %159 = vector.broadcast %cst_46 : f32 to vector<8x128xf32>
    %160 = arith.subf %144, %159 : vector<8x128xf32>
    %cst_47 = arith.constant 1.24999976 : f32
    %161 = vector.broadcast %cst_47 : f32 to vector<8x128xf32>
    %162 = arith.subf %144, %161 : vector<8x128xf32>
    %cst_48 = arith.constant 1.74999976 : f32
    %163 = vector.broadcast %cst_48 : f32 to vector<8x128xf32>
    %164 = arith.subf %144, %163 : vector<8x128xf32>
    %165 = arith.mulf %146, %97 : vector<8x128xf32>
    %cst_49 = arith.constant 1.000000e+00 : f32
    %166 = vector.broadcast %cst_49 : f32 to vector<8x128xf32>
    %167 = arith.subf %166, %148 : vector<8x128xf32>
    %168 = arith.mulf %167, %102 : vector<8x128xf32>
    %169 = arith.addf %165, %168 : vector<8x128xf32>
    %170 = arith.mulf %148, %102 : vector<8x128xf32>
    %cst_50 = arith.constant 1.000000e+00 : f32
    %171 = vector.broadcast %cst_50 : f32 to vector<8x128xf32>
    %172 = arith.subf %171, %150 : vector<8x128xf32>
    %173 = arith.mulf %172, %107 : vector<8x128xf32>
    %174 = arith.addf %170, %173 : vector<8x128xf32>
    %175 = arith.mulf %150, %107 : vector<8x128xf32>
    %cst_51 = arith.constant 1.000000e+00 : f32
    %176 = vector.broadcast %cst_51 : f32 to vector<8x128xf32>
    %177 = arith.subf %176, %152 : vector<8x128xf32>
    %178 = arith.mulf %177, %112 : vector<8x128xf32>
    %179 = arith.addf %175, %178 : vector<8x128xf32>
    %180 = arith.mulf %152, %112 : vector<8x128xf32>
    %cst_52 = arith.constant 1.000000e+00 : f32
    %181 = vector.broadcast %cst_52 : f32 to vector<8x128xf32>
    %182 = arith.subf %181, %154 : vector<8x128xf32>
    %183 = arith.mulf %182, %117 : vector<8x128xf32>
    %184 = arith.addf %180, %183 : vector<8x128xf32>
    %185 = arith.mulf %154, %117 : vector<8x128xf32>
    %cst_53 = arith.constant 1.000000e+00 : f32
    %186 = vector.broadcast %cst_53 : f32 to vector<8x128xf32>
    %187 = arith.subf %186, %156 : vector<8x128xf32>
    %188 = arith.mulf %187, %122 : vector<8x128xf32>
    %189 = arith.addf %185, %188 : vector<8x128xf32>
    %190 = arith.mulf %156, %122 : vector<8x128xf32>
    %cst_54 = arith.constant 1.000000e+00 : f32
    %191 = vector.broadcast %cst_54 : f32 to vector<8x128xf32>
    %192 = arith.subf %191, %158 : vector<8x128xf32>
    %193 = arith.mulf %192, %127 : vector<8x128xf32>
    %194 = arith.addf %190, %193 : vector<8x128xf32>
    %195 = arith.mulf %158, %127 : vector<8x128xf32>
    %cst_55 = arith.constant 1.000000e+00 : f32
    %196 = vector.broadcast %cst_55 : f32 to vector<8x128xf32>
    %197 = arith.subf %196, %160 : vector<8x128xf32>
    %198 = arith.mulf %197, %132 : vector<8x128xf32>
    %199 = arith.addf %195, %198 : vector<8x128xf32>
    %200 = arith.mulf %160, %132 : vector<8x128xf32>
    %cst_56 = arith.constant 1.000000e+00 : f32
    %201 = vector.broadcast %cst_56 : f32 to vector<8x128xf32>
    %202 = arith.subf %201, %162 : vector<8x128xf32>
    %203 = arith.mulf %202, %137 : vector<8x128xf32>
    %204 = arith.addf %200, %203 : vector<8x128xf32>
    %205 = arith.mulf %162, %137 : vector<8x128xf32>
    %cst_57 = arith.constant 1.000000e+00 : f32
    %206 = vector.broadcast %cst_57 : f32 to vector<8x128xf32>
    %207 = arith.subf %206, %164 : vector<8x128xf32>
    %208 = arith.mulf %207, %142 : vector<8x128xf32>
    %209 = arith.addf %205, %208 : vector<8x128xf32>
    %cst_58 = arith.constant 0.833333134 : f32
    %210 = vector.broadcast %cst_58 : f32 to vector<8x128xf32>
    %211 = arith.mulf %0, %210 : vector<8x128xf32>
    %cst_59 = arith.constant -1.8333329 : f32
    %212 = vector.broadcast %cst_59 : f32 to vector<8x128xf32>
    %213 = arith.subf %211, %212 : vector<8x128xf32>
    %cst_60 = arith.constant -1.49999964 : f32
    %214 = vector.broadcast %cst_60 : f32 to vector<8x128xf32>
    %215 = arith.subf %211, %214 : vector<8x128xf32>
    %cst_61 = arith.constant -1.16666639 : f32
    %216 = vector.broadcast %cst_61 : f32 to vector<8x128xf32>
    %217 = arith.subf %211, %216 : vector<8x128xf32>
    %cst_62 = arith.constant -0.833333134 : f32
    %218 = vector.broadcast %cst_62 : f32 to vector<8x128xf32>
    %219 = arith.subf %211, %218 : vector<8x128xf32>
    %cst_63 = arith.constant -0.499999911 : f32
    %220 = vector.broadcast %cst_63 : f32 to vector<8x128xf32>
    %221 = arith.subf %211, %220 : vector<8x128xf32>
    %cst_64 = arith.constant -0.166666612 : f32
    %222 = vector.broadcast %cst_64 : f32 to vector<8x128xf32>
    %223 = arith.subf %211, %222 : vector<8x128xf32>
    %cst_65 = arith.constant 0.166666672 : f32
    %224 = vector.broadcast %cst_65 : f32 to vector<8x128xf32>
    %225 = arith.subf %211, %224 : vector<8x128xf32>
    %cst_66 = arith.constant 0.499999911 : f32
    %226 = vector.broadcast %cst_66 : f32 to vector<8x128xf32>
    %227 = arith.subf %211, %226 : vector<8x128xf32>
    %cst_67 = arith.constant 0.833333134 : f32
    %228 = vector.broadcast %cst_67 : f32 to vector<8x128xf32>
    %229 = arith.subf %211, %228 : vector<8x128xf32>
    %230 = arith.mulf %213, %169 : vector<8x128xf32>
    %cst_68 = arith.constant 1.000000e+00 : f32
    %231 = vector.broadcast %cst_68 : f32 to vector<8x128xf32>
    %232 = arith.subf %231, %215 : vector<8x128xf32>
    %233 = arith.mulf %232, %174 : vector<8x128xf32>
    %234 = arith.addf %230, %233 : vector<8x128xf32>
    %235 = arith.mulf %215, %174 : vector<8x128xf32>
    %cst_69 = arith.constant 1.000000e+00 : f32
    %236 = vector.broadcast %cst_69 : f32 to vector<8x128xf32>
    %237 = arith.subf %236, %217 : vector<8x128xf32>
    %238 = arith.mulf %237, %179 : vector<8x128xf32>
    %239 = arith.addf %235, %238 : vector<8x128xf32>
    %240 = arith.mulf %217, %179 : vector<8x128xf32>
    %cst_70 = arith.constant 1.000000e+00 : f32
    %241 = vector.broadcast %cst_70 : f32 to vector<8x128xf32>
    %242 = arith.subf %241, %219 : vector<8x128xf32>
    %243 = arith.mulf %242, %184 : vector<8x128xf32>
    %244 = arith.addf %240, %243 : vector<8x128xf32>
    %245 = arith.mulf %219, %184 : vector<8x128xf32>
    %cst_71 = arith.constant 1.000000e+00 : f32
    %246 = vector.broadcast %cst_71 : f32 to vector<8x128xf32>
    %247 = arith.subf %246, %221 : vector<8x128xf32>
    %248 = arith.mulf %247, %189 : vector<8x128xf32>
    %249 = arith.addf %245, %248 : vector<8x128xf32>
    %250 = arith.mulf %221, %189 : vector<8x128xf32>
    %cst_72 = arith.constant 1.000000e+00 : f32
    %251 = vector.broadcast %cst_72 : f32 to vector<8x128xf32>
    %252 = arith.subf %251, %223 : vector<8x128xf32>
    %253 = arith.mulf %252, %194 : vector<8x128xf32>
    %254 = arith.addf %250, %253 : vector<8x128xf32>
    %255 = arith.mulf %223, %194 : vector<8x128xf32>
    %cst_73 = arith.constant 1.000000e+00 : f32
    %256 = vector.broadcast %cst_73 : f32 to vector<8x128xf32>
    %257 = arith.subf %256, %225 : vector<8x128xf32>
    %258 = arith.mulf %257, %199 : vector<8x128xf32>
    %259 = arith.addf %255, %258 : vector<8x128xf32>
    %260 = arith.mulf %225, %199 : vector<8x128xf32>
    %cst_74 = arith.constant 1.000000e+00 : f32
    %261 = vector.broadcast %cst_74 : f32 to vector<8x128xf32>
    %262 = arith.subf %261, %227 : vector<8x128xf32>
    %263 = arith.mulf %262, %204 : vector<8x128xf32>
    %264 = arith.addf %260, %263 : vector<8x128xf32>
    %265 = arith.mulf %227, %204 : vector<8x128xf32>
    %cst_75 = arith.constant 1.000000e+00 : f32
    %266 = vector.broadcast %cst_75 : f32 to vector<8x128xf32>
    %267 = arith.subf %266, %229 : vector<8x128xf32>
    %268 = arith.mulf %267, %209 : vector<8x128xf32>
    %269 = arith.addf %265, %268 : vector<8x128xf32>
    %270 = arith.truncf %234 : vector<8x128xf32> to vector<8x128xbf16>
    %271 = arith.truncf %239 : vector<8x128xf32> to vector<8x128xbf16>
    %272 = arith.truncf %244 : vector<8x128xf32> to vector<8x128xbf16>
    %273 = arith.truncf %249 : vector<8x128xf32> to vector<8x128xbf16>
    %274 = arith.truncf %254 : vector<8x128xf32> to vector<8x128xbf16>
    %275 = arith.truncf %259 : vector<8x128xf32> to vector<8x128xbf16>
    %276 = arith.truncf %264 : vector<8x128xf32> to vector<8x128xbf16>
    %277 = arith.truncf %269 : vector<8x128xf32> to vector<8x128xbf16>
    %278 = tpu.concatenate %9, %270, %271, %272, %273, %274, %275, %276, %277 in 1 : vector<8x128xbf16>, vector<8x128xbf16>, vector<8x128xbf16>, vector<8x128xbf16>, vector<8x128xbf16>, vector<8x128xbf16>, vector<8x128xbf16>, vector<8x128xbf16>, vector<8x128xbf16> -> vector<8x1152xbf16>
    %cst_76 = arith.constant dense<0.000000e+00> : vector<8x128xf32>
    %279 = tpu.matmul %278, %1, %cst_76 {dimension_numbers = #tpu.dot_dimension_numbers<[1], [0], [0], [1], [0, 0, 1, 1], [], []>} : vector<8x1152xbf16>, vector<1152x128xbf16>, vector<8x128xf32> -> vector<8x128xf32>
    %c0_77 = arith.constant 0 : index
    %c0_78 = arith.constant 0 : index
    %280 = vector.load %arg3[%c0_77, %c0_78] : memref<1152x128xbf16, #tpu.memory_space<vmem>>, vector<1152x128xbf16>
    %cst_79 = arith.constant 0.000000e+00 : f32
    %281 = vector.broadcast %cst_79 : f32 to vector<8x128xf32>
    %282 = arith.subf %281, %279 : vector<8x128xf32>
    %283 = math.exp %282 : vector<8x128xf32>
    %cst_80 = arith.constant 1.000000e+00 : f32
    %284 = vector.broadcast %cst_80 : f32 to vector<8x128xf32>
    %285 = arith.addf %284, %283 : vector<8x128xf32>
    %286 = tpu.reciprocal %285 {approx = true} : vector<8x128xf32> -> vector<8x128xf32>
    %287 = arith.mulf %279, %286 : vector<8x128xf32>
    %288 = arith.truncf %287 : vector<8x128xf32> to vector<8x128xbf16>
    %cst_81 = arith.constant -2.200000e+00 : f32
    %289 = vector.broadcast %cst_81 : f32 to vector<8x128xf32>
    %290 = arith.cmpf oge, %279, %289 : vector<8x128xf32>
    %291 = arith.extui %290 : vector<8x128xi1> to vector<8x128xi32>
    %292 = arith.sitofp %291 : vector<8x128xi32> to vector<8x128xf32>
    %cst_82 = arith.constant -1.800000e+00 : f32
    %293 = vector.broadcast %cst_82 : f32 to vector<8x128xf32>
    %294 = arith.cmpf oge, %279, %293 : vector<8x128xf32>
    %295 = arith.extui %294 : vector<8x128xi1> to vector<8x128xi32>
    %296 = arith.sitofp %295 : vector<8x128xi32> to vector<8x128xf32>
    %cst_83 = arith.constant -1.400000e+00 : f32
    %297 = vector.broadcast %cst_83 : f32 to vector<8x128xf32>
    %298 = arith.cmpf oge, %279, %297 : vector<8x128xf32>
    %299 = arith.extui %298 : vector<8x128xi1> to vector<8x128xi32>
    %300 = arith.sitofp %299 : vector<8x128xi32> to vector<8x128xf32>
    %cst_84 = arith.constant -1.000000e+00 : f32
    %301 = vector.broadcast %cst_84 : f32 to vector<8x128xf32>
    %302 = arith.cmpf oge, %279, %301 : vector<8x128xf32>
    %303 = arith.extui %302 : vector<8x128xi1> to vector<8x128xi32>
    %304 = arith.sitofp %303 : vector<8x128xi32> to vector<8x128xf32>
    %cst_85 = arith.constant -6.000000e-01 : f32
    %305 = vector.broadcast %cst_85 : f32 to vector<8x128xf32>
    %306 = arith.cmpf oge, %279, %305 : vector<8x128xf32>
    %307 = arith.extui %306 : vector<8x128xi1> to vector<8x128xi32>
    %308 = arith.sitofp %307 : vector<8x128xi32> to vector<8x128xf32>
    %cst_86 = arith.constant -0.199999988 : f32
    %309 = vector.broadcast %cst_86 : f32 to vector<8x128xf32>
    %310 = arith.cmpf oge, %279, %309 : vector<8x128xf32>
    %311 = arith.extui %310 : vector<8x128xi1> to vector<8x128xi32>
    %312 = arith.sitofp %311 : vector<8x128xi32> to vector<8x128xf32>
    %cst_87 = arith.constant 0.200000048 : f32
    %313 = vector.broadcast %cst_87 : f32 to vector<8x128xf32>
    %314 = arith.cmpf oge, %279, %313 : vector<8x128xf32>
    %315 = arith.extui %314 : vector<8x128xi1> to vector<8x128xi32>
    %316 = arith.sitofp %315 : vector<8x128xi32> to vector<8x128xf32>
    %cst_88 = arith.constant 6.000000e-01 : f32
    %317 = vector.broadcast %cst_88 : f32 to vector<8x128xf32>
    %318 = arith.cmpf oge, %279, %317 : vector<8x128xf32>
    %319 = arith.extui %318 : vector<8x128xi1> to vector<8x128xi32>
    %320 = arith.sitofp %319 : vector<8x128xi32> to vector<8x128xf32>
    %cst_89 = arith.constant 1.000000e+00 : f32
    %321 = vector.broadcast %cst_89 : f32 to vector<8x128xf32>
    %322 = arith.cmpf oge, %279, %321 : vector<8x128xf32>
    %323 = arith.extui %322 : vector<8x128xi1> to vector<8x128xi32>
    %324 = arith.sitofp %323 : vector<8x128xi32> to vector<8x128xf32>
    %cst_90 = arith.constant 1.4000001 : f32
    %325 = vector.broadcast %cst_90 : f32 to vector<8x128xf32>
    %326 = arith.cmpf oge, %279, %325 : vector<8x128xf32>
    %327 = arith.extui %326 : vector<8x128xi1> to vector<8x128xi32>
    %328 = arith.sitofp %327 : vector<8x128xi32> to vector<8x128xf32>
    %cst_91 = arith.constant 1.800000e+00 : f32
    %329 = vector.broadcast %cst_91 : f32 to vector<8x128xf32>
    %330 = arith.cmpf oge, %279, %329 : vector<8x128xf32>
    %331 = arith.extui %330 : vector<8x128xi1> to vector<8x128xi32>
    %332 = arith.sitofp %331 : vector<8x128xi32> to vector<8x128xf32>
    %cst_92 = arith.constant 2.200000e+00 : f32
    %333 = vector.broadcast %cst_92 : f32 to vector<8x128xf32>
    %334 = arith.cmpf oge, %279, %333 : vector<8x128xf32>
    %335 = arith.extui %334 : vector<8x128xi1> to vector<8x128xi32>
    %336 = arith.sitofp %335 : vector<8x128xi32> to vector<8x128xf32>
    %337 = arith.subf %292, %296 : vector<8x128xf32>
    %338 = arith.subf %296, %300 : vector<8x128xf32>
    %339 = arith.subf %300, %304 : vector<8x128xf32>
    %340 = arith.subf %304, %308 : vector<8x128xf32>
    %341 = arith.subf %308, %312 : vector<8x128xf32>
    %342 = arith.subf %312, %316 : vector<8x128xf32>
    %343 = arith.subf %316, %320 : vector<8x128xf32>
    %344 = arith.subf %320, %324 : vector<8x128xf32>
    %345 = arith.subf %324, %328 : vector<8x128xf32>
    %346 = arith.subf %328, %332 : vector<8x128xf32>
    %347 = arith.subf %332, %336 : vector<8x128xf32>
    %cst_93 = arith.constant 2.49999952 : f32
    %348 = vector.broadcast %cst_93 : f32 to vector<8x128xf32>
    %349 = arith.mulf %279, %348 : vector<8x128xf32>
    %cst_94 = arith.constant -5.49999905 : f32
    %350 = vector.broadcast %cst_94 : f32 to vector<8x128xf32>
    %351 = arith.subf %349, %350 : vector<8x128xf32>
    %cst_95 = arith.constant -4.49999905 : f32
    %352 = vector.broadcast %cst_95 : f32 to vector<8x128xf32>
    %353 = arith.subf %349, %352 : vector<8x128xf32>
    %cst_96 = arith.constant -3.49999905 : f32
    %354 = vector.broadcast %cst_96 : f32 to vector<8x128xf32>
    %355 = arith.subf %349, %354 : vector<8x128xf32>
    %cst_97 = arith.constant -2.49999952 : f32
    %356 = vector.broadcast %cst_97 : f32 to vector<8x128xf32>
    %357 = arith.subf %349, %356 : vector<8x128xf32>
    %cst_98 = arith.constant -1.49999976 : f32
    %358 = vector.broadcast %cst_98 : f32 to vector<8x128xf32>
    %359 = arith.subf %349, %358 : vector<8x128xf32>
    %cst_99 = arith.constant -0.499999851 : f32
    %360 = vector.broadcast %cst_99 : f32 to vector<8x128xf32>
    %361 = arith.subf %349, %360 : vector<8x128xf32>
    %cst_100 = arith.constant 5.000000e-01 : f32
    %362 = vector.broadcast %cst_100 : f32 to vector<8x128xf32>
    %363 = arith.subf %349, %362 : vector<8x128xf32>
    %cst_101 = arith.constant 1.49999976 : f32
    %364 = vector.broadcast %cst_101 : f32 to vector<8x128xf32>
    %365 = arith.subf %349, %364 : vector<8x128xf32>
    %cst_102 = arith.constant 2.49999952 : f32
    %366 = vector.broadcast %cst_102 : f32 to vector<8x128xf32>
    %367 = arith.subf %349, %366 : vector<8x128xf32>
    %cst_103 = arith.constant 3.49999952 : f32
    %368 = vector.broadcast %cst_103 : f32 to vector<8x128xf32>
    %369 = arith.subf %349, %368 : vector<8x128xf32>
    %cst_104 = arith.constant 4.49999905 : f32
    %370 = vector.broadcast %cst_104 : f32 to vector<8x128xf32>
    %371 = arith.subf %349, %370 : vector<8x128xf32>
    %372 = arith.mulf %351, %337 : vector<8x128xf32>
    %cst_105 = arith.constant 1.000000e+00 : f32
    %373 = vector.broadcast %cst_105 : f32 to vector<8x128xf32>
    %374 = arith.subf %373, %353 : vector<8x128xf32>
    %375 = arith.mulf %374, %338 : vector<8x128xf32>
    %376 = arith.addf %372, %375 : vector<8x128xf32>
    %377 = arith.mulf %353, %338 : vector<8x128xf32>
    %cst_106 = arith.constant 1.000000e+00 : f32
    %378 = vector.broadcast %cst_106 : f32 to vector<8x128xf32>
    %379 = arith.subf %378, %355 : vector<8x128xf32>
    %380 = arith.mulf %379, %339 : vector<8x128xf32>
    %381 = arith.addf %377, %380 : vector<8x128xf32>
    %382 = arith.mulf %355, %339 : vector<8x128xf32>
    %cst_107 = arith.constant 1.000000e+00 : f32
    %383 = vector.broadcast %cst_107 : f32 to vector<8x128xf32>
    %384 = arith.subf %383, %357 : vector<8x128xf32>
    %385 = arith.mulf %384, %340 : vector<8x128xf32>
    %386 = arith.addf %382, %385 : vector<8x128xf32>
    %387 = arith.mulf %357, %340 : vector<8x128xf32>
    %cst_108 = arith.constant 1.000000e+00 : f32
    %388 = vector.broadcast %cst_108 : f32 to vector<8x128xf32>
    %389 = arith.subf %388, %359 : vector<8x128xf32>
    %390 = arith.mulf %389, %341 : vector<8x128xf32>
    %391 = arith.addf %387, %390 : vector<8x128xf32>
    %392 = arith.mulf %359, %341 : vector<8x128xf32>
    %cst_109 = arith.constant 1.000000e+00 : f32
    %393 = vector.broadcast %cst_109 : f32 to vector<8x128xf32>
    %394 = arith.subf %393, %361 : vector<8x128xf32>
    %395 = arith.mulf %394, %342 : vector<8x128xf32>
    %396 = arith.addf %392, %395 : vector<8x128xf32>
    %397 = arith.mulf %361, %342 : vector<8x128xf32>
    %cst_110 = arith.constant 1.000000e+00 : f32
    %398 = vector.broadcast %cst_110 : f32 to vector<8x128xf32>
    %399 = arith.subf %398, %363 : vector<8x128xf32>
    %400 = arith.mulf %399, %343 : vector<8x128xf32>
    %401 = arith.addf %397, %400 : vector<8x128xf32>
    %402 = arith.mulf %363, %343 : vector<8x128xf32>
    %cst_111 = arith.constant 1.000000e+00 : f32
    %403 = vector.broadcast %cst_111 : f32 to vector<8x128xf32>
    %404 = arith.subf %403, %365 : vector<8x128xf32>
    %405 = arith.mulf %404, %344 : vector<8x128xf32>
    %406 = arith.addf %402, %405 : vector<8x128xf32>
    %407 = arith.mulf %365, %344 : vector<8x128xf32>
    %cst_112 = arith.constant 1.000000e+00 : f32
    %408 = vector.broadcast %cst_112 : f32 to vector<8x128xf32>
    %409 = arith.subf %408, %367 : vector<8x128xf32>
    %410 = arith.mulf %409, %345 : vector<8x128xf32>
    %411 = arith.addf %407, %410 : vector<8x128xf32>
    %412 = arith.mulf %367, %345 : vector<8x128xf32>
    %cst_113 = arith.constant 1.000000e+00 : f32
    %413 = vector.broadcast %cst_113 : f32 to vector<8x128xf32>
    %414 = arith.subf %413, %369 : vector<8x128xf32>
    %415 = arith.mulf %414, %346 : vector<8x128xf32>
    %416 = arith.addf %412, %415 : vector<8x128xf32>
    %417 = arith.mulf %369, %346 : vector<8x128xf32>
    %cst_114 = arith.constant 1.000000e+00 : f32
    %418 = vector.broadcast %cst_114 : f32 to vector<8x128xf32>
    %419 = arith.subf %418, %371 : vector<8x128xf32>
    %420 = arith.mulf %419, %347 : vector<8x128xf32>
    %421 = arith.addf %417, %420 : vector<8x128xf32>
    %cst_115 = arith.constant 1.24999976 : f32
    %422 = vector.broadcast %cst_115 : f32 to vector<8x128xf32>
    %423 = arith.mulf %279, %422 : vector<8x128xf32>
    %cst_116 = arith.constant -2.74999952 : f32
    %424 = vector.broadcast %cst_116 : f32 to vector<8x128xf32>
    %425 = arith.subf %423, %424 : vector<8x128xf32>
    %cst_117 = arith.constant -2.24999952 : f32
    %426 = vector.broadcast %cst_117 : f32 to vector<8x128xf32>
    %427 = arith.subf %423, %426 : vector<8x128xf32>
    %cst_118 = arith.constant -1.74999952 : f32
    %428 = vector.broadcast %cst_118 : f32 to vector<8x128xf32>
    %429 = arith.subf %423, %428 : vector<8x128xf32>
    %cst_119 = arith.constant -1.24999976 : f32
    %430 = vector.broadcast %cst_119 : f32 to vector<8x128xf32>
    %431 = arith.subf %423, %430 : vector<8x128xf32>
    %cst_120 = arith.constant -0.749999881 : f32
    %432 = vector.broadcast %cst_120 : f32 to vector<8x128xf32>
    %433 = arith.subf %423, %432 : vector<8x128xf32>
    %cst_121 = arith.constant -0.249999925 : f32
    %434 = vector.broadcast %cst_121 : f32 to vector<8x128xf32>
    %435 = arith.subf %423, %434 : vector<8x128xf32>
    %cst_122 = arith.constant 2.500000e-01 : f32
    %436 = vector.broadcast %cst_122 : f32 to vector<8x128xf32>
    %437 = arith.subf %423, %436 : vector<8x128xf32>
    %cst_123 = arith.constant 0.749999881 : f32
    %438 = vector.broadcast %cst_123 : f32 to vector<8x128xf32>
    %439 = arith.subf %423, %438 : vector<8x128xf32>
    %cst_124 = arith.constant 1.24999976 : f32
    %440 = vector.broadcast %cst_124 : f32 to vector<8x128xf32>
    %441 = arith.subf %423, %440 : vector<8x128xf32>
    %cst_125 = arith.constant 1.74999976 : f32
    %442 = vector.broadcast %cst_125 : f32 to vector<8x128xf32>
    %443 = arith.subf %423, %442 : vector<8x128xf32>
    %444 = arith.mulf %425, %376 : vector<8x128xf32>
    %cst_126 = arith.constant 1.000000e+00 : f32
    %445 = vector.broadcast %cst_126 : f32 to vector<8x128xf32>
    %446 = arith.subf %445, %427 : vector<8x128xf32>
    %447 = arith.mulf %446, %381 : vector<8x128xf32>
    %448 = arith.addf %444, %447 : vector<8x128xf32>
    %449 = arith.mulf %427, %381 : vector<8x128xf32>
    %cst_127 = arith.constant 1.000000e+00 : f32
    %450 = vector.broadcast %cst_127 : f32 to vector<8x128xf32>
    %451 = arith.subf %450, %429 : vector<8x128xf32>
    %452 = arith.mulf %451, %386 : vector<8x128xf32>
    %453 = arith.addf %449, %452 : vector<8x128xf32>
    %454 = arith.mulf %429, %386 : vector<8x128xf32>
    %cst_128 = arith.constant 1.000000e+00 : f32
    %455 = vector.broadcast %cst_128 : f32 to vector<8x128xf32>
    %456 = arith.subf %455, %431 : vector<8x128xf32>
    %457 = arith.mulf %456, %391 : vector<8x128xf32>
    %458 = arith.addf %454, %457 : vector<8x128xf32>
    %459 = arith.mulf %431, %391 : vector<8x128xf32>
    %cst_129 = arith.constant 1.000000e+00 : f32
    %460 = vector.broadcast %cst_129 : f32 to vector<8x128xf32>
    %461 = arith.subf %460, %433 : vector<8x128xf32>
    %462 = arith.mulf %461, %396 : vector<8x128xf32>
    %463 = arith.addf %459, %462 : vector<8x128xf32>
    %464 = arith.mulf %433, %396 : vector<8x128xf32>
    %cst_130 = arith.constant 1.000000e+00 : f32
    %465 = vector.broadcast %cst_130 : f32 to vector<8x128xf32>
    %466 = arith.subf %465, %435 : vector<8x128xf32>
    %467 = arith.mulf %466, %401 : vector<8x128xf32>
    %468 = arith.addf %464, %467 : vector<8x128xf32>
    %469 = arith.mulf %435, %401 : vector<8x128xf32>
    %cst_131 = arith.constant 1.000000e+00 : f32
    %470 = vector.broadcast %cst_131 : f32 to vector<8x128xf32>
    %471 = arith.subf %470, %437 : vector<8x128xf32>
    %472 = arith.mulf %471, %406 : vector<8x128xf32>
    %473 = arith.addf %469, %472 : vector<8x128xf32>
    %474 = arith.mulf %437, %406 : vector<8x128xf32>
    %cst_132 = arith.constant 1.000000e+00 : f32
    %475 = vector.broadcast %cst_132 : f32 to vector<8x128xf32>
    %476 = arith.subf %475, %439 : vector<8x128xf32>
    %477 = arith.mulf %476, %411 : vector<8x128xf32>
    %478 = arith.addf %474, %477 : vector<8x128xf32>
    %479 = arith.mulf %439, %411 : vector<8x128xf32>
    %cst_133 = arith.constant 1.000000e+00 : f32
    %480 = vector.broadcast %cst_133 : f32 to vector<8x128xf32>
    %481 = arith.subf %480, %441 : vector<8x128xf32>
    %482 = arith.mulf %481, %416 : vector<8x128xf32>
    %483 = arith.addf %479, %482 : vector<8x128xf32>
    %484 = arith.mulf %441, %416 : vector<8x128xf32>
    %cst_134 = arith.constant 1.000000e+00 : f32
    %485 = vector.broadcast %cst_134 : f32 to vector<8x128xf32>
    %486 = arith.subf %485, %443 : vector<8x128xf32>
    %487 = arith.mulf %486, %421 : vector<8x128xf32>
    %488 = arith.addf %484, %487 : vector<8x128xf32>
    %cst_135 = arith.constant 0.833333134 : f32
    %489 = vector.broadcast %cst_135 : f32 to vector<8x128xf32>
    %490 = arith.mulf %279, %489 : vector<8x128xf32>
    %cst_136 = arith.constant -1.8333329 : f32
    %491 = vector.broadcast %cst_136 : f32 to vector<8x128xf32>
    %492 = arith.subf %490, %491 : vector<8x128xf32>
    %cst_137 = arith.constant -1.49999964 : f32
    %493 = vector.broadcast %cst_137 : f32 to vector<8x128xf32>
    %494 = arith.subf %490, %493 : vector<8x128xf32>
    %cst_138 = arith.constant -1.16666639 : f32
    %495 = vector.broadcast %cst_138 : f32 to vector<8x128xf32>
    %496 = arith.subf %490, %495 : vector<8x128xf32>
    %cst_139 = arith.constant -0.833333134 : f32
    %497 = vector.broadcast %cst_139 : f32 to vector<8x128xf32>
    %498 = arith.subf %490, %497 : vector<8x128xf32>
    %cst_140 = arith.constant -0.499999911 : f32
    %499 = vector.broadcast %cst_140 : f32 to vector<8x128xf32>
    %500 = arith.subf %490, %499 : vector<8x128xf32>
    %cst_141 = arith.constant -0.166666612 : f32
    %501 = vector.broadcast %cst_141 : f32 to vector<8x128xf32>
    %502 = arith.subf %490, %501 : vector<8x128xf32>
    %cst_142 = arith.constant 0.166666672 : f32
    %503 = vector.broadcast %cst_142 : f32 to vector<8x128xf32>
    %504 = arith.subf %490, %503 : vector<8x128xf32>
    %cst_143 = arith.constant 0.499999911 : f32
    %505 = vector.broadcast %cst_143 : f32 to vector<8x128xf32>
    %506 = arith.subf %490, %505 : vector<8x128xf32>
    %cst_144 = arith.constant 0.833333134 : f32
    %507 = vector.broadcast %cst_144 : f32 to vector<8x128xf32>
    %508 = arith.subf %490, %507 : vector<8x128xf32>
    %509 = arith.mulf %492, %448 : vector<8x128xf32>
    %cst_145 = arith.constant 1.000000e+00 : f32
    %510 = vector.broadcast %cst_145 : f32 to vector<8x128xf32>
    %511 = arith.subf %510, %494 : vector<8x128xf32>
    %512 = arith.mulf %511, %453 : vector<8x128xf32>
    %513 = arith.addf %509, %512 : vector<8x128xf32>
    %514 = arith.mulf %494, %453 : vector<8x128xf32>
    %cst_146 = arith.constant 1.000000e+00 : f32
    %515 = vector.broadcast %cst_146 : f32 to vector<8x128xf32>
    %516 = arith.subf %515, %496 : vector<8x128xf32>
    %517 = arith.mulf %516, %458 : vector<8x128xf32>
    %518 = arith.addf %514, %517 : vector<8x128xf32>
    %519 = arith.mulf %496, %458 : vector<8x128xf32>
    %cst_147 = arith.constant 1.000000e+00 : f32
    %520 = vector.broadcast %cst_147 : f32 to vector<8x128xf32>
    %521 = arith.subf %520, %498 : vector<8x128xf32>
    %522 = arith.mulf %521, %463 : vector<8x128xf32>
    %523 = arith.addf %519, %522 : vector<8x128xf32>
    %524 = arith.mulf %498, %463 : vector<8x128xf32>
    %cst_148 = arith.constant 1.000000e+00 : f32
    %525 = vector.broadcast %cst_148 : f32 to vector<8x128xf32>
    %526 = arith.subf %525, %500 : vector<8x128xf32>
    %527 = arith.mulf %526, %468 : vector<8x128xf32>
    %528 = arith.addf %524, %527 : vector<8x128xf32>
    %529 = arith.mulf %500, %468 : vector<8x128xf32>
    %cst_149 = arith.constant 1.000000e+00 : f32
    %530 = vector.broadcast %cst_149 : f32 to vector<8x128xf32>
    %531 = arith.subf %530, %502 : vector<8x128xf32>
    %532 = arith.mulf %531, %473 : vector<8x128xf32>
    %533 = arith.addf %529, %532 : vector<8x128xf32>
    %534 = arith.mulf %502, %473 : vector<8x128xf32>
    %cst_150 = arith.constant 1.000000e+00 : f32
    %535 = vector.broadcast %cst_150 : f32 to vector<8x128xf32>
    %536 = arith.subf %535, %504 : vector<8x128xf32>
    %537 = arith.mulf %536, %478 : vector<8x128xf32>
    %538 = arith.addf %534, %537 : vector<8x128xf32>
    %539 = arith.mulf %504, %478 : vector<8x128xf32>
    %cst_151 = arith.constant 1.000000e+00 : f32
    %540 = vector.broadcast %cst_151 : f32 to vector<8x128xf32>
    %541 = arith.subf %540, %506 : vector<8x128xf32>
    %542 = arith.mulf %541, %483 : vector<8x128xf32>
    %543 = arith.addf %539, %542 : vector<8x128xf32>
    %544 = arith.mulf %506, %483 : vector<8x128xf32>
    %cst_152 = arith.constant 1.000000e+00 : f32
    %545 = vector.broadcast %cst_152 : f32 to vector<8x128xf32>
    %546 = arith.subf %545, %508 : vector<8x128xf32>
    %547 = arith.mulf %546, %488 : vector<8x128xf32>
    %548 = arith.addf %544, %547 : vector<8x128xf32>
    %549 = arith.truncf %513 : vector<8x128xf32> to vector<8x128xbf16>
    %550 = arith.truncf %518 : vector<8x128xf32> to vector<8x128xbf16>
    %551 = arith.truncf %523 : vector<8x128xf32> to vector<8x128xbf16>
    %552 = arith.truncf %528 : vector<8x128xf32> to vector<8x128xbf16>
    %553 = arith.truncf %533 : vector<8x128xf32> to vector<8x128xbf16>
    %554 = arith.truncf %538 : vector<8x128xf32> to vector<8x128xbf16>
    %555 = arith.truncf %543 : vector<8x128xf32> to vector<8x128xbf16>
    %556 = arith.truncf %548 : vector<8x128xf32> to vector<8x128xbf16>
    %557 = tpu.concatenate %288, %549, %550, %551, %552, %553, %554, %555, %556 in 1 : vector<8x128xbf16>, vector<8x128xbf16>, vector<8x128xbf16>, vector<8x128xbf16>, vector<8x128xbf16>, vector<8x128xbf16>, vector<8x128xbf16>, vector<8x128xbf16>, vector<8x128xbf16> -> vector<8x1152xbf16>
    %cst_153 = arith.constant dense<0.000000e+00> : vector<8x128xf32>
    %558 = tpu.matmul %557, %280, %cst_153 {dimension_numbers = #tpu.dot_dimension_numbers<[1], [0], [0], [1], [0, 0, 1, 1], [], []>} : vector<8x1152xbf16>, vector<1152x128xbf16>, vector<8x128xf32> -> vector<8x128xf32>
    %c0_154 = arith.constant 0 : index
    %c0_155 = arith.constant 0 : index
    %559 = vector.load %arg4[%c0_154, %c0_155] : memref<8x128xf32, #tpu.memory_space<vmem>>, vector<8x128xf32>
    tpu.vector_store %arg4[%c0_154, %c0_155], %558 {strides = array<i32>} : memref<8x128xf32, #tpu.memory_space<vmem>>, vector<8x128xf32>,
    return
  }
  func.func @transform_0(%arg0: i32) -> (i32, i32) {
    %c0_i32 = arith.constant 0 : i32
    %c0_i32_0 = arith.constant 0 : i32
    return %arg0, %c0_i32 : i32, i32
  }
  func.func @transform_1(%arg0: i32) -> (i32, i32) {
    %c0_i32 = arith.constant 0 : i32
    %c0_i32_0 = arith.constant 0 : i32
    %c0_i32_1 = arith.constant 0 : i32
    return %c0_i32, %c0_i32_0 : i32, i32
  }
  func.func @transform_2(%arg0: i32) -> (i32, i32) {
    %c0_i32 = arith.constant 0 : i32
    %c0_i32_0 = arith.constant 0 : i32
    %c0_i32_1 = arith.constant 0 : i32
    return %c0_i32, %c0_i32_0 : i32, i32
  }
  func.func @transform_3(%arg0: i32) -> (i32, i32) {
    %c0_i32 = arith.constant 0 : i32
    %c0_i32_0 = arith.constant 0 : i32
    return %arg0, %c0_i32 : i32, i32
  }
}

</mosaic_0001>

<bundles_post_ra>
// kernel: tpu_custom_call.1
= control target key start
LH: loop header
LB: loop body
LE: loop exit
PB: predicated region body
PF: predicated region fallthrough
CT: control target
= control target key end

     0   :  { %8 = vsyncpa [#allocation3], 0  ;;  %s3585_s0 = inlined_call_operand.hbm [shape: f32[16,128], index: 0, kind: input, shape index: {}]   ;;  %s3586_s1 = inlined_call_operand.hbm [shape: bf16[1152,128], index: 1, kind: input, shape index: {}]   ;;  %s3587_s2 = inlined_call_operand.hbm [shape: bf16[1152,128], index: 2, kind: input, shape index: {}]   ;;  %s3588_s3 = inlined_call_operand.hbm [shape: f32[16,128], index: 3, kind: output, shape index: {}]  }
   0x1   :  { %10 = vsyncpa [#allocation3 + $0x1], 0 }
   0x2   :  { %11 = vsyncpa [#allocation6], 0 }
   0x3   :  { %12 = vsyncpa [#allocation4], 0 }
   0x4   :  { %14 = vsyncpa [#allocation4 + $0x1], 0  ;;  %s3158_s12 = smov 0   ;;  %s3160_s13 = smov 0  }
   0x5   :  { %s3162_s14 = smov 0   ;;  %s3164_s15 = smov 0  }
   0x6 LB: > { %s3179_s16 = sadd.s32 4294967295, %s3128_s15   ;;  %s2279_s17 = sadd.s32 4294967294, %s3128_s15   ;;  %s3128_s15 = sphi %s3164_s15, %s3610_s15   ;;  %s3124_s14 = sphi %s3162_s14, %s3609_s14   ;;  %s3120_s13 = sphi %s3160_s13, %s3608_s13   ;;  %s3116_s12 = sphi %s3158_s12, %s3607_s12  }
   0x7   : > { %p40_p0 = scmp.ne.s32.totalorder %s3120_s13, %s3116_s12  ;;  %p3589_p1 = scmp.eq.s32.totalorder %s3179_s16, 0 }
   0x8   : > { %p112_p3 = scmp.eq.s32.totalorder %s2279_s17, 1  ;;  %p2280_p5 = scmp.ge.s32.totalorder %s3128_s15, 1 }
   0x9   : > { %p3188_p4 = por %p3589_p1, %p40_p0  ;;  %p119_p7 = scmp.lt.s32.totalorder %s3128_s15, 3 }
   0xa   : > { %p3193_p6 = por %p112_p3, %p40_p0  ;;  %s3130_s21 = smov [#allocation5]  }
   0xb   : > { %s3593_s18 = scalar_select %p3188_p4, 1, 0 }
   0xc   : > { %s3594_s19 = scalar_select %p3193_p6, 1, 0 }
   0xd   : > { %p3198_p8 = pnand %p2280_p5, %p119_p7  ;;  %s131_s22 = sshll.u32 %s3130_s21, 4  ;;  %s132_s22 = int_to_ptr.vmem [resolvable:$true] %s131_s22 }
   0xe   : > { %s3131_s24 = smov [#allocation7]   ;;  %s2991_s26 = scalar_lea.vmem %s132_s22, 9216 }
   0xf   : > { %s3595_s20 = scalar_select %p3198_p8, 1, 0 }
  0x10   : > { %p2769_p9 = pneg %p3198_p8  ;;  %s144_s25 = sshll.u32 %s3131_s24, 4  ;;  %s145_s25 = int_to_ptr.vmem [resolvable:$true] %s144_s25 }
  0x11   : > { %p2992_p13 = scmp.ne.s32.totalorder %s132_s22, %s2991_s26  ;;  %p2999_p5 = scmp.lt.s32.totalorder %s132_s22, %s132_s22 }
  0x12   : > { %p3207_p11 = pnand %p2769_p9, %p3589_p1  ;;  %p3000_p7 = scmp.lt.s32.totalorder %s2991_s26, %s2991_s26 }
  0x14   : > { %p2982_p12 = pneg %p3207_p11  ;;  %p3001_p10 = por %p3000_p7, %p2999_p5 }
  0x16   : > { %p2994_p0 = pnand %p2992_p13, %p2982_p12 }
  0x18   : > { %p2995_p3 = pneg %p2994_p0 }
  0x1a   : > { %p3002_p9 = pnand %p3001_p10, %p2995_p3 }
  0x1c   : > { %3005 = shalt.err (!%p3002_p9)
}
  0x1d   : > { %s3132_s27 = smov 64   ;;  %s3133_s28 = smov 4  }
  0x1e   : > { %2772 = dma.hbm_to_vmem [thread:$0]  (!%p3207_p11), %s3586_s1, 9216, %s132_s22, [#allocation6], %s3132_s27, %s3132_s27, %s3133_s28  }
  0x1f   : > { %s3017_s4 = scalar_lea.vmem %s145_s25, 9216  ;;  %p3025_p2 = scmp.lt.s32.totalorder %s145_s25, %s145_s25 }
  0x20   : > { %p3018_p1 = scmp.ne.s32.totalorder %s145_s25, %s3017_s4  ;;  %p3026_p6 = scmp.lt.s32.totalorder %s3017_s4, %s3017_s4 }
  0x22   : > { %p3020_p13 = pnand %p3018_p1, %p2982_p12  ;;  %p3027_p5 = por %p3026_p6, %p3025_p2 }
  0x24   : > { %p3021_p0 = pneg %p3020_p13 }
  0x26   : > { %p3028_p10 = pnand %p3027_p5, %p3021_p0 }
  0x28   : > { %3031 = shalt.err (!%p3028_p10)
}
  0x29   : > { %2775 = dma.hbm_to_vmem [thread:$0]  (!%p3207_p11), %s3587_s2, 9216, %s145_s25, [#allocation6], %s3132_s27, %s3132_s27, %s3133_s28  }
  0x2a   : > { %s3230_s7 = sadd.s32 1, %s3128_s15   ;;  %s27_s8 = sadd.s32 1, %s3124_s14 }
  0x2b   : > { %s24_s9 = ssub.s32 %s3128_s15, %s3230_s7  ;;  %p34_p1 = scmp.ne.s32.totalorder %s3124_s14, %s3120_s13 }
  0x2c   : > { %p25_p2 = scmp.eq.s32.totalorder %s24_s9, 0  ;;  %p35_p6 = scmp.eq.s32.totalorder %s3128_s15, 0 }
  0x2d   : > { %p3597_p12 = scmp.eq.s32.totalorder %s3179_s16, 1  ;;  %p2786_p7 = scmp.lt.s32.totalorder %s3128_s15, 2 }
  0x2e   : > { %s3246_s11 = scalar_select %p25_p2, %s3124_s14, %s27_s8  }
  0x2f   : > { %p3240_p3 = por %p3597_p12, %p34_p1  ;;  %p36_p9 = por %p35_p6, %p34_p1 }
  0x30   : > { %s158_s17 = sand.u32 1, %s3124_s14   ;;  %s2285_s22 = sshll.u32 %s3128_s15, 7 }
  0x31   : > { %s3598_s10 = scalar_select %p3240_p3, 1, 0 }
  0x32   : > { %s2284_s21 = sshll.u32 %s158_s17, 3  ;;  %s3253_s25 = scalar_lea.hbm %s3585_s0, %s2285_s22 }
  0x33   : > { %s162_s26 = scalar_lea.vmem [#allocation2], %s2284_s21  ;;  %p3255_p11 = pnand %p2786_p7, %p36_p9 }
  0x34   : > { %s169_s27 = sshll.u32 %s162_s26, 4  ;;  %s159_s29 = scalar_lea.sflag [#allocation3], %s158_s17  ;;  %s170_s27 = int_to_ptr.vmem [resolvable:$true] %s169_s27 }
  0x35   : > { %s3032_s30 = scalar_lea.hbm %s3253_s25, 128  ;;  %p3034_p0 = pneg %p3255_p11 }
  0x36   : > { %p3033_p13 = scmp.ne.s32.totalorder %s3253_s25, %s3032_s30  ;;  %s3037_s6 = scalar_lea.hbm %s3585_s0, 256 }
  0x37   : > { %p3038_p1 = scmp.lt.s32.totalorder %s3253_s25, %s3585_s0  ;;  %p3039_p2 = scmp.lt.s32.totalorder %s3037_s6, %s3032_s30 }
  0x38   : > { %p3035_p5 = pnand %p3034_p0, %p3033_p13 }
  0x39   : > { %p3040_p6 = por %p3039_p2, %p3038_p1 }
  0x3a   : > { %p3036_p10 = pneg %p3035_p5 }
  0x3c   : > { %p3041_p12 = pnand %p3040_p6, %p3036_p10 }
  0x3e   : > { %3044 = shalt.err (!%p3041_p12)
}
  0x3f   : > { %s3045_s21 = scalar_lea.vmem %s170_s27, 128  ;;  %s3134_s17 = smov [#allocation2]  }
  0x40   : > { %p3046_p7 = scmp.ne.s32.totalorder %s170_s27, %s3045_s21  ;;  %s3050_s22 = sshll.u32 %s3134_s17, 4  ;;  %s3051_s22 = int_to_ptr.vmem [resolvable:$false] %s3050_s22 }
  0x41   : > { %s3052_s23 = scalar_lea.vmem %s3051_s22, 256  ;;  %p3053_p13 = scmp.lt.s32.totalorder %s170_s27, %s3051_s22 }
  0x42   : > { %p3048_p9 = pnand %p3046_p7, %p3034_p0  ;;  %p3054_p5 = scmp.lt.s32.totalorder %s3052_s23, %s3045_s21 }
  0x44   : > { %p3049_p3 = pneg %p3048_p9  ;;  %p3055_p4 = por %p3054_p5, %p3053_p13 }
  0x46   : > { %p3056_p8 = pnand %p3055_p4, %p3049_p3 }
  0x48   : > { %3059 = shalt.err (!%p3056_p8)
}
  0x49   : > { %2779 = dma.hbm_to_vmem [thread:$0]  (!%p3255_p11), %s3253_s25, 128, %s170_s27, %s159_s29  }
  0x4a   : > { %p3600_p10 = scmp.ne.s32.totalorder %s3595_s20, 0 }
  0x4b   : > { %s3276_s24 = sand.u32 (!%p3600_p10), 1, %s3120_s13   ;;  %p3601_p4 = scmp.ne.s32.totalorder (!%p3600_p10), %s3593_s18, 0 }
  0x4c   : > { %178 = sbr.rel (%p3600_p10) target bundleno = 749 (0x2ed), region = 32  ;;  %s2287_s26 = sshll.u32 (!%p3600_p10), %s3276_s24, 3 }
  0x4d   : > { %s181_s30 = scalar_lea.sflag (!%p3600_p10), [#allocation3], %s3276_s24  ;;  %s3282_s4 = scalar_lea.vmem (!%p3600_p10), [#allocation2], %s2287_s26 }
  0x51   : > { %3103 = dma.done.wait (%p3601_p4), %s181_s30, 128  }
  0x52   : > { %3105 = vsyncadd (%p3601_p4), %s181_s30, 4294967168  ;;  %p3602_p8 = scmp.eq.s32.totalorder %s3179_s16, 0 }
  0x54   : > { %3107 = dma.done.wait (%p3602_p8), [#allocation6], 18432   ;;  %p3603_p3 = pmov %p3602_p8 }
  0x55   : > { %v2828_v0 = vld [vmem:[#allocation5 + $0x78] sm:$0xff]   ;;  %v2832_v4 = vld [vmem:[#allocation5 + $0x70] sm:$0xff]   ;;  %v2836_v8 = vld [vmem:[#allocation5 + $0x68] sm:$0xff]   ;;  %v3135_v33 = vmov 0.0   ;;  %vm3136_vm12 = vmmov 0   ;;  %s2520_s18 = sshll.u32 %s3179_s16, 7 }
  0x56   : > { %3109 = vsyncadd (%p3603_p3), [#allocation6], 4294948864  ;;  %v2829_v1 = vld [vmem:[#allocation5 + $0x38] sm:$0xff]   ;;  %2523 = vmatprep.subr.bf16.mxu0 %v2828_v0  ;;  %v2833_v5 = vld [vmem:[#allocation5 + $0x30] sm:$0xff]   ;;  %s214_s20 = scalar_lea.vmem [#allocation8], %s2287_s26  ;;  %s3542_s29 = scalar_lea.hbm %s3588_s3, %s2520_s18 }
  0x57   : > { %v2830_v2 = vld [vmem:[#allocation5 + $0xf8] sm:$0xff]   ;;  %2524 = vmatpush3.bf16.msra.mxu0 %v2829_v1  ;;  %v2834_v6 = vld [vmem:[#allocation5 + $0xf0] sm:$0xff]   ;;  %v2837_v9 = vld [vmem:[#allocation5 + $0x28] sm:$0xff]   ;;  %s2190_s25 = sshll.u32 %s214_s20, 4  ;;  %s2177_s5 = scalar_lea.sflag [#allocation4], %s3276_s24  ;;  %s3544_s25 = int_to_ptr.vmem [resolvable:$true] %s2190_s25 }
  0x58   : > { %v2831_v3 = vld [vmem:[#allocation5 + $0xb8] sm:$0xff]   ;;  %2545 = vmatprep.subr.bf16.mxu1 %v2830_v2  ;;  %2525 = vmatprep.subr.bf16.mxu0 %v2832_v4  ;;  %v2835_v7 = vld [vmem:[#allocation5 + $0xb0] sm:$0xff]   ;;  %v2838_v10 = vld [vmem:[#allocation5 + $0xe8] sm:$0xff]   ;;  %s3060_s16 = scalar_lea.vmem %s3544_s25, 128  ;;  %p3604_p0 = scmp.ne.s32.totalorder %s3598_s10, 0 }
  0x59   : > { %2546 = vmatpush3.bf16.msra.mxu1 %v2831_v3  ;;  %v2839_v11 = vld [vmem:[#allocation5 + $0xa8] sm:$0xff]   ;;  %v2840_v12 = vld [vmem:[#allocation5 + $0x60] sm:$0xff]   ;;  %v2844_v16 = vld [vmem:[#allocation5 + $0x58] sm:$0xff]   ;;  %p3061_p11 = scmp.ne.s32.totalorder %s3544_s25, %s3060_s16  ;;  %s3137_s6 = smov [#allocation8]  }
  0x5a   : > { %2547 = vmatprep.subr.bf16.mxu1 %v2834_v6  ;;  %v2841_v13 = vld [vmem:[#allocation5 + $0x20] sm:$0xff]   ;;  %v2845_v17 = vld [vmem:[#allocation5 + $0x18] sm:$0xff]   ;;  %v2848_v20 = vld [vmem:[#allocation5 + $0x50] sm:$0xff]   ;;  %s3064_s8 = sshll.u32 %s3137_s6, 4  ;;  %s3065_s8 = int_to_ptr.vmem [resolvable:$false] %s3064_s8 }
  0x5b   : > { %2526 = vmatpush3.bf16.msra.mxu0 %v2833_v5  ;;  %v2842_v14 = vld [vmem:[#allocation5 + $0xe0] sm:$0xff]   ;;  %v2846_v18 = vld [vmem:[#allocation5 + $0xd8] sm:$0xff]   ;;  %v2849_v21 = vld [vmem:[#allocation5 + $0x10] sm:$0xff]   ;;  %p3062_p1 = pnand %p3061_p11, %p3604_p0  ;;  %s3066_s9 = scalar_lea.vmem %s3065_s8, 256 }
  0x5c   : > { %2527 = vmatprep.subr.bf16.mxu0 %v2836_v8  ;;  %v2843_v15 = vld [vmem:[#allocation5 + $0xa0] sm:$0xff]   ;;  %v2847_v19 = vld [vmem:[#allocation5 + $0x98] sm:$0xff]   ;;  %v2850_v22 = vld [vmem:[#allocation5 + $0xd0] sm:$0xff]   ;;  %p3067_p6 = scmp.lt.s32.totalorder %s3544_s25, %s3065_s8  ;;  %p3068_p12 = scmp.lt.s32.totalorder %s3066_s9, %s3060_s16 }
  0x5d   : > { %2548 = vmatpush3.bf16.msra.mxu1 %v2835_v7  ;;  %v2851_v23 = vld [vmem:[#allocation5 + $0x90] sm:$0xff]   ;;  %v2852_v24 = vld [vmem:[#allocation5 + $0x48] sm:$0xff]   ;;  %v2856_v28 = vld [vmem:[#allocation5 + $0x40] sm:$0xff]   ;;  %p3063_p2 = pneg %p3062_p1 }
  0x5e   : > { %2549 = vmatprep.subr.bf16.mxu1 %v2838_v10  ;;  %v2853_v25 = vld [vmem:[#allocation5 + $0x8] sm:$0xff]   ;;  %v2857_v29 = vld [vmem:[#allocation5] sm:$0xff]   ;;  %v3293_v32 = vld [vmem:[%s3282_s4] sm:$0xff]  ;;  %p3069_p7 = por %p3068_p12, %p3067_p6 }
  0x5f   : > { %2528 = vmatpush3.bf16.msra.mxu0 %v2837_v9  ;;  %v2854_v26 = vld [vmem:[#allocation5 + $0xc8] sm:$0xff]   ;;  %v2858_v30 = vld [vmem:[#allocation5 + $0xc0] sm:$0xff]   ;;  %vm368_vm0 = vcmp.ge.f32.partialorder %v3293_v32, -2.2  ;;  %vm371_vm1 = vcmp.ge.f32.partialorder %v3293_v32, -1.8 }
  0x60   : > { %2529 = vmatprep.subr.bf16.mxu0 %v2840_v12  ;;  %v2855_v27 = vld [vmem:[#allocation5 + $0x88] sm:$0xff]   ;;  %v2859_v31 = vld [vmem:[#allocation5 + $0x80] sm:$0xff]   ;;  %vm374_vm2 = vcmp.ge.f32.partialorder %v3293_v32, -1.4  ;;  %v2291_v34 = vsel %vm368_vm0, 1.0, %v3135_v33  ;;  %v2292_v35 = vsel %vm371_vm1, 1.0, %v3135_v33  ;;  %p3070_p9 = pnand %p3069_p7, %p3063_p2 }
  0x61   : > { %2550 = vmatpush3.bf16.msra.mxu1 %v2839_v11  ;;  %v2293_v36 = vsel %vm374_vm2, 1.0, %v3135_v33  ;;  %vm377_vm3 = vcmp.ge.f32.partialorder %v3293_v32, -1.0  ;;  %v2860_v37 = vld [vmem:[#allocation5 + $0x178] sm:$0xff]   ;;  %vm380_vm4 = vcmp.ge.f32.partialorder %v3293_v32, -0.6  ;;  %v404_v39 = vsub.f32 %v2291_v34, %v2292_v35 }
  0x62   : > { %2551 = vmatprep.subr.bf16.mxu1 %v2842_v14  ;;  %v2294_v38 = vsel %vm377_vm3, 1.0, %v3135_v33  ;;  %v2862_v40 = vld [vmem:[#allocation5 + $0x1f8] sm:$0xff]   ;;  %v2295_v41 = vsel %vm380_vm4, 1.0, %v3135_v33  ;;  %v405_v42 = vsub.f32 %v2292_v35, %v2293_v36  ;;  %v3306_v43 = vmul.f32 2.4999995, %v3293_v32 }
  0x63   : > { %2530 = vmatpush3.bf16.msra.mxu0 %v2841_v13  ;;  %v3309_v44 = vmul.f32 1.2499998, %v3293_v32  ;;  %v406_v45 = vsub.f32 %v2293_v36, %v2294_v38  ;;  %v3312_v46 = vmul.f32 0.83333313, %v3293_v32  ;;  %vm383_vm5 = vcmp.ge.f32.partialorder %v3293_v32, -0.19999999 }
  0x64   : > { %2531 = vmatprep.subr.bf16.mxu0 %v2844_v16  ;;  %vm386_vm6 = vcmp.ge.f32.partialorder %v3293_v32, 0.20000005  ;;  %v2303_v47 = vadd.f32 5.499999, %v3306_v43  ;;  %v2304_v48 = vadd.f32 4.499999, %v3306_v43  ;;  %v407_v50 = vsub.f32 %v2294_v38, %v2295_v41 }
  0x65   : > { %2552 = vmatpush3.bf16.msra.mxu1 %v2843_v15  ;;  %v2305_v49 = vadd.f32 3.499999, %v3306_v43  ;;  %v2306_v51 = vadd.f32 2.4999995, %v3306_v43  ;;  %v2314_v52 = vadd.f32 2.7499995, %v3309_v44 }
  0x66   : > { %2553 = vmatprep.subr.bf16.mxu1 %v2846_v18  ;;  %v2315_v53 = vadd.f32 2.2499995, %v3309_v44  ;;  %v427_v54 = vmul.f32 %v2303_v47, %v404_v39  ;;  %v428_v55 = vsub.f32 1.0, %v2304_v48  ;;  %v431_v56 = vmul.f32 %v2304_v48, %v405_v42 }
  0x67   : > { %2532 = vmatpush3.bf16.msra.mxu0 %v2845_v17  ;;  %v432_v57 = vsub.f32 1.0, %v2305_v49  ;;  %v435_v58 = vmul.f32 %v2305_v49, %v406_v45  ;;  %v436_v59 = vsub.f32 1.0, %v2306_v51  ;;  %v2316_v60 = vadd.f32 1.7499995, %v3309_v44 }
  0x68   : > { %2533 = vmatprep.subr.bf16.mxu0 %v2848_v20  ;;  %v429_v61 = vmul.f32 %v428_v55, %v405_v42  ;;  %v479_v63 = vsub.f32 1.0, %v2315_v53  ;;  %v2325_v0 = vadd.f32 1.4999996, %v3312_v46  ;;  %v2296_v3 = vsel %vm383_vm5, 1.0, %v3135_v33 }
  0x69   : > { %2554 = vmatpush3.bf16.msra.mxu1 %v2847_v19  ;;  %v433_v62 = vmul.f32 %v432_v57, %v406_v45  ;;  %v437_v1 = vmul.f32 %v436_v59, %v407_v50  ;;  %v483_v2 = vsub.f32 1.0, %v2316_v60  ;;  %v2324_v6 = vadd.f32 1.8333329, %v3312_v46 }
  0x6a   : > { %2555 = vmatprep.subr.bf16.mxu1 %v2850_v22  ;;  %v430_v4 = vadd.f32 %v429_v61, %v427_v54  ;;  %v2297_v7 = vsel %vm386_vm6, 1.0, %v3135_v33  ;;  %v525_v9 = vsub.f32 1.0, %v2325_v0  ;;  %v408_v10 = vsub.f32 %v2295_v41, %v2296_v3 }
  0x6b   : > { %2534 = vmatpush3.bf16.msra.mxu0 %v2849_v21  ;;  %v434_v5 = vadd.f32 %v433_v62, %v431_v56  ;;  %v438_v8 = vadd.f32 %v437_v1, %v435_v58  ;;  %v409_v15 = vsub.f32 %v2296_v3, %v2297_v7  ;;  %v2307_v16 = vadd.f32 1.4999998, %v3306_v43  ;;  %v2866_v1 = vld [vmem:[#allocation5 + $0x1f0] sm:$0xff]  }
  0x6c   : > { %2535 = vmatprep.subr.bf16.mxu0 %v2852_v24  ;;  %v478_v11 = vmul.f32 %v2314_v52, %v430_v4  ;;  %v2308_v17 = vadd.f32 0.49999985, %v3306_v43  ;;  %v439_v19 = vmul.f32 %v2306_v51, %v407_v50  ;;  %v2317_v20 = vadd.f32 1.2499998, %v3309_v44  ;;  %v2867_v3 = vld [vmem:[#allocation5 + $0x1b0] sm:$0xff]   ;;  %v2870_v4 = vld [vmem:[#allocation5 + $0x1e8] sm:$0xff]  }
  0x6d   : > { %2556 = vmatpush3.bf16.msra.mxu1 %v2851_v23  ;;  %v480_v12 = vmul.f32 %v479_v63, %v434_v5  ;;  %v482_v13 = vmul.f32 %v2315_v53, %v434_v5  ;;  %v484_v14 = vmul.f32 %v483_v2, %v438_v8  ;;  %v3335_v21 = vadd.f32 0.7499999, %v3309_v44  ;;  %v2863_v63 = vld [vmem:[#allocation5 + $0x1b8] sm:$0xff]  }
  0x6e   : > { %2557 = vmatprep.subr.bf16.mxu1 %v2854_v26  ;;  %v440_v23 = vsub.f32 1.0, %v2307_v16  ;;  %v443_v24 = vmul.f32 %v2307_v16, %v408_v10  ;;  %v3340_v35 = vadd.f32 0.83333313, %v3312_v46  ;;  %v486_v36 = vmul.f32 %v2316_v60, %v438_v8  ;;  %v2875_v16 = vld [vmem:[#allocation5 + $0x1a0] sm:$0xff]  }
  0x6f   : > { %2536 = vmatpush3.bf16.msra.mxu0 %v2853_v25  ;;  %v481_v18 = vadd.f32 %v480_v12, %v478_v11  ;;  %v485_v22 = vadd.f32 %v484_v14, %v482_v13  ;;  %v444_v25 = vsub.f32 1.0, %v2308_v17  ;;  %v361_v38 = vsub.f32 0.0, %v3293_v32  ;;  %v2871_v11 = vld [vmem:[#allocation5 + $0x1a8] sm:$0xff]   ;;  %v2874_v12 = vld [vmem:[#allocation5 + $0x1e0] sm:$0xff]  }
  0x70   : > { %2537 = vmatprep.subr.bf16.mxu0 %v2856_v28  ;;  %v491_v28 = vsub.f32 1.0, %v3335_v21  ;;  %v533_v42 = vsub.f32 1.0, %v3340_v35  ;;  %vm389_vm7 = vcmp.ge.f32.partialorder %v3293_v32, 0.6  ;;  %v2309_v59 = vadd.f32 -0.5, %v3306_v43 }
  0x71   : > { %2558 = vmatpush3.bf16.msra.mxu1 %v2855_v27  ;;  %v524_v26 = vmul.f32 %v2324_v6, %v481_v18  ;;  %v487_v27 = vsub.f32 1.0, %v2317_v20  ;;  %v445_v34 = vmul.f32 %v444_v25, %v409_v15  ;;  %v362_v45 = vmul.f32 1.442695, %v361_v38 }
  0x72   : > { %2559 = vmatprep.subr.bf16.mxu1 %v2858_v30  ;;  %v526_v30 = vmul.f32 %v525_v9, %v485_v22  ;;  %v528_v53 = vmul.f32 %v2325_v0, %v485_v22  ;;  %v2298_v60 = vsel %vm389_vm7, 1.0, %v3135_v33  ;;  %v448_v0 = vsub.f32 1.0, %v2309_v59 }
  0x73   : > { %2538 = vmatpush3.bf16.msra.mxu0 %v2857_v29  ;;  %v2326_v29 = vadd.f32 1.1666664, %v3312_v46  ;;  %v446_v41 = vadd.f32 %v445_v34, %v443_v24  ;;  %2972 = vpow2.f32 %v362_v45  ;;  %v410_v2 = vsub.f32 %v2297_v7, %v2298_v60 }
  0x74   : > { %2567 = vmatprep.subr.bf16.mxu0 %v2860_v37  ;;  %v527_v39 = vadd.f32 %v526_v30, %v524_v26  ;;  %vm392_vm8 = vcmp.ge.f32.partialorder %v3293_v32, 1.0  ;;  %v447_v9 = vmul.f32 %v2308_v17, %v409_v15  ;;  %v2320_v7 = vadd.f32 -0.25, %v3309_v44  ;;  %v2878_v15 = vld [vmem:[#allocation5 + $0x1d8] sm:$0xff]   ;;  %v2882_v30 = vld [vmem:[#allocation5 + $0x1d0] sm:$0xff]  }
  0x75   : > { %2560 = vmatpush3.bf16.msra.mxu1 %v2859_v31  ;;  %v441_v31 = vmul.f32 %v440_v23, %v408_v10  ;;  %v529_v37 = vsub.f32 1.0, %v2326_v29  ;;  %v492_v50 = vmul.f32 %v491_v28, %v446_v41  ;;  %v2299_v8 = vsel %vm392_vm8, 1.0, %v3135_v33 }
  0x76   : > { %2589 = vmatprep.subr.bf16.mxu1 %v2862_v40  ;;  %v556_v47 = vpack.c.bf16 %v527_v39, %v527_v39  ;;  %v449_v10 = vmul.f32 %v448_v0, %v410_v2  ;;  %v411_v13 = vsub.f32 %v2298_v60, %v2299_v8  ;;  %v2310_v14 = vadd.f32 -1.4999998, %v3306_v43 }
  0x77   : > { %v442_v40 = vadd.f32 %v441_v31, %v439_v19  ;;  %v2319_v19 = vadd.f32 0.24999993, %v3309_v44  ;;  %v451_v17 = vmul.f32 %v2309_v59, %v410_v2  ;;  %v494_v23 = vmul.f32 %v3335_v21, %v446_v41  ;;  %v2861_v2 = vld [vmem:[#allocation5 + $0x138] sm:$0xff]  }
  0x78   : > { %1028 = vmatprep.mubr.bf16.mxu0 %v556_v47  ;;  %v450_v18 = vadd.f32 %v449_v10, %v447_v9  ;;  %v452_v22 = vsub.f32 1.0, %v2310_v14  ;;  %v499_v25 = vsub.f32 1.0, %v2320_v7  ;;  %v3360_v26 = vadd.f32 0.4999999, %v3312_v46 }
  0x79   : > { %v488_v48 = vmul.f32 %v487_v27, %v442_v40  ;;  %v490_v49 = vmul.f32 %v2317_v20, %v442_v40  ;;  %v3356_v20 = vadd.f32 0.16666661, %v3312_v46  ;;  %v495_v24 = vsub.f32 1.0, %v2319_v19  ;;  %v2879_v27 = vld [vmem:[#allocation5 + $0x198] sm:$0xff]  }
  0x7a   : > { %v453_v28 = vmul.f32 %v452_v22, %v411_v13  ;;  %vm395_vm9 = vcmp.ge.f32.partialorder %v3293_v32, 1.4000001  ;;  %vm398_vm10 = vcmp.ge.f32.partialorder %v3293_v32, 1.8  ;;  %vm401_vm11 = vcmp.ge.f32.partialorder %v3293_v32, 2.2 }
  0x7b   : > { %v489_v51 = vadd.f32 %v488_v48, %v486_v36  ;;  %v3344_v52 = vadd.f32 %v492_v50, %v490_v49  ;;  %v496_v31 = vmul.f32 %v495_v24, %v450_v18  ;;  %v2300_v34 = vsel %vm395_vm9, 1.0, %v3135_v33 }
  0x7c   : > { %v3367_v36 = vsel %vm398_vm10, 1.0, %v3135_v33  ;;  %v454_v21 = vadd.f32 %v453_v28, %v451_v17  ;;  %v412_v38 = vsub.f32 %v2299_v8, %v2300_v34  ;;  %v2311_v40 = vadd.f32 -2.4999995, %v3306_v43  ;;  %v2891_v28 = vld [vmem:[#allocation5 + $0x180] sm:$0xff]  }
  0x7d   : > { %v532_v54 = vmul.f32 %v2326_v29, %v489_v51  ;;  %v534_v55 = vmul.f32 %v533_v42, %v3344_v52  ;;  %v530_v56 = vmul.f32 %v529_v37, %v489_v51  ;;  %v541_v29 = vsub.f32 1.0, %v3356_v20 }
  0x7e   : > { %v498_v37 = vmul.f32 %v2319_v19, %v450_v18  ;;  %v3370_v39 = vadd.f32 %v496_v31, %v494_v23  ;;  %v2312_v41 = vadd.f32 -3.4999995, %v3306_v43  ;;  %v2321_v42 = vadd.f32 -0.7499999, %v3309_v44  ;;  %v2865_v23 = vld [vmem:[#allocation5 + $0x130] sm:$0xff]  }
  0x7f   : > { %v535_v57 = vadd.f32 %v534_v55, %v532_v54  ;;  %v531_v58 = vadd.f32 %v530_v56, %v528_v53  ;;  %v500_v45 = vmul.f32 %v499_v25, %v454_v21  ;;  %v413_v47 = vsub.f32 %v2300_v34, %v3367_v36  ;;  %v2883_v54 = vld [vmem:[#allocation5 + $0x190] sm:$0xff]   ;;  %v2886_v55 = vld [vmem:[#allocation5 + $0x1c8] sm:$0xff]  }
  0x80   : > { %v2973_v5 = vpop.eup %2972  ;;  %v3377_v48 = vadd.f32 -1.2499998, %v3309_v44  ;;  %v2330_v49 = vadd.f32 -0.16666667, %v3312_v46  ;;  %v2302_v50 = vsel %vm401_vm11, 1.0, %v3135_v33  ;;  %v455_v51 = vmul.f32 %v2310_v14, %v411_v13 }
  0x81   : > { %v558_v61 = vpack.c.bf16 %v535_v57, %v535_v57  ;;  %v557_v62 = vpack.c.bf16 %v531_v58, %v531_v58  ;;  %v364_v6 = vadd.f32 1.0, %v2973_v5  ;;  %v456_v53 = vsub.f32 1.0, %v2311_v40 }
  0x82   : > { %v501_v56 = vadd.f32 %v500_v45, %v498_v37  ;;  %v540_v57 = vmul.f32 %v3360_v26, %v3370_v39  ;;  %v459_v58 = vmul.f32 %v2311_v40, %v412_v38  ;;  %v460_v59 = vsub.f32 1.0, %v2312_v41  ;;  %v2869_v40 = vld [vmem:[#allocation5 + $0x128] sm:$0xff]  }
  0x83   : > { %1068 = vmatprep.mubr.bf16.mxu1 %v558_v61  ;;  %2974 = vrcp.f32 %v364_v6  ;;  %v457_v60 = vmul.f32 %v456_v53, %v412_v38  ;;  %v503_v61 = vsub.f32 1.0, %v2321_v42  ;;  %v2864_v6 = vld [vmem:[#allocation5 + $0x170] sm:$0xff]   ;;  %v502_v9 = vmul.f32 %v2320_v7, %v454_v21  ;;  %v2873_v53 = vld [vmem:[#allocation5 + $0x120] sm:$0xff]  }
  0x84   : > { %1069 = vmatmul.mubr.bf16.vlgmr.msra.gmra.mxu1 %v557_v62  ;;  %v507_v62 = vsub.f32 1.0, %v3377_v48  ;;  %v542_v0 = vmul.f32 %v541_v29, %v501_v56  ;;  %v545_v10 = vsub.f32 1.0, %v2330_v49  ;;  %v463_v18 = vmul.f32 %v2312_v41, %v413_v47 }
  0x85   : > { %2590 = vmatpush3.bf16.msra.mxu1 %v2863_v63  ;;  %v3385_v63 = vadd.f32 -0.4999999, %v3312_v46  ;;  %v458_v8 = vadd.f32 %v457_v60, %v455_v51  ;;  %v2323_v22 = vadd.f32 -1.7499998, %v3309_v44  ;;  %v2332_v31 = vadd.f32 -0.83333313, %v3312_v46 }
  0x86   : > { %2591 = vmatprep.subr.bf16.mxu1 %v2866_v1  ;;  %v543_v13 = vadd.f32 %v542_v0, %v540_v57  ;;  %v2872_v46 = vld [vmem:[#allocation5 + $0x160] sm:$0xff]   ;;  %v2880_v57 = vld [vmem:[#allocation5 + $0x150] sm:$0xff]   ;;  %v536_v60 = vmul.f32 %v3340_v35, %v3344_v52  ;;  %v2892_v0 = vld [vmem:[#allocation5 + $0x238] sm:$0xff]  }
  0x87   : > { %v506_v17 = vmul.f32 %v2321_v42, %v458_v8  ;;  %v549_v7 = vsub.f32 1.0, %v3385_v63  ;;  %v553_v38 = vsub.f32 1.0, %v2332_v31  ;;  %v2894_v35 = vld [vmem:[#allocation5 + $0x228] sm:$0xff]   ;;  %v2895_v52 = vld [vmem:[#allocation5 + $0x220] sm:$0xff]  }
  0x88   : > { %v2920_v31 = vld [vmem:[#allocation7 + $0xc0] sm:$0xff]  }
  0x89   : > { %2592 = vmatpush3.bf16.msra.mxu1 %v2867_v3  ;;  %v414_v3 = vsub.f32 %v3367_v36, %v2302_v50  ;;  %v537_v36 = vsub.f32 1.0, %v3360_v26 }
  0x8a   : > { %2593 = vmatprep.subr.bf16.mxu1 %v2870_v4  ;;  %v461_v4 = vmul.f32 %v460_v59, %v413_v47  ;;  %v2885_v59 = vld [vmem:[#allocation5 + $0x108] sm:$0xff]  }
  0x8c   : > { %v462_v14 = vadd.f32 %v461_v4, %v459_v58  ;;  %v2884_v58 = vld [vmem:[#allocation5 + $0x148] sm:$0xff]   ;;  %v2893_v4 = vld [vmem:[#allocation5 + $0x230] sm:$0xff]  }
  0x8d   : > { %2594 = vmatpush3.bf16.msra.mxu1 %v2871_v11  ;;  %v2887_v11 = vld [vmem:[#allocation5 + $0x188] sm:$0xff]  }
  0x8e   : > { %2595 = vmatprep.subr.bf16.mxu1 %v2874_v12  ;;  %v2890_v12 = vld [vmem:[#allocation5 + $0x1c0] sm:$0xff]   ;;  %v508_v24 = vmul.f32 %v507_v62, %v462_v14  ;;  %v510_v42 = vmul.f32 %v3377_v48, %v462_v14  ;;  %v2881_v48 = vld [vmem:[#allocation5 + $0x110] sm:$0xff]   ;;  %v538_v62 = vmul.f32 %v537_v36, %v3370_v39  ;;  %v2896_v39 = vld [vmem:[#allocation5 + $0x218] sm:$0xff]  }
  0x8f   : > { %v2902_v14 = vld [vmem:[#allocation7 + $0xf0] sm:$0xff]   ;;  %v2923_v36 = vld [vmem:[#allocation7 + $0x20] sm:$0xff]  }
  0x90   : > { %v2975_v1 = vpop.eup %2974  ;;  %v3394_v34 = vadd.f32 %v508_v24, %v506_v17  ;;  %v2908_v17 = vld [vmem:[#allocation7 + $0xd8] sm:$0xff]   ;;  %v2912_v24 = vld [vmem:[#allocation7 + $0xd0] sm:$0xff]  }
  0x91   : > { %2596 = vmatpush3.bf16.msra.mxu1 %v2875_v16  ;;  %v366_v5 = vmul.f32 %v2975_v1, %v3293_v32  ;;  %v2313_v16 = vadd.f32 -4.499999, %v3306_v43  ;;  %v560_v32 = vpack.c.bf16 %v543_v13, %v543_v13  ;;  %v511_v43 = vsub.f32 1.0, %v2323_v22  ;;  %v2889_v1 = vld [vmem:[#allocation5 + $0x100] sm:$0xff]   ;;  %v2901_v13 = vld [vmem:[#allocation7 + $0xb8] sm:$0xff]  }
  0x92   : > { %2597 = vmatprep.subr.bf16.mxu1 %v2878_v15  ;;  %v504_v15 = vmul.f32 %v503_v61, %v458_v8  ;;  %v550_v41 = vmul.f32 %v549_v7, %v3394_v34  ;;  %v2888_v61 = vld [vmem:[#allocation5 + $0x140] sm:$0xff]   ;;  %v2898_v8 = vld [vmem:[#allocation5 + $0x208] sm:$0xff]   ;;  %v2909_v22 = vld [vmem:[#allocation7 + $0x78] sm:$0xff]  }
  0x93   : > { %v367_v19 = vpack.c.bf16 %v366_v5, %v366_v5  ;;  %v464_v25 = vsub.f32 1.0, %v2313_v16  ;;  %v2897_v5 = vld [vmem:[#allocation5 + $0x210] sm:$0xff]  }
  0x94   : > { %v505_v29 = vadd.f32 %v504_v15, %v502_v9  ;;  %v2903_v16 = vld [vmem:[#allocation7 + $0xb0] sm:$0xff]   ;;  %v2907_v15 = vld [vmem:[#allocation7 + $0xa0] sm:$0xff]  }
  0x95   : > { %2598 = vmatpush3.bf16.msra.mxu1 %v2879_v27  ;;  %1029 = vmatmul.mubr.bf16.vlgmr.msra.gmra.mxu0 %v367_v19  ;;  %v2868_v27 = vld [vmem:[#allocation5 + $0x168] sm:$0xff]   ;;  %v465_v44 = vmul.f32 %v464_v25, %v414_v3  ;;  %v2906_v19 = vld [vmem:[#allocation7 + $0xe0] sm:$0xff]   ;;  %v2913_v7 = vld [vmem:[#allocation7 + $0x70] sm:$0xff]  }
  0x96   : > { %2599 = vmatprep.subr.bf16.mxu1 %v2882_v30  ;;  %v544_v30 = vmul.f32 %v3356_v20, %v501_v56  ;;  %2568 = vmatpush3.bf16.msra.mxu0 %v2861_v2  ;;  %v548_v21 = vmul.f32 %v2330_v49, %v505_v29  ;;  %v546_v37 = vmul.f32 %v545_v10, %v505_v29  ;;  %v2877_v56 = vld [vmem:[#allocation5 + $0x118] sm:$0xff]   ;;  %v2899_v10 = vld [vmem:[#allocation5 + $0x200] sm:$0xff]   ;;  %v2914_v25 = vld [vmem:[#allocation7 + $0x90] sm:$0xff]  }
  0x97   : > { %2569 = vmatprep.subr.bf16.mxu0 %v2864_v6  ;;  %1108 = vmatprep.mubr.bf16.mxu0 %v560_v32  ;;  %v466_v20 = vadd.f32 %v465_v44, %v463_v18  ;;  %v539_v2 = vadd.f32 %v538_v62, %v536_v60  ;;  %v552_v6 = vmul.f32 %v3385_v63, %v3394_v34  ;;  %v2904_v63 = vld [vmem:[#allocation7 + $0xe8] sm:$0xff]   ;;  %v2911_v32 = vld [vmem:[#allocation7 + $0x38] sm:$0xff]   ;;  %v2921_v34 = vld [vmem:[#allocation7 + $0x60] sm:$0xff]  }
  0x98   : > { %v547_v45 = vadd.f32 %v546_v37, %v544_v30  ;;  %v551_v47 = vadd.f32 %v550_v41, %v548_v21  ;;  %v2905_v18 = vld [vmem:[#allocation7 + $0xa8] sm:$0xff]   ;;  %v2922_v44 = vld [vmem:[#allocation7 + $0x80] sm:$0xff]   ;;  %v2924_v21 = vld [vmem:[#allocation7 + $0x1f8] sm:$0xff]  }
  0x99   : > { %2600 = vmatpush3.bf16.msra.mxu1 %v2883_v54  ;;  %v512_v50 = vmul.f32 %v511_v43, %v466_v20  ;;  %v2876_v54 = vld [vmem:[#allocation5 + $0x158] sm:$0xff]   ;;  %v559_v3 = vpack.c.bf16 %v539_v2, %v539_v2  ;;  %v2917_v29 = vld [vmem:[#allocation7 + $0x68] sm:$0xff]  }
  0x9a   : > { %2601 = vmatprep.subr.bf16.mxu1 %v2886_v55  ;;  %2570 = vmatpush3.bf16.msra.mxu0 %v2865_v23  ;;  %v561_v51 = vpack.c.bf16 %v547_v45, %v547_v45  ;;  %v562_v26 = vpack.c.bf16 %v551_v47, %v551_v47  ;;  %v2910_v23 = vld [vmem:[#allocation7 + $0x98] sm:$0xff]   ;;  %v2918_v30 = vld [vmem:[#allocation7 + $0x88] sm:$0xff]   ;;  %v2929_v45 = vld [vmem:[#allocation7 + $0x50] sm:$0xff]  }
  0x9b   : > { %2571 = vmatprep.subr.bf16.mxu0 %v2868_v27  ;;  %v513_v49 = vadd.f32 %v512_v50, %v510_v42  ;;  %v2915_v27 = vld [vmem:[#allocation7 + $0x30] sm:$0xff]   ;;  %v2919_v43 = vld [vmem:[#allocation7 + $0x28] sm:$0xff]   ;;  %v2925_v37 = vld [vmem:[#allocation7 + $0x58] sm:$0xff]  }
  0x9c   : > { %1148 = vmatprep.mubr.bf16.mxu1 %v562_v26  ;;  %v2931_v47 = vld [vmem:[#allocation7 + $0x10] sm:$0xff]   ;;  %v2933_v50 = vld [vmem:[#allocation7 + $0x48] sm:$0xff]   ;;  %v2939_v26 = vld [vmem:[#allocation7] sm:$0xff]  }
  0x9d   : > { %2602 = vmatpush3.bf16.msra.mxu1 %v2887_v11  ;;  %v554_v55 = vmul.f32 %v553_v38, %v513_v49  ;;  %v2927_v38 = vld [vmem:[#allocation7 + $0x18] sm:$0xff]  }
  0x9e   : > { %2603 = vmatprep.subr.bf16.mxu1 %v2890_v12  ;;  %2572 = vmatpush3.bf16.msra.mxu0 %v2869_v40  ;;  %v2900_v12 = vld [vmem:[#allocation7 + $0xf8] sm:$0xff]  }
  0x9f   : > { %2573 = vmatprep.subr.bf16.mxu0 %v2872_v46  ;;  %v555_v9 = vadd.f32 %v554_v55, %v552_v6  ;;  %v2941_v49 = vld [vmem:[#allocation7 + $0x178] sm:$0xff]  }
  0xa1   : > { %2604 = vmatpush3.bf16.msra.mxu1 %v2891_v28  ;;  %v563_v11 = vpack.c.bf16 %v555_v9, %v555_v9  ;;  %v2916_v28 = vld [vmem:[#allocation7 + $0xc8] sm:$0xff]  }
  0xa2   : > { %2574 = vmatpush3.bf16.msra.mxu0 %v2873_v53  ;;  %2620 = vmatprep.subr.bf16.mxu1 %v2909_v22  ;;  %v2937_v53 = vld [vmem:[#allocation7 + $0x40] sm:$0xff]  }
  0xa3   : > { %2575 = vmatprep.subr.bf16.mxu0 %v2876_v54 }
  0xa4   : > { %1149 = vmatmul.mubr.bf16.vlgmr.msra.gmra.mxu1 %v561_v51  ;;  %v2935_v51 = vld [vmem:[#allocation7 + $0x8] sm:$0xff]  }
  0xa5   : > { %2621 = vmatpush3.bf16.msra.mxu1 %v2911_v32 }
  0xa6   : > { %2576 = vmatpush3.bf16.msra.mxu0 %v2877_v56  ;;  %2622 = vmatprep.subr.bf16.mxu1 %v2913_v7 }
  0xa7   : > { %2577 = vmatprep.subr.bf16.mxu0 %v2880_v57 }
  0xa9   : > { %2623 = vmatpush3.bf16.msra.mxu1 %v2915_v27 }
  0xaa   : > { %2578 = vmatpush3.bf16.msra.mxu0 %v2881_v48  ;;  %2624 = vmatprep.subr.bf16.mxu1 %v2917_v29 }
  0xab   : > { %2579 = vmatprep.subr.bf16.mxu0 %v2884_v58 }
  0xad   : > { %2625 = vmatpush3.bf16.msra.mxu1 %v2919_v43 }
  0xae   : > { %2580 = vmatpush3.bf16.msra.mxu0 %v2885_v59  ;;  %2626 = vmatprep.subr.bf16.mxu1 %v2921_v34 }
  0xaf   : > { %2581 = vmatprep.subr.bf16.mxu0 %v2888_v61 }
  0xb1   : > { %2627 = vmatpush3.bf16.msra.mxu1 %v2923_v36 }
  0xb2   : > { %2582 = vmatpush3.bf16.msra.mxu0 %v2889_v1  ;;  %2628 = vmatprep.subr.bf16.mxu1 %v2925_v37 }
  0xb3   : > { %2717 = vmatprep.subr.bf16.mxu0 %v3135_v33 }
  0xb5   : > { %1109 = vmatmul.mubr.bf16.vlgmr.msra.gmra.mxu0 %v559_v3  ;;  %2629 = vmatpush3.bf16.msra.mxu1 %v2927_v38 }
  0xb6   : > { %2718 = vmatpush3.bf16.msra.mxu0 %v2892_v0  ;;  %2733 = vmatprep.mubr.msk.bf16.mxu0 %vm3136_vm12, %v3135_v33 }
  0xb7   : > { %2719 = vmatprep.subr.bf16.mxu0 %v3135_v33  ;;  %2630 = vmatprep.subr.bf16.mxu1 %v2929_v45 }
  0xb9   : > { %2631 = vmatpush3.bf16.msra.mxu1 %v2931_v47 }
  0xba   : > { %2720 = vmatpush3.bf16.msra.mxu0 %v2893_v4  ;;  %2632 = vmatprep.subr.bf16.mxu1 %v2933_v50 }
  0xbb   : > { %2721 = vmatprep.subr.bf16.mxu0 %v3135_v33 }
  0xbd   : > { %2633 = vmatpush3.bf16.msra.mxu1 %v2935_v51 }
  0xbe   : > { %2722 = vmatpush3.bf16.msra.mxu0 %v2894_v35  ;;  %2634 = vmatprep.subr.bf16.mxu1 %v2937_v53 }
  0xbf   : > { %2723 = vmatprep.subr.bf16.mxu0 %v3135_v33 }
  0xc1   : > { %2635 = vmatpush3.bf16.msra.mxu1 %v2939_v26 }
  0xc2   : > { %2724 = vmatpush3.bf16.msra.mxu0 %v2895_v52  ;;  %2664 = vmatprep.subr.bf16.mxu1 %v2941_v49 }
  0xc3   : > { %2725 = vmatprep.subr.bf16.mxu0 %v3135_v33 }
  0xc6   : > { %2726 = vmatpush3.bf16.msra.mxu0 %v2896_v39 }
  0xc7   : > { %2727 = vmatprep.subr.bf16.mxu0 %v3135_v33 }
  0xca   : > { %2728 = vmatpush3.bf16.msra.mxu0 %v2897_v5 }
  0xcb   : > { %2729 = vmatprep.subr.bf16.mxu0 %v3135_v33 }
  0xce   : > { %2730 = vmatpush3.bf16.msra.mxu0 %v2898_v8 }
  0xcf   : > { %2731 = vmatprep.subr.bf16.mxu0 %v3135_v33 }
  0xd2   : > { %2732 = vmatpush3.bf16.msra.mxu0 %v2899_v10 }
  0xd3   : > { %2642 = vmatprep.subr.bf16.mxu0 %v2900_v12 }
  0xd5   : > { %2734 = vmatmul.mubr.bf16.vlgmr.msra.gmra.mxu0 %v563_v11 }
  0xd6   : > { %2643 = vmatpush3.bf16.msra.mxu0 %v2901_v13 }
  0xd7   : > { %2644 = vmatprep.subr.bf16.mxu0 %v2902_v14 }
  0xda   : > { %2645 = vmatpush3.bf16.msra.mxu0 %v2903_v16 }
  0xdb   : > { %2646 = vmatprep.subr.bf16.mxu0 %v2904_v63 }
  0xde   : > { %2647 = vmatpush3.bf16.msra.mxu0 %v2905_v18 }
  0xdf   : > { %2648 = vmatprep.subr.bf16.mxu0 %v2906_v19 }
  0xe2   : > { %2649 = vmatpush3.bf16.msra.mxu0 %v2907_v15 }
  0xe3   : > { %2650 = vmatprep.subr.bf16.mxu0 %v2908_v17 }
  0xe6   : > { %2651 = vmatpush3.bf16.msra.mxu0 %v2910_v23 }
  0xe7   : > { %2652 = vmatprep.subr.bf16.mxu0 %v2912_v24 }
  0xea   : > { %2653 = vmatpush3.bf16.msra.mxu0 %v2914_v25 }
  0xeb   : > { %2654 = vmatprep.subr.bf16.mxu0 %v2916_v28 }
  0xee   : > { %2655 = vmatpush3.bf16.msra.mxu0 %v2918_v30 }
  0xef   : > { %2656 = vmatprep.subr.bf16.mxu0 %v2920_v31 }
  0xf2   : > { %2657 = vmatpush3.bf16.msra.mxu0 %v2922_v44 }
  0xf3   : > { %2686 = vmatprep.subr.bf16.mxu0 %v2924_v21 }
 0x144   : > { %v2561_v40 = vpop.f32.mrf.mxu1 }
 0x146   : > { %v2562_v41 = vpop.f32.mrf.mxu1 }
 0x147   : > { %v2563_v20 = vadd.f32 %v2562_v41, %v2561_v40 }
 0x148   : > { %v2564_v42 = vpop.f32.mrf.mxu1 }
 0x14a   : > { %v2565_v46 = vpop.f32.mrf.mxu1 }
 0x155   : > { %v2539_v54 = vpop.f32.mrf.mxu0 }
 0x157   : > { %v2540_v55 = vpop.f32.mrf.mxu0 }
 0x158   : > { %v2541_v0 = vadd.f32 %v2540_v55, %v2539_v54 }
 0x159   : > { %v2542_v56 = vpop.f32.mrf.mxu0 }
 0x15a   : > { %v1071_v4 = vadd.f32 %v2563_v20, %v2541_v0 }
 0x15b   : > { %v2543_v57 = vpop.f32.mrf.mxu0 }
 0x164   : > { %v2605_v48 = vpop.f32.mrf.mxu1 }
 0x166   : > { %v2606_v58 = vpop.f32.mrf.mxu1 }
 0x167   : > { %v2607_v52 = vadd.f32 %v2606_v58, %v2605_v48 }
 0x168   : > { %v2608_v59 = vpop.f32.mrf.mxu1 }
 0x16a   : > { %v2609_v60 = vpop.f32.mrf.mxu1 }
 0x175   : > { %v2583_v61 = vpop.f32.mrf.mxu0 }
 0x177   : > { %v2584_v62 = vpop.f32.mrf.mxu0 }
 0x178   : > { %v2585_v3 = vadd.f32 %v2584_v62, %v2583_v61 }
 0x179   : > { %v2586_v1 = vpop.f32.mrf.mxu0 }
 0x17a   : > { %v1111_v35 = vadd.f32 %v2585_v3, %v1071_v4 }
 0x17b   : > { %v2587_v2 = vpop.f32.mrf.mxu0 }
 0x17c   : > { %v1151_v39 = vadd.f32 %v2607_v52, %v1111_v35 }
 0x195   : > { %v1190_v5 = vpop.f32.mrf.mxu0 }
 0x196   : > { %v3414_v6 = vadd.f32 %v1190_v5, %v1151_v39 }
 0x197   : > { %v2735_v8 = vpop.f32.mrf.mxu0 }
 0x198   : > { %vm1347_vm13 = vcmp.ge.f32.partialorder %v3414_v6, -2.2  ;;  %vm1350_vm14 = vcmp.ge.f32.partialorder %v3414_v6, -1.8  ;;  %vm1353_vm15 = vcmp.ge.f32.partialorder %v3414_v6, -1.4 }
 0x199   : > { %v1193_v9 = vpop.f32.mrf.mxu0  ;;  %v2405_v10 = vsel %vm1347_vm13, 1.0, %v3135_v33  ;;  %v2406_v11 = vsel %vm1350_vm14, 1.0, %v3135_v33  ;;  %v2407_v12 = vsel %vm1353_vm15, 1.0, %v3135_v33  ;;  %vm1356_vm0 = vcmp.ge.f32.partialorder %v3414_v6, -1.0 }
 0x19a   : > { %v2408_v13 = vsel %vm1356_vm0, 1.0, %v3135_v33  ;;  %vm1359_vm1 = vcmp.ge.f32.partialorder %v3414_v6, -0.6  ;;  %v1383_v63 = vsub.f32 %v2405_v10, %v2406_v11  ;;  %v3427_v18 = vmul.f32 2.4999995, %v3414_v6 }
 0x19b   : > { %v2736_v14 = vpop.f32.mrf.mxu0  ;;  %v2409_v16 = vsel %vm1359_vm1, 1.0, %v3135_v33  ;;  %v3430_v19 = vmul.f32 1.2499998, %v3414_v6  ;;  %v1384_v15 = vsub.f32 %v2406_v11, %v2407_v12  ;;  %v1385_v17 = vsub.f32 %v2407_v12, %v2408_v13 }
 0x19c   : > { %v3433_v22 = vmul.f32 0.83333313, %v3414_v6  ;;  %vm1362_vm2 = vcmp.ge.f32.partialorder %v3414_v6, -0.19999999  ;;  %v2417_v23 = vadd.f32 5.499999, %v3427_v18  ;;  %v1386_v7 = vsub.f32 %v2408_v13, %v2409_v16 }
 0x19d   : > { %v2418_v32 = vadd.f32 4.499999, %v3427_v18  ;;  %v2419_v24 = vadd.f32 3.499999, %v3427_v18  ;;  %v2420_v25 = vadd.f32 2.4999995, %v3427_v18 }
 0x19e   : > { %v2429_v27 = vadd.f32 2.2499995, %v3430_v19  ;;  %vm1365_vm3 = vcmp.ge.f32.partialorder %v3414_v6, 0.20000005  ;;  %v1406_v28 = vmul.f32 %v2417_v23, %v1383_v63  ;;  %v2428_v43 = vadd.f32 2.7499995, %v3430_v19 }
 0x19f   : > { %v1407_v29 = vsub.f32 1.0, %v2418_v32  ;;  %v1411_v30 = vsub.f32 1.0, %v2419_v24  ;;  %v1410_v31 = vmul.f32 %v2418_v32, %v1384_v15  ;;  %v1414_v34 = vmul.f32 %v2419_v24, %v1385_v17 }
 0x1a0   : > { %v1415_v44 = vsub.f32 1.0, %v2420_v25  ;;  %v2430_v36 = vadd.f32 1.7499995, %v3430_v19  ;;  %v1458_v38 = vsub.f32 1.0, %v2429_v27  ;;  %v2439_v40 = vadd.f32 1.4999996, %v3433_v22 }
 0x1a1   : > { %v1408_v21 = vmul.f32 %v1407_v29, %v1384_v15  ;;  %v1412_v37 = vmul.f32 %v1411_v30, %v1385_v17  ;;  %v2438_v20 = vadd.f32 1.8333329, %v3433_v22  ;;  %v2410_v42 = vsel %vm1362_vm2, 1.0, %v3135_v33 }
 0x1a2   : > { %v1416_v41 = vmul.f32 %v1415_v44, %v1386_v7  ;;  %v2411_v46 = vsel %vm1365_vm3, 1.0, %v3135_v33  ;;  %v1462_v50 = vsub.f32 1.0, %v2430_v36  ;;  %v1387_v51 = vsub.f32 %v2409_v16, %v2410_v42 }
 0x1a3   : > { %v1409_v45 = vadd.f32 %v1408_v21, %v1406_v28  ;;  %v1413_v47 = vadd.f32 %v1412_v37, %v1410_v31  ;;  %v1504_v26 = vsub.f32 1.0, %v2439_v40  ;;  %v2421_v49 = vadd.f32 1.4999998, %v3427_v18 }
 0x1a4   : > { %v1417_v53 = vadd.f32 %v1416_v41, %v1414_v34  ;;  %v3454_v54 = vadd.f32 0.49999985, %v3427_v18  ;;  %v3456_v48 = vsub.f32 %v2410_v42, %v2411_v46  ;;  %v1418_v59 = vmul.f32 %v2420_v25, %v1386_v7 }
 0x1a5   : > { %v1457_v55 = vmul.f32 %v2428_v43, %v1409_v45  ;;  %v1459_v56 = vmul.f32 %v1458_v38, %v1413_v47  ;;  %v1461_v57 = vmul.f32 %v2429_v27, %v1413_v47  ;;  %v1419_v60 = vsub.f32 1.0, %v2421_v49 }
 0x1a6   : > { %v1463_v58 = vmul.f32 %v1462_v50, %v1417_v53  ;;  %v1423_v61 = vsub.f32 1.0, %v3454_v54  ;;  %v1422_v1 = vmul.f32 %v2421_v49, %v1387_v51  ;;  %v2431_v2 = vadd.f32 1.2499998, %v3430_v19  ;;  %v2926_v50 = vld [vmem:[#allocation7 + $0x1b8] sm:$0xff]  }
 0x1a7   : > { %v1460_v62 = vadd.f32 %v1459_v56, %v1457_v55  ;;  %v3461_v0 = vadd.f32 0.7499999, %v3430_v19  ;;  %v1420_v4 = vmul.f32 %v1419_v60, %v1387_v51  ;;  %v2440_v52 = vadd.f32 1.1666664, %v3433_v22  ;;  %v2928_v56 = vld [vmem:[#allocation7 + $0x1f0] sm:$0xff]  }
 0x1a8   : > { %v1464_v3 = vadd.f32 %v1463_v58, %v1461_v57  ;;  %v1424_v35 = vmul.f32 %v1423_v61, %v3456_v48  ;;  %v1465_v5 = vmul.f32 %v2430_v36, %v1417_v53  ;;  %v1466_v8 = vsub.f32 1.0, %v2431_v2 }
 0x1a9   : > { %v1503_v39 = vmul.f32 %v2438_v20, %v1460_v62  ;;  %v3466_v9 = vadd.f32 0.83333313, %v3433_v22  ;;  %v1421_v11 = vadd.f32 %v1420_v4, %v1418_v59  ;;  %v1470_v13 = vsub.f32 1.0, %v3461_v0 }
 0x1aa   : > { %v1505_v10 = vmul.f32 %v1504_v26, %v1464_v3  ;;  %v3468_v12 = vadd.f32 %v1424_v35, %v1422_v1  ;;  %v1508_v14 = vsub.f32 1.0, %v2440_v52  ;;  %vm1368_vm4 = vcmp.ge.f32.partialorder %v3414_v6, 0.6 }
 0x1ab   : > { %v1512_v16 = vsub.f32 1.0, %v3466_v9  ;;  %vm1371_vm5 = vcmp.ge.f32.partialorder %v3414_v6, 1.0  ;;  %v1467_v15 = vmul.f32 %v1466_v8, %v1421_v11  ;;  %v1469_v17 = vmul.f32 %v2431_v2, %v1421_v11 }
 0x1ac   : > { %v1506_v63 = vadd.f32 %v1505_v10, %v1503_v39  ;;  %v1471_v23 = vmul.f32 %v1470_v13, %v3468_v12  ;;  %v1507_v32 = vmul.f32 %v2439_v40, %v1464_v3  ;;  %v2412_v24 = vsel %vm1368_vm4, 1.0, %v3135_v33  ;;  %v2930_v39 = vld [vmem:[#allocation7 + $0x1b0] sm:$0xff]   ;;  %v2932_v10 = vld [vmem:[#allocation7 + $0x1e8] sm:$0xff]  }
 0x1ad   : > { %v2413_v7 = vsel %vm1371_vm5, 1.0, %v3135_v33  ;;  %vm1374_vm6 = vcmp.ge.f32.partialorder %v3414_v6, 1.4000001  ;;  %v1468_v27 = vadd.f32 %v1467_v15, %v1465_v5  ;;  %vm1377_vm7 = vcmp.ge.f32.partialorder %v3414_v6, 1.8 }
 0x1ae   : > { %v1535_v25 = vpack.c.bf16 %v1506_v63, %v1506_v63  ;;  %v3478_v28 = vadd.f32 %v1471_v23, %v1469_v17  ;;  %v2414_v31 = vsel %vm1374_vm6, 1.0, %v3135_v33  ;;  %v3484_v34 = vsel %vm1377_vm7, 1.0, %v3135_v33 }
 0x1af   : > { %v1511_v29 = vmul.f32 %v2440_v52, %v1468_v27  ;;  %v1509_v43 = vmul.f32 %v1508_v14, %v1468_v27  ;;  %v1389_v44 = vsub.f32 %v2411_v46, %v2412_v24  ;;  %v1390_v36 = vsub.f32 %v2412_v24, %v2413_v7 }
 0x1b0   : > { %2007 = vmatprep.mubr.bf16.mxu1 %v1535_v25  ;;  %v1513_v30 = vmul.f32 %v1512_v16, %v3478_v28  ;;  %v2423_v21 = vadd.f32 -0.5, %v3427_v18  ;;  %v2424_v40 = vadd.f32 -1.4999998, %v3427_v18  ;;  %v2425_v41 = vadd.f32 -2.4999995, %v3427_v18 }
 0x1b1   : > { %v1510_v38 = vadd.f32 %v1509_v43, %v1507_v32  ;;  %vm1380_vm8 = vcmp.ge.f32.partialorder %v3414_v6, 2.2  ;;  %v1391_v20 = vsub.f32 %v2413_v7, %v2414_v31  ;;  %v2426_v42 = vadd.f32 -3.4999995, %v3427_v18  ;;  %v2934_v32 = vld [vmem:[#allocation7 + $0x1a8] sm:$0xff]  }
 0x1b2   : > { %v1514_v37 = vadd.f32 %v1513_v30, %v1511_v29  ;;  %v1431_v51 = vsub.f32 1.0, %v2424_v40  ;;  %v2435_v46 = vadd.f32 -0.7499999, %v3430_v19  ;;  %v1392_v53 = vsub.f32 %v2414_v31, %v3484_v34  ;;  %v2936_v29 = vld [vmem:[#allocation7 + $0x1e0] sm:$0xff]  }
 0x1b3   : > { %v1536_v47 = vpack.c.bf16 %v1510_v38, %v1510_v38  ;;  %v1435_v26 = vsub.f32 1.0, %v2425_v41  ;;  %v1439_v49 = vsub.f32 1.0, %v2426_v42  ;;  %v2436_v55 = vadd.f32 -1.2499998, %v3430_v19  ;;  %v2938_v38 = vld [vmem:[#allocation7 + $0x1a0] sm:$0xff]  }
 0x1b4   : > { %v1537_v45 = vpack.c.bf16 %v1514_v37, %v1514_v37  ;;  %v1430_v57 = vmul.f32 %v2423_v21, %v1389_v44  ;;  %v1432_v58 = vmul.f32 %v1431_v51, %v1390_v36  ;;  %v1434_v59 = vmul.f32 %v2424_v40, %v1390_v36 }
 0x1b5   : > { %v2434_v60 = vadd.f32 -0.25, %v3430_v19  ;;  %v1436_v61 = vmul.f32 %v1435_v26, %v1391_v20  ;;  %v1438_v62 = vmul.f32 %v2425_v41, %v1391_v20  ;;  %v1440_v1 = vmul.f32 %v1439_v49, %v1392_v53 }
 0x1b6   : > { %2047 = vmatprep.mubr.bf16.mxu0 %v1537_v45  ;;  %v1340_v2 = vsub.f32 0.0, %v3414_v6  ;;  %v1433_v3 = vadd.f32 %v1432_v58, %v1430_v57  ;;  %v1482_v4 = vsub.f32 1.0, %v2435_v46  ;;  %v1486_v35 = vsub.f32 1.0, %v2436_v55  ;;  %v2940_v45 = vld [vmem:[#allocation7 + $0x1d8] sm:$0xff]  }
 0x1b7   : > { %2048 = vmatmul.mubr.bf16.vlgmr.msra.gmra.mxu0 %v1536_v47  ;;  %v2445_v52 = vadd.f32 -0.4999999, %v3433_v22  ;;  %v1437_v5 = vadd.f32 %v1436_v61, %v1434_v59  ;;  %v1441_v8 = vadd.f32 %v1440_v1, %v1438_v62  ;;  %v1427_v13 = vsub.f32 1.0, %v2423_v21 }
 0x1b8   : > { %2687 = vmatpush3.bf16.msra.mxu0 %v2926_v50  ;;  %v1341_v11 = vmul.f32 1.442695, %v1340_v2  ;;  %v1481_v14 = vmul.f32 %v2434_v60, %v1433_v3  ;;  %v2416_v17 = vsel %vm1380_vm8, 1.0, %v3135_v33  ;;  %v3501_v23 = vadd.f32 -0.16666667, %v3433_v22  ;;  %v2942_v50 = vld [vmem:[#allocation7 + $0x198] sm:$0xff]  }
 0x1b9   : > { %2688 = vmatprep.subr.bf16.mxu0 %v2928_v56  ;;  %v1483_v16 = vmul.f32 %v1482_v4, %v1437_v5  ;;  %v1485_v63 = vmul.f32 %v2435_v46, %v1437_v5  ;;  %v1487_v15 = vmul.f32 %v1486_v35, %v1441_v8  ;;  %v1428_v24 = vmul.f32 %v1427_v13, %v1389_v44  ;;  %v2944_v46 = vld [vmem:[#allocation7 + $0x1d0] sm:$0xff]   ;;  %v2954_v13 = vld [vmem:[#allocation7 + $0x180] sm:$0xff]  }
 0x1ba   : > { %2976 = vpow2.f32 %v1341_v11  ;;  %v1528_v27 = vsub.f32 1.0, %v2445_v52  ;;  %v3505_v30 = vmul.f32 %v3466_v9, %v3478_v28  ;;  %v1426_v43 = vmul.f32 %v3454_v54, %v3456_v48 }
 0x1bb   : > { %v1484_v7 = vadd.f32 %v1483_v16, %v1481_v14  ;;  %v1488_v25 = vadd.f32 %v1487_v15, %v1485_v63  ;;  %v2427_v31 = vadd.f32 -4.499999, %v3427_v18  ;;  %v1442_v36 = vmul.f32 %v2426_v42, %v1392_v53 }
 0x1bc   : > { %2689 = vmatpush3.bf16.msra.mxu0 %v2930_v39  ;;  %v1393_v44 = vsub.f32 %v3484_v34, %v2416_v17  ;;  %v1429_v40 = vadd.f32 %v1428_v24, %v1426_v43  ;;  %v2437_v9 = vadd.f32 -1.7499998, %v3430_v19  ;;  %v1489_v28 = vmul.f32 %v2436_v55, %v1441_v8  ;;  %v2946_v55 = vld [vmem:[#allocation7 + $0x190] sm:$0xff]   ;;  %v2952_v39 = vld [vmem:[#allocation7 + $0x1c0] sm:$0xff]   ;;  %v2943_v24 = vld [vmem:[#allocation7 + $0x138] sm:$0xff]  }
 0x1bd   : > { %2690 = vmatprep.subr.bf16.mxu0 %v2932_v10  ;;  %v1527_v21 = vmul.f32 %v3501_v23, %v1484_v7  ;;  %v1529_v37 = vmul.f32 %v1528_v27, %v1488_v25  ;;  %v1443_v41 = vsub.f32 1.0, %v2427_v31  ;;  %v1531_v47 = vmul.f32 %v2445_v52, %v1488_v25  ;;  %v2950_v52 = vld [vmem:[#allocation7 + $0x188] sm:$0xff]   ;;  %v2945_v25 = vld [vmem:[#allocation7 + $0x170] sm:$0xff]   ;;  %v2953_v31 = vld [vmem:[#allocation7 + $0x160] sm:$0xff]  }
 0x1be   : > { %v1478_v54 = vsub.f32 1.0, %v2434_v60  ;;  %v2433_v42 = vadd.f32 0.24999993, %v3430_v19  ;;  %v1490_v26 = vsub.f32 1.0, %v2437_v9  ;;  %v2446_v49 = vadd.f32 -0.83333313, %v3433_v22 }
 0x1bf   : > { %v1530_v20 = vadd.f32 %v1529_v37, %v1527_v21  ;;  %v1444_v48 = vmul.f32 %v1443_v41, %v1393_v44  ;;  %v2948_v60 = vld [vmem:[#allocation7 + $0x1c8] sm:$0xff]   ;;  %v1524_v1 = vsub.f32 1.0, %v3501_v23  ;;  %v2443_v2 = vadd.f32 0.16666661, %v3433_v22  ;;  %v2956_v21 = vld [vmem:[#allocation7 + $0x158] sm:$0xff]   ;;  %v2958_v37 = vld [vmem:[#allocation7 + $0x150] sm:$0xff]  }
 0x1c0   : > { %2691 = vmatpush3.bf16.msra.mxu0 %v2934_v32  ;;  %v1479_v51 = vmul.f32 %v1478_v54, %v1433_v3  ;;  %v1477_v34 = vmul.f32 %v2433_v42, %v1429_v40  ;;  %v1532_v61 = vsub.f32 1.0, %v2446_v49  ;;  %v1474_v62 = vsub.f32 1.0, %v2433_v42  ;;  %v2951_v43 = vld [vmem:[#allocation7 + $0x128] sm:$0xff]   ;;  %v2959_v44 = vld [vmem:[#allocation7 + $0x110] sm:$0xff]   ;;  %v2963_v9 = vld [vmem:[#allocation7 + $0x100] sm:$0xff]  }
 0x1c1   : > { %2692 = vmatprep.subr.bf16.mxu0 %v2936_v29  ;;  %v1541_v18 = vpack.c.bf16 %v1530_v20, %v1530_v20  ;;  %v1445_v53 = vadd.f32 %v1444_v48, %v1442_v36  ;;  %v1473_v4 = vmul.f32 %v3461_v0, %v3468_v12  ;;  %v1525_v8 = vmul.f32 %v1524_v1, %v1484_v7  ;;  %v2947_v29 = vld [vmem:[#allocation7 + $0x130] sm:$0xff]   ;;  %v2955_v36 = vld [vmem:[#allocation7 + $0x120] sm:$0xff]   ;;  %v2961_v41 = vld [vmem:[#allocation7 + $0x108] sm:$0xff]  }
 0x1c2   : > { %v1480_v59 = vadd.f32 %v1479_v51, %v1477_v34  ;;  %v1475_v35 = vmul.f32 %v1474_v62, %v1429_v40  ;;  %v2442_v16 = vadd.f32 0.4999999, %v3433_v22  ;;  %v1520_v63 = vsub.f32 1.0, %v2443_v2  ;;  %v2949_v22 = vld [vmem:[#allocation7 + $0x168] sm:$0xff]   ;;  %v2962_v20 = vld [vmem:[#allocation7 + $0x140] sm:$0xff]   ;;  %v2965_v48 = vld [vmem:[#allocation7 + $0x230] sm:$0xff]  }
 0x1c3   : > { %2127 = vmatprep.mubr.bf16.mxu0 %v1541_v18  ;;  %v1491_v56 = vmul.f32 %v1490_v26, %v1445_v53  ;;  %v2966_v18 = vld [vmem:[#allocation7 + $0x228] sm:$0xff]   ;;  %v2967_v42 = vld [vmem:[#allocation7 + $0x220] sm:$0xff]  }
 0x1c4   : > { %2693 = vmatpush3.bf16.msra.mxu0 %v2938_v38  ;;  %v1523_v5 = vmul.f32 %v2443_v2, %v1480_v59  ;;  %v1476_v11 = vadd.f32 %v1475_v35, %v1473_v4  ;;  %v1521_v17 = vmul.f32 %v1520_v63, %v1480_v59  ;;  %v2960_v38 = vld [vmem:[#allocation7 + $0x148] sm:$0xff]   ;;  %v1516_v40 = vsub.f32 1.0, %v2442_v16  ;;  %v2971_v34 = vld [vmem:[#allocation7 + $0x200] sm:$0xff]  }
 0x1c5   : > { %2694 = vmatprep.subr.bf16.mxu0 %v2940_v45  ;;  %v1492_v19 = vadd.f32 %v1491_v56, %v1489_v28  ;;  %v2970_v51 = vld [vmem:[#allocation7 + $0x208] sm:$0xff]  }
 0x1c6   : > { %v1526_v14 = vadd.f32 %v1525_v8, %v1523_v5  ;;  %v1519_v15 = vmul.f32 %v2442_v16, %v1476_v11  ;;  %v1517_v45 = vmul.f32 %v1516_v40, %v1476_v11 }
 0x1c7   : > { %v2977_v57 = vpop.eup %2976  ;;  %v1533_v3 = vmul.f32 %v1532_v61, %v1492_v19 }
 0x1c8   : > { %2695 = vmatpush3.bf16.msra.mxu0 %v2942_v50  ;;  %v1343_v58 = vadd.f32 1.0, %v2977_v57  ;;  %v1540_v0 = vpack.c.bf16 %v1526_v14, %v1526_v14  ;;  %v1522_v23 = vadd.f32 %v1521_v17, %v1519_v15  ;;  %v1518_v28 = vadd.f32 %v1517_v45, %v3505_v30  ;;  %v2968_v30 = vld [vmem:[#allocation7 + $0x218] sm:$0xff]   ;;  %v2969_v50 = vld [vmem:[#allocation7 + $0x210] sm:$0xff]  }
 0x1c9   : > { %2696 = vmatprep.subr.bf16.mxu0 %v2944_v46  ;;  %v3519_v10 = vadd.f32 %v1533_v3, %v1531_v47  ;;  %v2964_v47 = vld [vmem:[#allocation7 + $0x238] sm:$0xff]  }
 0x1ca   : > { %2978 = vrcp.f32 %v1343_v58  ;;  %v1539_v27 = vpack.c.bf16 %v1522_v23, %v1522_v23  ;;  %v1538_v54 = vpack.c.bf16 %v1518_v28, %v1518_v28 }
 0x1cb   : > { %v1542_v46 = vpack.c.bf16 %v3519_v10, %v3519_v10 }
 0x1cc   : > { %2697 = vmatpush3.bf16.msra.mxu0 %v2946_v55 }
 0x1cd   : > { %2698 = vmatprep.subr.bf16.mxu0 %v2948_v60 }
 0x1d0   : > { %2699 = vmatpush3.bf16.msra.mxu0 %v2950_v52 }
 0x1d1   : > { %2700 = vmatprep.subr.bf16.mxu0 %v2952_v39 }
 0x1d4   : > { %2701 = vmatpush3.bf16.msra.mxu0 %v2954_v13 }
 0x1d7   : > { %2128 = vmatmul.mubr.bf16.vlgmr.msra.gmra.mxu0 %v1540_v0  ;;  %v2979_v12 = vpop.eup %2978 }
 0x1d8   : > { %v1345_v32 = vmul.f32 %v2979_v12, %v3414_v6  ;;  %v2957_v6 = vld [vmem:[#allocation7 + $0x118] sm:$0xff]  }
 0x1da   : > { %v1346_v7 = vpack.c.bf16 %v1345_v32, %v1345_v32 }
 0x1dc   : > { %2008 = vmatmul.mubr.bf16.vlgmr.msra.gmra.mxu1 %v1346_v7 }
 0x1dd   : > { %2665 = vmatpush3.bf16.msra.mxu1 %v2943_v24  ;;  %2087 = vmatprep.mubr.bf16.mxu1 %v1539_v27 }
 0x1de   : > { %2666 = vmatprep.subr.bf16.mxu1 %v2945_v25 }
 0x1e1   : > { %2667 = vmatpush3.bf16.msra.mxu1 %v2947_v29 }
 0x1e2   : > { %2668 = vmatprep.subr.bf16.mxu1 %v2949_v22 }
 0x1e5   : > { %2669 = vmatpush3.bf16.msra.mxu1 %v2951_v43 }
 0x1e6   : > { %2670 = vmatprep.subr.bf16.mxu1 %v2953_v31 }
 0x1e9   : > { %2671 = vmatpush3.bf16.msra.mxu1 %v2955_v36 }
 0x1ea   : > { %2672 = vmatprep.subr.bf16.mxu1 %v2956_v21 }
 0x1ed   : > { %2673 = vmatpush3.bf16.msra.mxu1 %v2957_v6 }
 0x1ee   : > { %2674 = vmatprep.subr.bf16.mxu1 %v2958_v37 }
 0x1f1   : > { %2675 = vmatpush3.bf16.msra.mxu1 %v2959_v44 }
 0x1f2   : > { %2676 = vmatprep.subr.bf16.mxu1 %v2960_v38 }
 0x1f5   : > { %2677 = vmatpush3.bf16.msra.mxu1 %v2961_v41 }
 0x1f6   : > { %2678 = vmatprep.subr.bf16.mxu1 %v2962_v20 }
 0x1f9   : > { %2679 = vmatpush3.bf16.msra.mxu1 %v2963_v9 }
 0x1fa   : > { %2737 = vmatprep.subr.bf16.mxu1 %v3135_v33 }
 0x1fc   : > { %2088 = vmatmul.mubr.bf16.vlgmr.msra.gmra.mxu1 %v1538_v54 }
 0x1fd   : > { %2738 = vmatpush3.bf16.msra.mxu1 %v2964_v47  ;;  %2753 = vmatprep.mubr.msk.bf16.mxu1 %vm3136_vm12, %v3135_v33 }
 0x1fe   : > { %2739 = vmatprep.subr.bf16.mxu1 %v3135_v33 }
 0x201   : > { %2740 = vmatpush3.bf16.msra.mxu1 %v2965_v48 }
 0x202   : > { %2741 = vmatprep.subr.bf16.mxu1 %v3135_v33 }
 0x205   : > { %2742 = vmatpush3.bf16.msra.mxu1 %v2966_v18 }
 0x206   : > { %2743 = vmatprep.subr.bf16.mxu1 %v3135_v33 }
 0x209   : > { %2744 = vmatpush3.bf16.msra.mxu1 %v2967_v42 }
 0x20a   : > { %2745 = vmatprep.subr.bf16.mxu1 %v3135_v33 }
 0x20d   : > { %2746 = vmatpush3.bf16.msra.mxu1 %v2968_v30 }
 0x20e   : > { %2747 = vmatprep.subr.bf16.mxu1 %v3135_v33 }
 0x211   : > { %2748 = vmatpush3.bf16.msra.mxu1 %v2969_v50 }
 0x212   : > { %2749 = vmatprep.subr.bf16.mxu1 %v3135_v33 }
 0x215   : > { %2750 = vmatpush3.bf16.msra.mxu1 %v2970_v51 }
 0x216   : > { %2751 = vmatprep.subr.bf16.mxu1 %v3135_v33 }
 0x219   : > { %2752 = vmatpush3.bf16.msra.mxu1 %v2971_v34 }
 0x21c   : > { %2754 = vmatmul.mubr.bf16.vlgmr.msra.gmra.mxu1 %v1542_v46 }
 0x277   : > { %v2658_v53 = vpop.f32.mrf.mxu0 }
 0x279   : > { %v2659_v26 = vpop.f32.mrf.mxu0 }
 0x27a   : > { %v2660_v49 = vadd.f32 %v2659_v26, %v2658_v53 }
 0x27b   : > { %v2661_v56 = vpop.f32.mrf.mxu0 }
 0x27d   : > { %v2662_v57 = vpop.f32.mrf.mxu0 }
 0x297   : > { %v2702_v55 = vpop.f32.mrf.mxu0 }
 0x299   : > { %v2703_v58 = vpop.f32.mrf.mxu0 }
 0x29a   : > { %v2704_v59 = vadd.f32 %v2703_v58, %v2702_v55 }
 0x29b   : > { %v2705_v60 = vpop.f32.mrf.mxu0 }
 0x29c   : > { %v2636_v19 = vpop.f32.mrf.mxu1 }
 0x29d   : > { %v2706_v61 = vpop.f32.mrf.mxu0 }
 0x29e   : > { %v2637_v62 = vpop.f32.mrf.mxu1 }
 0x29f   : > { %v2638_v2 = vadd.f32 %v2637_v62, %v2636_v19 }
 0x2a0   : > { %v2639_v33 = vpop.f32.mrf.mxu1 }
 0x2a1   : > { %v2050_v35 = vadd.f32 %v2660_v49, %v2638_v2 }
 0x2a2   : > { %v2640_v1 = vpop.f32.mrf.mxu1 }
 0x2bc   : > { %v2680_v3 = vpop.f32.mrf.mxu1 }
 0x2be   : > { %v2681_v4 = vpop.f32.mrf.mxu1 }
 0x2bf   : > { %v2682_v52 = vadd.f32 %v2681_v4, %v2680_v3 }
 0x2c0   : > { %v2683_v39 = vpop.f32.mrf.mxu1 }
 0x2c1   : > { %v2090_v5 = vadd.f32 %v2682_v52, %v2050_v35 }
 0x2c2   : > { %v2684_v8 = vpop.f32.mrf.mxu1 }
 0x2c3   : > { %v2130_v10 = vadd.f32 %v2704_v59, %v2090_v5 }
 0x2dc   : > { %v2169_v11 = vpop.f32.mrf.mxu1 }
 0x2dd   : > { %v2170_v13 = vadd.f32 %v2169_v11, %v2130_v10 }
 0x2de   : > { %v2755_v14 = vpop.f32.mrf.mxu1 }
 0x2df   : > { %2175 = vst [vmem:[%s214_s20] sm:$0xff] %v2170_v13 }
 0x2e0   : > { %v2172_v16 = vpop.f32.mrf.mxu1 }
 0x2e1   : > { %3073 = shalt.err (!%p3070_p9)
}
 0x2e2   : > { %s3074_s21 = scalar_lea.hbm %s3542_s29, 128  ;;  %s3078_s23 = scalar_lea.hbm %s3588_s3, 256 }
 0x2e3   : > { %p3075_p13 = scmp.ne.s32.totalorder %s3542_s29, %s3074_s21  ;;  %p3079_p4 = scmp.lt.s32.totalorder %s3542_s29, %s3588_s3 }
 0x2e4   : > { %p3080_p8 = scmp.lt.s32.totalorder %s3078_s23, %s3074_s21 }
 0x2e5   : > { %p3076_p5 = pnand %p3075_p13, %p3604_p0 }
 0x2e6   : > { %p3081_p3 = por %p3080_p8, %p3079_p4 }
 0x2e7   : > { %p3077_p10 = pneg %p3076_p5 }
 0x2e9   : > { %p3082_p11 = pnand %p3081_p3, %p3077_p10 }
 0x2eb   : > { %3085 = shalt.err (!%p3082_p11)
}
 0x2ec   : > { %2767 = dma.vmem_to_hbm [thread:$0]  (%p3604_p0), %s3544_s25, 128, %s3542_s29, %s2177_s5   ;;  %v2756_v63 = vpop.f32.mrf.mxu1 }
 0x2ed PF: > { %s2202_s30 = sand.u32 1, %s3116_s12   ;;  %p3605_p1 = scmp.ne.s32.totalorder %s3594_s19, 0 }
 0x2ee   : > { %p3606_p2 = scmp.ge.s32.totalorder %s3128_s15, 2  ;;  %s2203_s4 = scalar_lea.sflag [#allocation4], %s2202_s30 }
 0x2f0   : > { %p2781_p6 = pnand %p3606_p2, %p3605_p1 }
 0x2f2   : > { %p2782_p12 = pneg %p2781_p6 }
 0x2f4   : > { %3111 = dma.done.wait (%p2782_p12), %s2203_s4, 128  }
 0x2f5   : > { %3113 = vsyncadd (%p2782_p12), %s2203_s4, 4294967168  ;;  %p17_p7 = scmp.ge.s32.totalorder %s3230_s7, 4   ;;  %s3607_s12 = smov %s3120_s13 }
 0x2f6   : > { %s3608_s13 = smov %s3124_s14  ;;  %s3609_s14 = smov %s3246_s11 }
 0x2f7   : > { %s3610_s15 = smov %s3230_s7  ;;  %19 = sbr.rel (!%p17_p7) target bundleno = 6 (0x6), region = 85 }
 0x2fc   :  { %2208 = vsyncpa [#allocation3], 1 }
 0x2fd   :  { %2210 = vsyncpa [#allocation3 + $0x1], 1 }
 0x2fe   :  { %2211 = vsyncpa [#allocation6], 1 }
 0x2ff   :  { %2212 = vsyncpa [#allocation4], 1 }
 0x300   :  { %2214 = vsyncpa [#allocation4 + $0x1], 1 }

// kernel: tpu_custom_call.1
= control target key start
LH: loop header
LB: loop body
LE: loop exit
PB: predicated region body
PF: predicated region fallthrough
CT: control target
= control target key end

     0   :  { %8 = vsyncpa [#allocation3], 0  ;;  %s3585_s0 = inlined_call_operand.hbm [shape: f32[16,128], index: 0, kind: input, shape index: {}]   ;;  %s3586_s1 = inlined_call_operand.hbm [shape: bf16[1152,128], index: 1, kind: input, shape index: {}]   ;;  %s3587_s2 = inlined_call_operand.hbm [shape: bf16[1152,128], index: 2, kind: input, shape index: {}]   ;;  %s3588_s3 = inlined_call_operand.hbm [shape: f32[16,128], index: 3, kind: output, shape index: {}]  }
   0x1   :  { %10 = vsyncpa [#allocation3 + $0x1], 0 }
   0x2   :  { %11 = vsyncpa [#allocation6], 0 }
   0x3   :  { %12 = vsyncpa [#allocation4], 0 }
   0x4   :  { %14 = vsyncpa [#allocation4 + $0x1], 0  ;;  %s3158_s12 = smov 0   ;;  %s3160_s13 = smov 0  }
   0x5   :  { %s3162_s14 = smov 0   ;;  %s3164_s15 = smov 0  }
   0x6 LB: > { %s3179_s16 = sadd.s32 4294967295, %s3128_s15   ;;  %s2279_s17 = sadd.s32 4294967294, %s3128_s15   ;;  %s3128_s15 = sphi %s3164_s15, %s3610_s15   ;;  %s3124_s14 = sphi %s3162_s14, %s3609_s14   ;;  %s3120_s13 = sphi %s3160_s13, %s3608_s13   ;;  %s3116_s12 = sphi %s3158_s12, %s3607_s12  }
   0x7   : > { %p40_p0 = scmp.ne.s32.totalorder %s3120_s13, %s3116_s12  ;;  %p3589_p1 = scmp.eq.s32.totalorder %s3179_s16, 0 }
   0x8   : > { %p112_p3 = scmp.eq.s32.totalorder %s2279_s17, 1  ;;  %p2280_p5 = scmp.ge.s32.totalorder %s3128_s15, 1 }
   0x9   : > { %p3188_p4 = por %p3589_p1, %p40_p0  ;;  %p119_p7 = scmp.lt.s32.totalorder %s3128_s15, 3 }
   0xa   : > { %p3193_p6 = por %p112_p3, %p40_p0  ;;  %s3130_s21 = smov [#allocation5]  }
   0xb   : > { %s3593_s18 = scalar_select %p3188_p4, 1, 0 }
   0xc   : > { %s3594_s19 = scalar_select %p3193_p6, 1, 0 }
   0xd   : > { %p3198_p8 = pnand %p2280_p5, %p119_p7  ;;  %s131_s22 = sshll.u32 %s3130_s21, 4  ;;  %s132_s22 = int_to_ptr.vmem [resolvable:$true] %s131_s22 }
   0xe   : > { %s3131_s24 = smov [#allocation7]   ;;  %s2991_s26 = scalar_lea.vmem %s132_s22, 9216 }
   0xf   : > { %s3595_s20 = scalar_select %p3198_p8, 1, 0 }
  0x10   : > { %p2769_p9 = pneg %p3198_p8  ;;  %s144_s25 = sshll.u32 %s3131_s24, 4  ;;  %s145_s25 = int_to_ptr.vmem [resolvable:$true] %s144_s25 }
  0x11   : > { %p2992_p13 = scmp.ne.s32.totalorder %s132_s22, %s2991_s26  ;;  %p2999_p5 = scmp.lt.s32.totalorder %s132_s22, %s132_s22 }
  0x12   : > { %p3207_p11 = pnand %p2769_p9, %p3589_p1  ;;  %p3000_p7 = scmp.lt.s32.totalorder %s2991_s26, %s2991_s26 }
  0x14   : > { %p2982_p12 = pneg %p3207_p11  ;;  %p3001_p10 = por %p3000_p7, %p2999_p5 }
  0x16   : > { %p2994_p0 = pnand %p2992_p13, %p2982_p12 }
  0x18   : > { %p2995_p3 = pneg %p2994_p0 }
  0x1a   : > { %p3002_p9 = pnand %p3001_p10, %p2995_p3 }
  0x1c   : > { %3005 = shalt.err (!%p3002_p9)
}
  0x1d   : > { %s3132_s27 = smov 64   ;;  %s3133_s28 = smov 4  }
  0x1e   : > { %2772 = dma.hbm_to_vmem [thread:$0]  (!%p3207_p11), %s3586_s1, 9216, %s132_s22, [#allocation6], %s3132_s27, %s3132_s27, %s3133_s28  }
  0x1f   : > { %s3017_s4 = scalar_lea.vmem %s145_s25, 9216  ;;  %p3025_p2 = scmp.lt.s32.totalorder %s145_s25, %s145_s25 }
  0x20   : > { %p3018_p1 = scmp.ne.s32.totalorder %s145_s25, %s3017_s4  ;;  %p3026_p6 = scmp.lt.s32.totalorder %s3017_s4, %s3017_s4 }
  0x22   : > { %p3020_p13 = pnand %p3018_p1, %p2982_p12  ;;  %p3027_p5 = por %p3026_p6, %p3025_p2 }
  0x24   : > { %p3021_p0 = pneg %p3020_p13 }
  0x26   : > { %p3028_p10 = pnand %p3027_p5, %p3021_p0 }
  0x28   : > { %3031 = shalt.err (!%p3028_p10)
}
  0x29   : > { %2775 = dma.hbm_to_vmem [thread:$0]  (!%p3207_p11), %s3587_s2, 9216, %s145_s25, [#allocation6], %s3132_s27, %s3132_s27, %s3133_s28  }
  0x2a   : > { %s3230_s7 = sadd.s32 1, %s3128_s15   ;;  %s27_s8 = sadd.s32 1, %s3124_s14 }
  0x2b   : > { %s24_s9 = ssub.s32 %s3128_s15, %s3230_s7  ;;  %p34_p1 = scmp.ne.s32.totalorder %s3124_s14, %s3120_s13 }
  0x2c   : > { %p25_p2 = scmp.eq.s32.totalorder %s24_s9, 0  ;;  %p35_p6 = scmp.eq.s32.totalorder %s3128_s15, 0 }
  0x2d   : > { %p3597_p12 = scmp.eq.s32.totalorder %s3179_s16, 1  ;;  %p2786_p7 = scmp.lt.s32.totalorder %s3128_s15, 2 }
  0x2e   : > { %s3246_s11 = scalar_select %p25_p2, %s3124_s14, %s27_s8  }
  0x2f   : > { %p3240_p3 = por %p3597_p12, %p34_p1  ;;  %p36_p9 = por %p35_p6, %p34_p1 }
  0x30   : > { %s158_s17 = sand.u32 1, %s3124_s14   ;;  %s2285_s22 = sshll.u32 %s3128_s15, 7 }
  0x31   : > { %s3598_s10 = scalar_select %p3240_p3, 1, 0 }
  0x32   : > { %s2284_s21 = sshll.u32 %s158_s17, 3  ;;  %s3253_s25 = scalar_lea.hbm %s3585_s0, %s2285_s22 }
  0x33   : > { %s162_s26 = scalar_lea.vmem [#allocation2], %s2284_s21  ;;  %p3255_p11 = pnand %p2786_p7, %p36_p9 }
  0x34   : > { %s169_s27 = sshll.u32 %s162_s26, 4  ;;  %s159_s29 = scalar_lea.sflag [#allocation3], %s158_s17  ;;  %s170_s27 = int_to_ptr.vmem [resolvable:$true] %s169_s27 }
  0x35   : > { %s3032_s30 = scalar_lea.hbm %s3253_s25, 128  ;;  %p3034_p0 = pneg %p3255_p11 }
  0x36   : > { %p3033_p13 = scmp.ne.s32.totalorder %s3253_s25, %s3032_s30  ;;  %s3037_s6 = scalar_lea.hbm %s3585_s0, 256 }
  0x37   : > { %p3038_p1 = scmp.lt.s32.totalorder %s3253_s25, %s3585_s0  ;;  %p3039_p2 = scmp.lt.s32.totalorder %s3037_s6, %s3032_s30 }
  0x38   : > { %p3035_p5 = pnand %p3034_p0, %p3033_p13 }
  0x39   : > { %p3040_p6 = por %p3039_p2, %p3038_p1 }
  0x3a   : > { %p3036_p10 = pneg %p3035_p5 }
  0x3c   : > { %p3041_p12 = pnand %p3040_p6, %p3036_p10 }
  0x3e   : > { %3044 = shalt.err (!%p3041_p12)
}
  0x3f   : > { %s3045_s21 = scalar_lea.vmem %s170_s27, 128  ;;  %s3134_s17 = smov [#allocation2]  }
  0x40   : > { %p3046_p7 = scmp.ne.s32.totalorder %s170_s27, %s3045_s21  ;;  %s3050_s22 = sshll.u32 %s3134_s17, 4  ;;  %s3051_s22 = int_to_ptr.vmem [resolvable:$false] %s3050_s22 }
  0x41   : > { %s3052_s23 = scalar_lea.vmem %s3051_s22, 256  ;;  %p3053_p13 = scmp.lt.s32.totalorder %s170_s27, %s3051_s22 }
  0x42   : > { %p3048_p9 = pnand %p3046_p7, %p3034_p0  ;;  %p3054_p5 = scmp.lt.s32.totalorder %s3052_s23, %s3045_s21 }
  0x44   : > { %p3049_p3 = pneg %p3048_p9  ;;  %p3055_p4 = por %p3054_p5, %p3053_p13 }
  0x46   : > { %p3056_p8 = pnand %p3055_p4, %p3049_p3 }
  0x48   : > { %3059 = shalt.err (!%p3056_p8)
}
  0x49   : > { %2779 = dma.hbm_to_vmem [thread:$0]  (!%p3255_p11), %s3253_s25, 128, %s170_s27, %s159_s29  }
  0x4a   : > { %p3600_p10 = scmp.ne.s32.totalorder %s3595_s20, 0 }
  0x4b   : > { %s3276_s24 = sand.u32 (!%p3600_p10), 1, %s3120_s13   ;;  %p3601_p4 = scmp.ne.s32.totalorder (!%p3600_p10), %s3593_s18, 0 }
  0x4c   : > { %178 = sbr.rel (%p3600_p10) target bundleno = 749 (0x2ed), region = 32  ;;  %s2287_s26 = sshll.u32 (!%p3600_p10), %s3276_s24, 3 }
  0x4d   : > { %s181_s30 = scalar_lea.sflag (!%p3600_p10), [#allocation3], %s3276_s24  ;;  %s3282_s4 = scalar_lea.vmem (!%p3600_p10), [#allocation2], %s2287_s26 }
  0x51   : > { %3103 = dma.done.wait (%p3601_p4), %s181_s30, 128  }
  0x52   : > { %3105 = vsyncadd (%p3601_p4), %s181_s30, 4294967168  ;;  %p3602_p8 = scmp.eq.s32.totalorder %s3179_s16, 0 }
  0x54   : > { %3107 = dma.done.wait (%p3602_p8), [#allocation6], 18432   ;;  %p3603_p3 = pmov %p3602_p8 }
  0x55   : > { %v2828_v0 = vld [vmem:[#allocation5 + $0x78] sm:$0xff]   ;;  %v2832_v4 = vld [vmem:[#allocation5 + $0x70] sm:$0xff]   ;;  %v2836_v8 = vld [vmem:[#allocation5 + $0x68] sm:$0xff]   ;;  %v3135_v33 = vmov 0.0   ;;  %vm3136_vm12 = vmmov 0   ;;  %s2520_s18 = sshll.u32 %s3179_s16, 7 }
  0x56   : > { %3109 = vsyncadd (%p3603_p3), [#allocation6], 4294948864  ;;  %v2829_v1 = vld [vmem:[#allocation5 + $0x38] sm:$0xff]   ;;  %2523 = vmatprep.subr.bf16.mxu0 %v2828_v0  ;;  %v2833_v5 = vld [vmem:[#allocation5 + $0x30] sm:$0xff]   ;;  %s214_s20 = scalar_lea.vmem [#allocation8], %s2287_s26  ;;  %s3542_s29 = scalar_lea.hbm %s3588_s3, %s2520_s18 }
  0x57   : > { %v2830_v2 = vld [vmem:[#allocation5 + $0xf8] sm:$0xff]   ;;  %2524 = vmatpush3.bf16.msra.mxu0 %v2829_v1  ;;  %v2834_v6 = vld [vmem:[#allocation5 + $0xf0] sm:$0xff]   ;;  %v2837_v9 = vld [vmem:[#allocation5 + $0x28] sm:$0xff]   ;;  %s2190_s25 = sshll.u32 %s214_s20, 4  ;;  %s2177_s5 = scalar_lea.sflag [#allocation4], %s3276_s24  ;;  %s3544_s25 = int_to_ptr.vmem [resolvable:$true] %s2190_s25 }
  0x58   : > { %v2831_v3 = vld [vmem:[#allocation5 + $0xb8] sm:$0xff]   ;;  %2545 = vmatprep.subr.bf16.mxu1 %v2830_v2  ;;  %2525 = vmatprep.subr.bf16.mxu0 %v2832_v4  ;;  %v2835_v7 = vld [vmem:[#allocation5 + $0xb0] sm:$0xff]   ;;  %v2838_v10 = vld [vmem:[#allocation5 + $0xe8] sm:$0xff]   ;;  %s3060_s16 = scalar_lea.vmem %s3544_s25, 128  ;;  %p3604_p0 = scmp.ne.s32.totalorder %s3598_s10, 0 }
  0x59   : > { %2546 = vmatpush3.bf16.msra.mxu1 %v2831_v3  ;;  %v2839_v11 = vld [vmem:[#allocation5 + $0xa8] sm:$0xff]   ;;  %v2840_v12 = vld [vmem:[#allocation5 + $0x60] sm:$0xff]   ;;  %v2844_v16 = vld [vmem:[#allocation5 + $0x58] sm:$0xff]   ;;  %p3061_p11 = scmp.ne.s32.totalorder %s3544_s25, %s3060_s16  ;;  %s3137_s6 = smov [#allocation8]  }
  0x5a   : > { %2547 = vmatprep.subr.bf16.mxu1 %v2834_v6  ;;  %v2841_v13 = vld [vmem:[#allocation5 + $0x20] sm:$0xff]   ;;  %v2845_v17 = vld [vmem:[#allocation5 + $0x18] sm:$0xff]   ;;  %v2848_v20 = vld [vmem:[#allocation5 + $0x50] sm:$0xff]   ;;  %s3064_s8 = sshll.u32 %s3137_s6, 4  ;;  %s3065_s8 = int_to_ptr.vmem [resolvable:$false] %s3064_s8 }
  0x5b   : > { %2526 = vmatpush3.bf16.msra.mxu0 %v2833_v5  ;;  %v2842_v14 = vld [vmem:[#allocation5 + $0xe0] sm:$0xff]   ;;  %v2846_v18 = vld [vmem:[#allocation5 + $0xd8] sm:$0xff]   ;;  %v2849_v21 = vld [vmem:[#allocation5 + $0x10] sm:$0xff]   ;;  %p3062_p1 = pnand %p3061_p11, %p3604_p0  ;;  %s3066_s9 = scalar_lea.vmem %s3065_s8, 256 }
  0x5c   : > { %2527 = vmatprep.subr.bf16.mxu0 %v2836_v8  ;;  %v2843_v15 = vld [vmem:[#allocation5 + $0xa0] sm:$0xff]   ;;  %v2847_v19 = vld [vmem:[#allocation5 + $0x98] sm:$0xff]   ;;  %v2850_v22 = vld [vmem:[#allocation5 + $0xd0] sm:$0xff]   ;;  %p3067_p6 = scmp.lt.s32.totalorder %s3544_s25, %s3065_s8  ;;  %p3068_p12 = scmp.lt.s32.totalorder %s3066_s9, %s3060_s16 }
  0x5d   : > { %2548 = vmatpush3.bf16.msra.mxu1 %v2835_v7  ;;  %v2851_v23 = vld [vmem:[#allocation5 + $0x90] sm:$0xff]   ;;  %v2852_v24 = vld [vmem:[#allocation5 + $0x48] sm:$0xff]   ;;  %v2856_v28 = vld [vmem:[#allocation5 + $0x40] sm:$0xff]   ;;  %p3063_p2 = pneg %p3062_p1 }
  0x5e   : > { %2549 = vmatprep.subr.bf16.mxu1 %v2838_v10  ;;  %v2853_v25 = vld [vmem:[#allocation5 + $0x8] sm:$0xff]   ;;  %v2857_v29 = vld [vmem:[#allocation5] sm:$0xff]   ;;  %v3293_v32 = vld [vmem:[%s3282_s4] sm:$0xff]  ;;  %p3069_p7 = por %p3068_p12, %p3067_p6 }
  0x5f   : > { %2528 = vmatpush3.bf16.msra.mxu0 %v2837_v9  ;;  %v2854_v26 = vld [vmem:[#allocation5 + $0xc8] sm:$0xff]   ;;  %v2858_v30 = vld [vmem:[#allocation5 + $0xc0] sm:$0xff]   ;;  %vm368_vm0 = vcmp.ge.f32.partialorder %v3293_v32, -2.2  ;;  %vm371_vm1 = vcmp.ge.f32.partialorder %v3293_v32, -1.8 }
  0x60   : > { %2529 = vmatprep.subr.bf16.mxu0 %v2840_v12  ;;  %v2855_v27 = vld [vmem:[#allocation5 + $0x88] sm:$0xff]   ;;  %v2859_v31 = vld [vmem:[#allocation5 + $0x80] sm:$0xff]   ;;  %vm374_vm2 = vcmp.ge.f32.partialorder %v3293_v32, -1.4  ;;  %v2291_v34 = vsel %vm368_vm0, 1.0, %v3135_v33  ;;  %v2292_v35 = vsel %vm371_vm1, 1.0, %v3135_v33  ;;  %p3070_p9 = pnand %p3069_p7, %p3063_p2 }
  0x61   : > { %2550 = vmatpush3.bf16.msra.mxu1 %v2839_v11  ;;  %v2293_v36 = vsel %vm374_vm2, 1.0, %v3135_v33  ;;  %vm377_vm3 = vcmp.ge.f32.partialorder %v3293_v32, -1.0  ;;  %v2860_v37 = vld [vmem:[#allocation5 + $0x178] sm:$0xff]   ;;  %vm380_vm4 = vcmp.ge.f32.partialorder %v3293_v32, -0.6  ;;  %v404_v39 = vsub.f32 %v2291_v34, %v2292_v35 }
  0x62   : > { %2551 = vmatprep.subr.bf16.mxu1 %v2842_v14  ;;  %v2294_v38 = vsel %vm377_vm3, 1.0, %v3135_v33  ;;  %v2862_v40 = vld [vmem:[#allocation5 + $0x1f8] sm:$0xff]   ;;  %v2295_v41 = vsel %vm380_vm4, 1.0, %v3135_v33  ;;  %v405_v42 = vsub.f32 %v2292_v35, %v2293_v36  ;;  %v3306_v43 = vmul.f32 2.4999995, %v3293_v32 }
  0x63   : > { %2530 = vmatpush3.bf16.msra.mxu0 %v2841_v13  ;;  %v3309_v44 = vmul.f32 1.2499998, %v3293_v32  ;;  %v406_v45 = vsub.f32 %v2293_v36, %v2294_v38  ;;  %v3312_v46 = vmul.f32 0.83333313, %v3293_v32  ;;  %vm383_vm5 = vcmp.ge.f32.partialorder %v3293_v32, -0.19999999 }
  0x64   : > { %2531 = vmatprep.subr.bf16.mxu0 %v2844_v16  ;;  %vm386_vm6 = vcmp.ge.f32.partialorder %v3293_v32, 0.20000005  ;;  %v2303_v47 = vadd.f32 5.499999, %v3306_v43  ;;  %v2304_v48 = vadd.f32 4.499999, %v3306_v43  ;;  %v407_v50 = vsub.f32 %v2294_v38, %v2295_v41 }
  0x65   : > { %2552 = vmatpush3.bf16.msra.mxu1 %v2843_v15  ;;  %v2305_v49 = vadd.f32 3.499999, %v3306_v43  ;;  %v2306_v51 = vadd.f32 2.4999995, %v3306_v43  ;;  %v2314_v52 = vadd.f32 2.7499995, %v3309_v44 }
  0x66   : > { %2553 = vmatprep.subr.bf16.mxu1 %v2846_v18  ;;  %v2315_v53 = vadd.f32 2.2499995, %v3309_v44  ;;  %v427_v54 = vmul.f32 %v2303_v47, %v404_v39  ;;  %v428_v55 = vsub.f32 1.0, %v2304_v48  ;;  %v431_v56 = vmul.f32 %v2304_v48, %v405_v42 }
  0x67   : > { %2532 = vmatpush3.bf16.msra.mxu0 %v2845_v17  ;;  %v432_v57 = vsub.f32 1.0, %v2305_v49  ;;  %v435_v58 = vmul.f32 %v2305_v49, %v406_v45  ;;  %v436_v59 = vsub.f32 1.0, %v2306_v51  ;;  %v2316_v60 = vadd.f32 1.7499995, %v3309_v44 }
  0x68   : > { %2533 = vmatprep.subr.bf16.mxu0 %v2848_v20  ;;  %v429_v61 = vmul.f32 %v428_v55, %v405_v42  ;;  %v479_v63 = vsub.f32 1.0, %v2315_v53  ;;  %v2325_v0 = vadd.f32 1.4999996, %v3312_v46  ;;  %v2296_v3 = vsel %vm383_vm5, 1.0, %v3135_v33 }
  0x69   : > { %2554 = vmatpush3.bf16.msra.mxu1 %v2847_v19  ;;  %v433_v62 = vmul.f32 %v432_v57, %v406_v45  ;;  %v437_v1 = vmul.f32 %v436_v59, %v407_v50  ;;  %v483_v2 = vsub.f32 1.0, %v2316_v60  ;;  %v2324_v6 = vadd.f32 1.8333329, %v3312_v46 }
  0x6a   : > { %2555 = vmatprep.subr.bf16.mxu1 %v2850_v22  ;;  %v430_v4 = vadd.f32 %v429_v61, %v427_v54  ;;  %v2297_v7 = vsel %vm386_vm6, 1.0, %v3135_v33  ;;  %v525_v9 = vsub.f32 1.0, %v2325_v0  ;;  %v408_v10 = vsub.f32 %v2295_v41, %v2296_v3 }
  0x6b   : > { %2534 = vmatpush3.bf16.msra.mxu0 %v2849_v21  ;;  %v434_v5 = vadd.f32 %v433_v62, %v431_v56  ;;  %v438_v8 = vadd.f32 %v437_v1, %v435_v58  ;;  %v409_v15 = vsub.f32 %v2296_v3, %v2297_v7  ;;  %v2307_v16 = vadd.f32 1.4999998, %v3306_v43  ;;  %v2866_v1 = vld [vmem:[#allocation5 + $0x1f0] sm:$0xff]  }
  0x6c   : > { %2535 = vmatprep.subr.bf16.mxu0 %v2852_v24  ;;  %v478_v11 = vmul.f32 %v2314_v52, %v430_v4  ;;  %v2308_v17 = vadd.f32 0.49999985, %v3306_v43  ;;  %v439_v19 = vmul.f32 %v2306_v51, %v407_v50  ;;  %v2317_v20 = vadd.f32 1.2499998, %v3309_v44  ;;  %v2867_v3 = vld [vmem:[#allocation5 + $0x1b0] sm:$0xff]   ;;  %v2870_v4 = vld [vmem:[#allocation5 + $0x1e8] sm:$0xff]  }
  0x6d   : > { %2556 = vmatpush3.bf16.msra.mxu1 %v2851_v23  ;;  %v480_v12 = vmul.f32 %v479_v63, %v434_v5  ;;  %v482_v13 = vmul.f32 %v2315_v53, %v434_v5  ;;  %v484_v14 = vmul.f32 %v483_v2, %v438_v8  ;;  %v3335_v21 = vadd.f32 0.7499999, %v3309_v44  ;;  %v2863_v63 = vld [vmem:[#allocation5 + $0x1b8] sm:$0xff]  }
  0x6e   : > { %2557 = vmatprep.subr.bf16.mxu1 %v2854_v26  ;;  %v440_v23 = vsub.f32 1.0, %v2307_v16  ;;  %v443_v24 = vmul.f32 %v2307_v16, %v408_v10  ;;  %v3340_v35 = vadd.f32 0.83333313, %v3312_v46  ;;  %v486_v36 = vmul.f32 %v2316_v60, %v438_v8  ;;  %v2875_v16 = vld [vmem:[#allocation5 + $0x1a0] sm:$0xff]  }
  0x6f   : > { %2536 = vmatpush3.bf16.msra.mxu0 %v2853_v25  ;;  %v481_v18 = vadd.f32 %v480_v12, %v478_v11  ;;  %v485_v22 = vadd.f32 %v484_v14, %v482_v13  ;;  %v444_v25 = vsub.f32 1.0, %v2308_v17  ;;  %v361_v38 = vsub.f32 0.0, %v3293_v32  ;;  %v2871_v11 = vld [vmem:[#allocation5 + $0x1a8] sm:$0xff]   ;;  %v2874_v12 = vld [vmem:[#allocation5 + $0x1e0] sm:$0xff]  }
  0x70   : > { %2537 = vmatprep.subr.bf16.mxu0 %v2856_v28  ;;  %v491_v28 = vsub.f32 1.0, %v3335_v21  ;;  %v533_v42 = vsub.f32 1.0, %v3340_v35  ;;  %vm389_vm7 = vcmp.ge.f32.partialorder %v3293_v32, 0.6  ;;  %v2309_v59 = vadd.f32 -0.5, %v3306_v43 }
  0x71   : > { %2558 = vmatpush3.bf16.msra.mxu1 %v2855_v27  ;;  %v524_v26 = vmul.f32 %v2324_v6, %v481_v18  ;;  %v487_v27 = vsub.f32 1.0, %v2317_v20  ;;  %v445_v34 = vmul.f32 %v444_v25, %v409_v15  ;;  %v362_v45 = vmul.f32 1.442695, %v361_v38 }
  0x72   : > { %2559 = vmatprep.subr.bf16.mxu1 %v2858_v30  ;;  %v526_v30 = vmul.f32 %v525_v9, %v485_v22  ;;  %v528_v53 = vmul.f32 %v2325_v0, %v485_v22  ;;  %v2298_v60 = vsel %vm389_vm7, 1.0, %v3135_v33  ;;  %v448_v0 = vsub.f32 1.0, %v2309_v59 }
  0x73   : > { %2538 = vmatpush3.bf16.msra.mxu0 %v2857_v29  ;;  %v2326_v29 = vadd.f32 1.1666664, %v3312_v46  ;;  %v446_v41 = vadd.f32 %v445_v34, %v443_v24  ;;  %2972 = vpow2.f32 %v362_v45  ;;  %v410_v2 = vsub.f32 %v2297_v7, %v2298_v60 }
  0x74   : > { %2567 = vmatprep.subr.bf16.mxu0 %v2860_v37  ;;  %v527_v39 = vadd.f32 %v526_v30, %v524_v26  ;;  %vm392_vm8 = vcmp.ge.f32.partialorder %v3293_v32, 1.0  ;;  %v447_v9 = vmul.f32 %v2308_v17, %v409_v15  ;;  %v2320_v7 = vadd.f32 -0.25, %v3309_v44  ;;  %v2878_v15 = vld [vmem:[#allocation5 + $0x1d8] sm:$0xff]   ;;  %v2882_v30 = vld [vmem:[#allocation5 + $0x1d0] sm:$0xff]  }
  0x75   : > { %2560 = vmatpush3.bf16.msra.mxu1 %v2859_v31  ;;  %v441_v31 = vmul.f32 %v440_v23, %v408_v10  ;;  %v529_v37 = vsub.f32 1.0, %v2326_v29  ;;  %v492_v50 = vmul.f32 %v491_v28, %v446_v41  ;;  %v2299_v8 = vsel %vm392_vm8, 1.0, %v3135_v33 }
  0x76   : > { %2589 = vmatprep.subr.bf16.mxu1 %v2862_v40  ;;  %v556_v47 = vpack.c.bf16 %v527_v39, %v527_v39  ;;  %v449_v10 = vmul.f32 %v448_v0, %v410_v2  ;;  %v411_v13 = vsub.f32 %v2298_v60, %v2299_v8  ;;  %v2310_v14 = vadd.f32 -1.4999998, %v3306_v43 }
  0x77   : > { %v442_v40 = vadd.f32 %v441_v31, %v439_v19  ;;  %v2319_v19 = vadd.f32 0.24999993, %v3309_v44  ;;  %v451_v17 = vmul.f32 %v2309_v59, %v410_v2  ;;  %v494_v23 = vmul.f32 %v3335_v21, %v446_v41  ;;  %v2861_v2 = vld [vmem:[#allocation5 + $0x138] sm:$0xff]  }
  0x78   : > { %1028 = vmatprep.mubr.bf16.mxu0 %v556_v47  ;;  %v450_v18 = vadd.f32 %v449_v10, %v447_v9  ;;  %v452_v22 = vsub.f32 1.0, %v2310_v14  ;;  %v499_v25 = vsub.f32 1.0, %v2320_v7  ;;  %v3360_v26 = vadd.f32 0.4999999, %v3312_v46 }
  0x79   : > { %v488_v48 = vmul.f32 %v487_v27, %v442_v40  ;;  %v490_v49 = vmul.f32 %v2317_v20, %v442_v40  ;;  %v3356_v20 = vadd.f32 0.16666661, %v3312_v46  ;;  %v495_v24 = vsub.f32 1.0, %v2319_v19  ;;  %v2879_v27 = vld [vmem:[#allocation5 + $0x198] sm:$0xff]  }
  0x7a   : > { %v453_v28 = vmul.f32 %v452_v22, %v411_v13  ;;  %vm395_vm9 = vcmp.ge.f32.partialorder %v3293_v32, 1.4000001  ;;  %vm398_vm10 = vcmp.ge.f32.partialorder %v3293_v32, 1.8  ;;  %vm401_vm11 = vcmp.ge.f32.partialorder %v3293_v32, 2.2 }
  0x7b   : > { %v489_v51 = vadd.f32 %v488_v48, %v486_v36  ;;  %v3344_v52 = vadd.f32 %v492_v50, %v490_v49  ;;  %v496_v31 = vmul.f32 %v495_v24, %v450_v18  ;;  %v2300_v34 = vsel %vm395_vm9, 1.0, %v3135_v33 }
  0x7c   : > { %v3367_v36 = vsel %vm398_vm10, 1.0, %v3135_v33  ;;  %v454_v21 = vadd.f32 %v453_v28, %v451_v17  ;;  %v412_v38 = vsub.f32 %v2299_v8, %v2300_v34  ;;  %v2311_v40 = vadd.f32 -2.4999995, %v3306_v43  ;;  %v2891_v28 = vld [vmem:[#allocation5 + $0x180] sm:$0xff]  }
  0x7d   : > { %v532_v54 = vmul.f32 %v2326_v29, %v489_v51  ;;  %v534_v55 = vmul.f32 %v533_v42, %v3344_v52  ;;  %v530_v56 = vmul.f32 %v529_v37, %v489_v51  ;;  %v541_v29 = vsub.f32 1.0, %v3356_v20 }
  0x7e   : > { %v498_v37 = vmul.f32 %v2319_v19, %v450_v18  ;;  %v3370_v39 = vadd.f32 %v496_v31, %v494_v23  ;;  %v2312_v41 = vadd.f32 -3.4999995, %v3306_v43  ;;  %v2321_v42 = vadd.f32 -0.7499999, %v3309_v44  ;;  %v2865_v23 = vld [vmem:[#allocation5 + $0x130] sm:$0xff]  }
  0x7f   : > { %v535_v57 = vadd.f32 %v534_v55, %v532_v54  ;;  %v531_v58 = vadd.f32 %v530_v56, %v528_v53  ;;  %v500_v45 = vmul.f32 %v499_v25, %v454_v21  ;;  %v413_v47 = vsub.f32 %v2300_v34, %v3367_v36  ;;  %v2883_v54 = vld [vmem:[#allocation5 + $0x190] sm:$0xff]   ;;  %v2886_v55 = vld [vmem:[#allocation5 + $0x1c8] sm:$0xff]  }
  0x80   : > { %v2973_v5 = vpop.eup %2972  ;;  %v3377_v48 = vadd.f32 -1.2499998, %v3309_v44  ;;  %v2330_v49 = vadd.f32 -0.16666667, %v3312_v46  ;;  %v2302_v50 = vsel %vm401_vm11, 1.0, %v3135_v33  ;;  %v455_v51 = vmul.f32 %v2310_v14, %v411_v13 }
  0x81   : > { %v558_v61 = vpack.c.bf16 %v535_v57, %v535_v57  ;;  %v557_v62 = vpack.c.bf16 %v531_v58, %v531_v58  ;;  %v364_v6 = vadd.f32 1.0, %v2973_v5  ;;  %v456_v53 = vsub.f32 1.0, %v2311_v40 }
  0x82   : > { %v501_v56 = vadd.f32 %v500_v45, %v498_v37  ;;  %v540_v57 = vmul.f32 %v3360_v26, %v3370_v39  ;;  %v459_v58 = vmul.f32 %v2311_v40, %v412_v38  ;;  %v460_v59 = vsub.f32 1.0, %v2312_v41  ;;  %v2869_v40 = vld [vmem:[#allocation5 + $0x128] sm:$0xff]  }
  0x83   : > { %1068 = vmatprep.mubr.bf16.mxu1 %v558_v61  ;;  %2974 = vrcp.f32 %v364_v6  ;;  %v457_v60 = vmul.f32 %v456_v53, %v412_v38  ;;  %v503_v61 = vsub.f32 1.0, %v2321_v42  ;;  %v2864_v6 = vld [vmem:[#allocation5 + $0x170] sm:$0xff]   ;;  %v502_v9 = vmul.f32 %v2320_v7, %v454_v21  ;;  %v2873_v53 = vld [vmem:[#allocation5 + $0x120] sm:$0xff]  }
  0x84   : > { %1069 = vmatmul.mubr.bf16.vlgmr.msra.gmra.mxu1 %v557_v62  ;;  %v507_v62 = vsub.f32 1.0, %v3377_v48  ;;  %v542_v0 = vmul.f32 %v541_v29, %v501_v56  ;;  %v545_v10 = vsub.f32 1.0, %v2330_v49  ;;  %v463_v18 = vmul.f32 %v2312_v41, %v413_v47 }
  0x85   : > { %2590 = vmatpush3.bf16.msra.mxu1 %v2863_v63  ;;  %v3385_v63 = vadd.f32 -0.4999999, %v3312_v46  ;;  %v458_v8 = vadd.f32 %v457_v60, %v455_v51  ;;  %v2323_v22 = vadd.f32 -1.7499998, %v3309_v44  ;;  %v2332_v31 = vadd.f32 -0.83333313, %v3312_v46 }
  0x86   : > { %2591 = vmatprep.subr.bf16.mxu1 %v2866_v1  ;;  %v543_v13 = vadd.f32 %v542_v0, %v540_v57  ;;  %v2872_v46 = vld [vmem:[#allocation5 + $0x160] sm:$0xff]   ;;  %v2880_v57 = vld [vmem:[#allocation5 + $0x150] sm:$0xff]   ;;  %v536_v60 = vmul.f32 %v3340_v35, %v3344_v52  ;;  %v2892_v0 = vld [vmem:[#allocation5 + $0x238] sm:$0xff]  }
  0x87   : > { %v506_v17 = vmul.f32 %v2321_v42, %v458_v8  ;;  %v549_v7 = vsub.f32 1.0, %v3385_v63  ;;  %v553_v38 = vsub.f32 1.0, %v2332_v31  ;;  %v2894_v35 = vld [vmem:[#allocation5 + $0x228] sm:$0xff]   ;;  %v2895_v52 = vld [vmem:[#allocation5 + $0x220] sm:$0xff]  }
  0x88   : > { %v2920_v31 = vld [vmem:[#allocation7 + $0xc0] sm:$0xff]  }
  0x89   : > { %2592 = vmatpush3.bf16.msra.mxu1 %v2867_v3  ;;  %v414_v3 = vsub.f32 %v3367_v36, %v2302_v50  ;;  %v537_v36 = vsub.f32 1.0, %v3360_v26 }
  0x8a   : > { %2593 = vmatprep.subr.bf16.mxu1 %v2870_v4  ;;  %v461_v4 = vmul.f32 %v460_v59, %v413_v47  ;;  %v2885_v59 = vld [vmem:[#allocation5 + $0x108] sm:$0xff]  }
  0x8c   : > { %v462_v14 = vadd.f32 %v461_v4, %v459_v58  ;;  %v2884_v58 = vld [vmem:[#allocation5 + $0x148] sm:$0xff]   ;;  %v2893_v4 = vld [vmem:[#allocation5 + $0x230] sm:$0xff]  }
  0x8d   : > { %2594 = vmatpush3.bf16.msra.mxu1 %v2871_v11  ;;  %v2887_v11 = vld [vmem:[#allocation5 + $0x188] sm:$0xff]  }
  0x8e   : > { %2595 = vmatprep.subr.bf16.mxu1 %v2874_v12  ;;  %v2890_v12 = vld [vmem:[#allocation5 + $0x1c0] sm:$0xff]   ;;  %v508_v24 = vmul.f32 %v507_v62, %v462_v14  ;;  %v510_v42 = vmul.f32 %v3377_v48, %v462_v14  ;;  %v2881_v48 = vld [vmem:[#allocation5 + $0x110] sm:$0xff]   ;;  %v538_v62 = vmul.f32 %v537_v36, %v3370_v39  ;;  %v2896_v39 = vld [vmem:[#allocation5 + $0x218] sm:$0xff]  }
  0x8f   : > { %v2902_v14 = vld [vmem:[#allocation7 + $0xf0] sm:$0xff]   ;;  %v2923_v36 = vld [vmem:[#allocation7 + $0x20] sm:$0xff]  }
  0x90   : > { %v2975_v1 = vpop.eup %2974  ;;  %v3394_v34 = vadd.f32 %v508_v24, %v506_v17  ;;  %v2908_v17 = vld [vmem:[#allocation7 + $0xd8] sm:$0xff]   ;;  %v2912_v24 = vld [vmem:[#allocation7 + $0xd0] sm:$0xff]  }
  0x91   : > { %2596 = vmatpush3.bf16.msra.mxu1 %v2875_v16  ;;  %v366_v5 = vmul.f32 %v2975_v1, %v3293_v32  ;;  %v2313_v16 = vadd.f32 -4.499999, %v3306_v43  ;;  %v560_v32 = vpack.c.bf16 %v543_v13, %v543_v13  ;;  %v511_v43 = vsub.f32 1.0, %v2323_v22  ;;  %v2889_v1 = vld [vmem:[#allocation5 + $0x100] sm:$0xff]   ;;  %v2901_v13 = vld [vmem:[#allocation7 + $0xb8] sm:$0xff]  }
  0x92   : > { %2597 = vmatprep.subr.bf16.mxu1 %v2878_v15  ;;  %v504_v15 = vmul.f32 %v503_v61, %v458_v8  ;;  %v550_v41 = vmul.f32 %v549_v7, %v3394_v34  ;;  %v2888_v61 = vld [vmem:[#allocation5 + $0x140] sm:$0xff]   ;;  %v2898_v8 = vld [vmem:[#allocation5 + $0x208] sm:$0xff]   ;;  %v2909_v22 = vld [vmem:[#allocation7 + $0x78] sm:$0xff]  }
  0x93   : > { %v367_v19 = vpack.c.bf16 %v366_v5, %v366_v5  ;;  %v464_v25 = vsub.f32 1.0, %v2313_v16  ;;  %v2897_v5 = vld [vmem:[#allocation5 + $0x210] sm:$0xff]  }
  0x94   : > { %v505_v29 = vadd.f32 %v504_v15, %v502_v9  ;;  %v2903_v16 = vld [vmem:[#allocation7 + $0xb0] sm:$0xff]   ;;  %v2907_v15 = vld [vmem:[#allocation7 + $0xa0] sm:$0xff]  }
  0x95   : > { %2598 = vmatpush3.bf16.msra.mxu1 %v2879_v27  ;;  %1029 = vmatmul.mubr.bf16.vlgmr.msra.gmra.mxu0 %v367_v19  ;;  %v2868_v27 = vld [vmem:[#allocation5 + $0x168] sm:$0xff]   ;;  %v465_v44 = vmul.f32 %v464_v25, %v414_v3  ;;  %v2906_v19 = vld [vmem:[#allocation7 + $0xe0] sm:$0xff]   ;;  %v2913_v7 = vld [vmem:[#allocation7 + $0x70] sm:$0xff]  }
  0x96   : > { %2599 = vmatprep.subr.bf16.mxu1 %v2882_v30  ;;  %v544_v30 = vmul.f32 %v3356_v20, %v501_v56  ;;  %2568 = vmatpush3.bf16.msra.mxu0 %v2861_v2  ;;  %v548_v21 = vmul.f32 %v2330_v49, %v505_v29  ;;  %v546_v37 = vmul.f32 %v545_v10, %v505_v29  ;;  %v2877_v56 = vld [vmem:[#allocation5 + $0x118] sm:$0xff]   ;;  %v2899_v10 = vld [vmem:[#allocation5 + $0x200] sm:$0xff]   ;;  %v2914_v25 = vld [vmem:[#allocation7 + $0x90] sm:$0xff]  }
  0x97   : > { %2569 = vmatprep.subr.bf16.mxu0 %v2864_v6  ;;  %1108 = vmatprep.mubr.bf16.mxu0 %v560_v32  ;;  %v466_v20 = vadd.f32 %v465_v44, %v463_v18  ;;  %v539_v2 = vadd.f32 %v538_v62, %v536_v60  ;;  %v552_v6 = vmul.f32 %v3385_v63, %v3394_v34  ;;  %v2904_v63 = vld [vmem:[#allocation7 + $0xe8] sm:$0xff]   ;;  %v2911_v32 = vld [vmem:[#allocation7 + $0x38] sm:$0xff]   ;;  %v2921_v34 = vld [vmem:[#allocation7 + $0x60] sm:$0xff]  }
  0x98   : > { %v547_v45 = vadd.f32 %v546_v37, %v544_v30  ;;  %v551_v47 = vadd.f32 %v550_v41, %v548_v21  ;;  %v2905_v18 = vld [vmem:[#allocation7 + $0xa8] sm:$0xff]   ;;  %v2922_v44 = vld [vmem:[#allocation7 + $0x80] sm:$0xff]   ;;  %v2924_v21 = vld [vmem:[#allocation7 + $0x1f8] sm:$0xff]  }
  0x99   : > { %2600 = vmatpush3.bf16.msra.mxu1 %v2883_v54  ;;  %v512_v50 = vmul.f32 %v511_v43, %v466_v20  ;;  %v2876_v54 = vld [vmem:[#allocation5 + $0x158] sm:$0xff]   ;;  %v559_v3 = vpack.c.bf16 %v539_v2, %v539_v2  ;;  %v2917_v29 = vld [vmem:[#allocation7 + $0x68] sm:$0xff]  }
  0x9a   : > { %2601 = vmatprep.subr.bf16.mxu1 %v2886_v55  ;;  %2570 = vmatpush3.bf16.msra.mxu0 %v2865_v23  ;;  %v561_v51 = vpack.c.bf16 %v547_v45, %v547_v45  ;;  %v562_v26 = vpack.c.bf16 %v551_v47, %v551_v47  ;;  %v2910_v23 = vld [vmem:[#allocation7 + $0x98] sm:$0xff]   ;;  %v2918_v30 = vld [vmem:[#allocation7 + $0x88] sm:$0xff]   ;;  %v2929_v45 = vld [vmem:[#allocation7 + $0x50] sm:$0xff]  }
  0x9b   : > { %2571 = vmatprep.subr.bf16.mxu0 %v2868_v27  ;;  %v513_v49 = vadd.f32 %v512_v50, %v510_v42  ;;  %v2915_v27 = vld [vmem:[#allocation7 + $0x30] sm:$0xff]   ;;  %v2919_v43 = vld [vmem:[#allocation7 + $0x28] sm:$0xff]   ;;  %v2925_v37 = vld [vmem:[#allocation7 + $0x58] sm:$0xff]  }
  0x9c   : > { %1148 = vmatprep.mubr.bf16.mxu1 %v562_v26  ;;  %v2931_v47 = vld [vmem:[#allocation7 + $0x10] sm:$0xff]   ;;  %v2933_v50 = vld [vmem:[#allocation7 + $0x48] sm:$0xff]   ;;  %v2939_v26 = vld [vmem:[#allocation7] sm:$0xff]  }
  0x9d   : > { %2602 = vmatpush3.bf16.msra.mxu1 %v2887_v11  ;;  %v554_v55 = vmul.f32 %v553_v38, %v513_v49  ;;  %v2927_v38 = vld [vmem:[#allocation7 + $0x18] sm:$0xff]  }
  0x9e   : > { %2603 = vmatprep.subr.bf16.mxu1 %v2890_v12  ;;  %2572 = vmatpush3.bf16.msra.mxu0 %v2869_v40  ;;  %v2900_v12 = vld [vmem:[#allocation7 + $0xf8] sm:$0xff]  }
  0x9f   : > { %2573 = vmatprep.subr.bf16.mxu0 %v2872_v46  ;;  %v555_v9 = vadd.f32 %v554_v55, %v552_v6  ;;  %v2941_v49 = vld [vmem:[#allocation7 + $0x178] sm:$0xff]  }
  0xa1   : > { %2604 = vmatpush3.bf16.msra.mxu1 %v2891_v28  ;;  %v563_v11 = vpack.c.bf16 %v555_v9, %v555_v9  ;;  %v2916_v28 = vld [vmem:[#allocation7 + $0xc8] sm:$0xff]  }
  0xa2   : > { %2574 = vmatpush3.bf16.msra.mxu0 %v2873_v53  ;;  %2620 = vmatprep.subr.bf16.mxu1 %v2909_v22  ;;  %v2937_v53 = vld [vmem:[#allocation7 + $0x40] sm:$0xff]  }
  0xa3   : > { %2575 = vmatprep.subr.bf16.mxu0 %v2876_v54 }
  0xa4   : > { %1149 = vmatmul.mubr.bf16.vlgmr.msra.gmra.mxu1 %v561_v51  ;;  %v2935_v51 = vld [vmem:[#allocation7 + $0x8] sm:$0xff]  }
  0xa5   : > { %2621 = vmatpush3.bf16.msra.mxu1 %v2911_v32 }
  0xa6   : > { %2576 = vmatpush3.bf16.msra.mxu0 %v2877_v56  ;;  %2622 = vmatprep.subr.bf16.mxu1 %v2913_v7 }
  0xa7   : > { %2577 = vmatprep.subr.bf16.mxu0 %v2880_v57 }
  0xa9   : > { %2623 = vmatpush3.bf16.msra.mxu1 %v2915_v27 }
  0xaa   : > { %2578 = vmatpush3.bf16.msra.mxu0 %v2881_v48  ;;  %2624 = vmatprep.subr.bf16.mxu1 %v2917_v29 }
  0xab   : > { %2579 = vmatprep.subr.bf16.mxu0 %v2884_v58 }
  0xad   : > { %2625 = vmatpush3.bf16.msra.mxu1 %v2919_v43 }
  0xae   : > { %2580 = vmatpush3.bf16.msra.mxu0 %v2885_v59  ;;  %2626 = vmatprep.subr.bf16.mxu1 %v2921_v34 }
  0xaf   : > { %2581 = vmatprep.subr.bf16.mxu0 %v2888_v61 }
  0xb1   : > { %2627 = vmatpush3.bf16.msra.mxu1 %v2923_v36 }
  0xb2   : > { %2582 = vmatpush3.bf16.msra.mxu0 %v2889_v1  ;;  %2628 = vmatprep.subr.bf16.mxu1 %v2925_v37 }
  0xb3   : > { %2717 = vmatprep.subr.bf16.mxu0 %v3135_v33 }
  0xb5   : > { %1109 = vmatmul.mubr.bf16.vlgmr.msra.gmra.mxu0 %v559_v3  ;;  %2629 = vmatpush3.bf16.msra.mxu1 %v2927_v38 }
  0xb6   : > { %2718 = vmatpush3.bf16.msra.mxu0 %v2892_v0  ;;  %2733 = vmatprep.mubr.msk.bf16.mxu0 %vm3136_vm12, %v3135_v33 }
  0xb7   : > { %2719 = vmatprep.subr.bf16.mxu0 %v3135_v33  ;;  %2630 = vmatprep.subr.bf16.mxu1 %v2929_v45 }
  0xb9   : > { %2631 = vmatpush3.bf16.msra.mxu1 %v2931_v47 }
  0xba   : > { %2720 = vmatpush3.bf16.msra.mxu0 %v2893_v4  ;;  %2632 = vmatprep.subr.bf16.mxu1 %v2933_v50 }
  0xbb   : > { %2721 = vmatprep.subr.bf16.mxu0 %v3135_v33 }
  0xbd   : > { %2633 = vmatpush3.bf16.msra.mxu1 %v2935_v51 }
  0xbe   : > { %2722 = vmatpush3.bf16.msra.mxu0 %v2894_v35  ;;  %2634 = vmatprep.subr.bf16.mxu1 %v2937_v53 }
  0xbf   : > { %2723 = vmatprep.subr.bf16.mxu0 %v3135_v33 }
  0xc1   : > { %2635 = vmatpush3.bf16.msra.mxu1 %v2939_v26 }
  0xc2   : > { %2724 = vmatpush3.bf16.msra.mxu0 %v2895_v52  ;;  %2664 = vmatprep.subr.bf16.mxu1 %v2941_v49 }
  0xc3   : > { %2725 = vmatprep.subr.bf16.mxu0 %v3135_v33 }
  0xc6   : > { %2726 = vmatpush3.bf16.msra.mxu0 %v2896_v39 }
  0xc7   : > { %2727 = vmatprep.subr.bf16.mxu0 %v3135_v33 }
  0xca   : > { %2728 = vmatpush3.bf16.msra.mxu0 %v2897_v5 }
  0xcb   : > { %2729 = vmatprep.subr.bf16.mxu0 %v3135_v33 }
  0xce   : > { %2730 = vmatpush3.bf16.msra.mxu0 %v2898_v8 }
  0xcf   : > { %2731 = vmatprep.subr.bf16.mxu0 %v3135_v33 }
  0xd2   : > { %2732 = vmatpush3.bf16.msra.mxu0 %v2899_v10 }
  0xd3   : > { %2642 = vmatprep.subr.bf16.mxu0 %v2900_v12 }
  0xd5   : > { %2734 = vmatmul.mubr.bf16.vlgmr.msra.gmra.mxu0 %v563_v11 }
  0xd6   : > { %2643 = vmatpush3.bf16.msra.mxu0 %v2901_v13 }
  0xd7   : > { %2644 = vmatprep.subr.bf16.mxu0 %v2902_v14 }
  0xda   : > { %2645 = vmatpush3.bf16.msra.mxu0 %v2903_v16 }
  0xdb   : > { %2646 = vmatprep.subr.bf16.mxu0 %v2904_v63 }
  0xde   : > { %2647 = vmatpush3.bf16.msra.mxu0 %v2905_v18 }
  0xdf   : > { %2648 = vmatprep.subr.bf16.mxu0 %v2906_v19 }
  0xe2   : > { %2649 = vmatpush3.bf16.msra.mxu0 %v2907_v15 }
  0xe3   : > { %2650 = vmatprep.subr.bf16.mxu0 %v2908_v17 }
  0xe6   : > { %2651 = vmatpush3.bf16.msra.mxu0 %v2910_v23 }
  0xe7   : > { %2652 = vmatprep.subr.bf16.mxu0 %v2912_v24 }
  0xea   : > { %2653 = vmatpush3.bf16.msra.mxu0 %v2914_v25 }
  0xeb   : > { %2654 = vmatprep.subr.bf16.mxu0 %v2916_v28 }
  0xee   : > { %2655 = vmatpush3.bf16.msra.mxu0 %v2918_v30 }
  0xef   : > { %2656 = vmatprep.subr.bf16.mxu0 %v2920_v31 }
  0xf2   : > { %2657 = vmatpush3.bf16.msra.mxu0 %v2922_v44 }
  0xf3   : > { %2686 = vmatprep.subr.bf16.mxu0 %v2924_v21 }
 0x144   : > { %v2561_v40 = vpop.f32.mrf.mxu1 }
 0x146   : > { %v2562_v41 = vpop.f32.mrf.mxu1 }
 0x147   : > { %v2563_v20 = vadd.f32 %v2562_v41, %v2561_v40 }
 0x148   : > { %v2564_v42 = vpop.f32.mrf.mxu1 }
 0x14a   : > { %v2565_v46 = vpop.f32.mrf.mxu1 }
 0x155   : > { %v2539_v54 = vpop.f32.mrf.mxu0 }
 0x157   : > { %v2540_v55 = vpop.f32.mrf.mxu0 }
 0x158   : > { %v2541_v0 = vadd.f32 %v2540_v55, %v2539_v54 }
 0x159   : > { %v2542_v56 = vpop.f32.mrf.mxu0 }
 0x15a   : > { %v1071_v4 = vadd.f32 %v2563_v20, %v2541_v0 }
 0x15b   : > { %v2543_v57 = vpop.f32.mrf.mxu0 }
 0x164   : > { %v2605_v48 = vpop.f32.mrf.mxu1 }
 0x166   : > { %v2606_v58 = vpop.f32.mrf.mxu1 }
 0x167   : > { %v2607_v52 = vadd.f32 %v2606_v58, %v2605_v48 }
 0x168   : > { %v2608_v59 = vpop.f32.mrf.mxu1 }
 0x16a   : > { %v2609_v60 = vpop.f32.mrf.mxu1 }
 0x175   : > { %v2583_v61 = vpop.f32.mrf.mxu0 }
 0x177   : > { %v2584_v62 = vpop.f32.mrf.mxu0 }
 0x178   : > { %v2585_v3 = vadd.f32 %v2584_v62, %v2583_v61 }
 0x179   : > { %v2586_v1 = vpop.f32.mrf.mxu0 }
 0x17a   : > { %v1111_v35 = vadd.f32 %v2585_v3, %v1071_v4 }
 0x17b   : > { %v2587_v2 = vpop.f32.mrf.mxu0 }
 0x17c   : > { %v1151_v39 = vadd.f32 %v2607_v52, %v1111_v35 }
 0x195   : > { %v1190_v5 = vpop.f32.mrf.mxu0 }
 0x196   : > { %v3414_v6 = vadd.f32 %v1190_v5, %v1151_v39 }
 0x197   : > { %v2735_v8 = vpop.f32.mrf.mxu0 }
 0x198   : > { %vm1347_vm13 = vcmp.ge.f32.partialorder %v3414_v6, -2.2  ;;  %vm1350_vm14 = vcmp.ge.f32.partialorder %v3414_v6, -1.8  ;;  %vm1353_vm15 = vcmp.ge.f32.partialorder %v3414_v6, -1.4 }
 0x199   : > { %v1193_v9 = vpop.f32.mrf.mxu0  ;;  %v2405_v10 = vsel %vm1347_vm13, 1.0, %v3135_v33  ;;  %v2406_v11 = vsel %vm1350_vm14, 1.0, %v3135_v33  ;;  %v2407_v12 = vsel %vm1353_vm15, 1.0, %v3135_v33  ;;  %vm1356_vm0 = vcmp.ge.f32.partialorder %v3414_v6, -1.0 }
 0x19a   : > { %v2408_v13 = vsel %vm1356_vm0, 1.0, %v3135_v33  ;;  %vm1359_vm1 = vcmp.ge.f32.partialorder %v3414_v6, -0.6  ;;  %v1383_v63 = vsub.f32 %v2405_v10, %v2406_v11  ;;  %v3427_v18 = vmul.f32 2.4999995, %v3414_v6 }
 0x19b   : > { %v2736_v14 = vpop.f32.mrf.mxu0  ;;  %v2409_v16 = vsel %vm1359_vm1, 1.0, %v3135_v33  ;;  %v3430_v19 = vmul.f32 1.2499998, %v3414_v6  ;;  %v1384_v15 = vsub.f32 %v2406_v11, %v2407_v12  ;;  %v1385_v17 = vsub.f32 %v2407_v12, %v2408_v13 }
 0x19c   : > { %v3433_v22 = vmul.f32 0.83333313, %v3414_v6  ;;  %vm1362_vm2 = vcmp.ge.f32.partialorder %v3414_v6, -0.19999999  ;;  %v2417_v23 = vadd.f32 5.499999, %v3427_v18  ;;  %v1386_v7 = vsub.f32 %v2408_v13, %v2409_v16 }
 0x19d   : > { %v2418_v32 = vadd.f32 4.499999, %v3427_v18  ;;  %v2419_v24 = vadd.f32 3.499999, %v3427_v18  ;;  %v2420_v25 = vadd.f32 2.4999995, %v3427_v18 }
 0x19e   : > { %v2429_v27 = vadd.f32 2.2499995, %v3430_v19  ;;  %vm1365_vm3 = vcmp.ge.f32.partialorder %v3414_v6, 0.20000005  ;;  %v1406_v28 = vmul.f32 %v2417_v23, %v1383_v63  ;;  %v2428_v43 = vadd.f32 2.7499995, %v3430_v19 }
 0x19f   : > { %v1407_v29 = vsub.f32 1.0, %v2418_v32  ;;  %v1411_v30 = vsub.f32 1.0, %v2419_v24  ;;  %v1410_v31 = vmul.f32 %v2418_v32, %v1384_v15  ;;  %v1414_v34 = vmul.f32 %v2419_v24, %v1385_v17 }
 0x1a0   : > { %v1415_v44 = vsub.f32 1.0, %v2420_v25  ;;  %v2430_v36 = vadd.f32 1.7499995, %v3430_v19  ;;  %v1458_v38 = vsub.f32 1.0, %v2429_v27  ;;  %v2439_v40 = vadd.f32 1.4999996, %v3433_v22 }
 0x1a1   : > { %v1408_v21 = vmul.f32 %v1407_v29, %v1384_v15  ;;  %v1412_v37 = vmul.f32 %v1411_v30, %v1385_v17  ;;  %v2438_v20 = vadd.f32 1.8333329, %v3433_v22  ;;  %v2410_v42 = vsel %vm1362_vm2, 1.0, %v3135_v33 }
 0x1a2   : > { %v1416_v41 = vmul.f32 %v1415_v44, %v1386_v7  ;;  %v2411_v46 = vsel %vm1365_vm3, 1.0, %v3135_v33  ;;  %v1462_v50 = vsub.f32 1.0, %v2430_v36  ;;  %v1387_v51 = vsub.f32 %v2409_v16, %v2410_v42 }
 0x1a3   : > { %v1409_v45 = vadd.f32 %v1408_v21, %v1406_v28  ;;  %v1413_v47 = vadd.f32 %v1412_v37, %v1410_v31  ;;  %v1504_v26 = vsub.f32 1.0, %v2439_v40  ;;  %v2421_v49 = vadd.f32 1.4999998, %v3427_v18 }
 0x1a4   : > { %v1417_v53 = vadd.f32 %v1416_v41, %v1414_v34  ;;  %v3454_v54 = vadd.f32 0.49999985, %v3427_v18  ;;  %v3456_v48 = vsub.f32 %v2410_v42, %v2411_v46  ;;  %v1418_v59 = vmul.f32 %v2420_v25, %v1386_v7 }
 0x1a5   : > { %v1457_v55 = vmul.f32 %v2428_v43, %v1409_v45  ;;  %v1459_v56 = vmul.f32 %v1458_v38, %v1413_v47  ;;  %v1461_v57 = vmul.f32 %v2429_v27, %v1413_v47  ;;  %v1419_v60 = vsub.f32 1.0, %v2421_v49 }
 0x1a6   : > { %v1463_v58 = vmul.f32 %v1462_v50, %v1417_v53  ;;  %v1423_v61 = vsub.f32 1.0, %v3454_v54  ;;  %v1422_v1 = vmul.f32 %v2421_v49, %v1387_v51  ;;  %v2431_v2 = vadd.f32 1.2499998, %v3430_v19  ;;  %v2926_v50 = vld [vmem:[#allocation7 + $0x1b8] sm:$0xff]  }
 0x1a7   : > { %v1460_v62 = vadd.f32 %v1459_v56, %v1457_v55  ;;  %v3461_v0 = vadd.f32 0.7499999, %v3430_v19  ;;  %v1420_v4 = vmul.f32 %v1419_v60, %v1387_v51  ;;  %v2440_v52 = vadd.f32 1.1666664, %v3433_v22  ;;  %v2928_v56 = vld [vmem:[#allocation7 + $0x1f0] sm:$0xff]  }
 0x1a8   : > { %v1464_v3 = vadd.f32 %v1463_v58, %v1461_v57  ;;  %v1424_v35 = vmul.f32 %v1423_v61, %v3456_v48  ;;  %v1465_v5 = vmul.f32 %v2430_v36, %v1417_v53  ;;  %v1466_v8 = vsub.f32 1.0, %v2431_v2 }
 0x1a9   : > { %v1503_v39 = vmul.f32 %v2438_v20, %v1460_v62  ;;  %v3466_v9 = vadd.f32 0.83333313, %v3433_v22  ;;  %v1421_v11 = vadd.f32 %v1420_v4, %v1418_v59  ;;  %v1470_v13 = vsub.f32 1.0, %v3461_v0 }
 0x1aa   : > { %v1505_v10 = vmul.f32 %v1504_v26, %v1464_v3  ;;  %v3468_v12 = vadd.f32 %v1424_v35, %v1422_v1  ;;  %v1508_v14 = vsub.f32 1.0, %v2440_v52  ;;  %vm1368_vm4 = vcmp.ge.f32.partialorder %v3414_v6, 0.6 }
 0x1ab   : > { %v1512_v16 = vsub.f32 1.0, %v3466_v9  ;;  %vm1371_vm5 = vcmp.ge.f32.partialorder %v3414_v6, 1.0  ;;  %v1467_v15 = vmul.f32 %v1466_v8, %v1421_v11  ;;  %v1469_v17 = vmul.f32 %v2431_v2, %v1421_v11 }
 0x1ac   : > { %v1506_v63 = vadd.f32 %v1505_v10, %v1503_v39  ;;  %v1471_v23 = vmul.f32 %v1470_v13, %v3468_v12  ;;  %v1507_v32 = vmul.f32 %v2439_v40, %v1464_v3  ;;  %v2412_v24 = vsel %vm1368_vm4, 1.0, %v3135_v33  ;;  %v2930_v39 = vld [vmem:[#allocation7 + $0x1b0] sm:$0xff]   ;;  %v2932_v10 = vld [vmem:[#allocation7 + $0x1e8] sm:$0xff]  }
 0x1ad   : > { %v2413_v7 = vsel %vm1371_vm5, 1.0, %v3135_v33  ;;  %vm1374_vm6 = vcmp.ge.f32.partialorder %v3414_v6, 1.4000001  ;;  %v1468_v27 = vadd.f32 %v1467_v15, %v1465_v5  ;;  %vm1377_vm7 = vcmp.ge.f32.partialorder %v3414_v6, 1.8 }
 0x1ae   : > { %v1535_v25 = vpack.c.bf16 %v1506_v63, %v1506_v63  ;;  %v3478_v28 = vadd.f32 %v1471_v23, %v1469_v17  ;;  %v2414_v31 = vsel %vm1374_vm6, 1.0, %v3135_v33  ;;  %v3484_v34 = vsel %vm1377_vm7, 1.0, %v3135_v33 }
 0x1af   : > { %v1511_v29 = vmul.f32 %v2440_v52, %v1468_v27  ;;  %v1509_v43 = vmul.f32 %v1508_v14, %v1468_v27  ;;  %v1389_v44 = vsub.f32 %v2411_v46, %v2412_v24  ;;  %v1390_v36 = vsub.f32 %v2412_v24, %v2413_v7 }
 0x1b0   : > { %2007 = vmatprep.mubr.bf16.mxu1 %v1535_v25  ;;  %v1513_v30 = vmul.f32 %v1512_v16, %v3478_v28  ;;  %v2423_v21 = vadd.f32 -0.5, %v3427_v18  ;;  %v2424_v40 = vadd.f32 -1.4999998, %v3427_v18  ;;  %v2425_v41 = vadd.f32 -2.4999995, %v3427_v18 }
 0x1b1   : > { %v1510_v38 = vadd.f32 %v1509_v43, %v1507_v32  ;;  %vm1380_vm8 = vcmp.ge.f32.partialorder %v3414_v6, 2.2  ;;  %v1391_v20 = vsub.f32 %v2413_v7, %v2414_v31  ;;  %v2426_v42 = vadd.f32 -3.4999995, %v3427_v18  ;;  %v2934_v32 = vld [vmem:[#allocation7 + $0x1a8] sm:$0xff]  }
 0x1b2   : > { %v1514_v37 = vadd.f32 %v1513_v30, %v1511_v29  ;;  %v1431_v51 = vsub.f32 1.0, %v2424_v40  ;;  %v2435_v46 = vadd.f32 -0.7499999, %v3430_v19  ;;  %v1392_v53 = vsub.f32 %v2414_v31, %v3484_v34  ;;  %v2936_v29 = vld [vmem:[#allocation7 + $0x1e0] sm:$0xff]  }
 0x1b3   : > { %v1536_v47 = vpack.c.bf16 %v1510_v38, %v1510_v38  ;;  %v1435_v26 = vsub.f32 1.0, %v2425_v41  ;;  %v1439_v49 = vsub.f32 1.0, %v2426_v42  ;;  %v2436_v55 = vadd.f32 -1.2499998, %v3430_v19  ;;  %v2938_v38 = vld [vmem:[#allocation7 + $0x1a0] sm:$0xff]  }
 0x1b4   : > { %v1537_v45 = vpack.c.bf16 %v1514_v37, %v1514_v37  ;;  %v1430_v57 = vmul.f32 %v2423_v21, %v1389_v44  ;;  %v1432_v58 = vmul.f32 %v1431_v51, %v1390_v36  ;;  %v1434_v59 = vmul.f32 %v2424_v40, %v1390_v36 }
 0x1b5   : > { %v2434_v60 = vadd.f32 -0.25, %v3430_v19  ;;  %v1436_v61 = vmul.f32 %v1435_v26, %v1391_v20  ;;  %v1438_v62 = vmul.f32 %v2425_v41, %v1391_v20  ;;  %v1440_v1 = vmul.f32 %v1439_v49, %v1392_v53 }
 0x1b6   : > { %2047 = vmatprep.mubr.bf16.mxu0 %v1537_v45  ;;  %v1340_v2 = vsub.f32 0.0, %v3414_v6  ;;  %v1433_v3 = vadd.f32 %v1432_v58, %v1430_v57  ;;  %v1482_v4 = vsub.f32 1.0, %v2435_v46  ;;  %v1486_v35 = vsub.f32 1.0, %v2436_v55  ;;  %v2940_v45 = vld [vmem:[#allocation7 + $0x1d8] sm:$0xff]  }
 0x1b7   : > { %2048 = vmatmul.mubr.bf16.vlgmr.msra.gmra.mxu0 %v1536_v47  ;;  %v2445_v52 = vadd.f32 -0.4999999, %v3433_v22  ;;  %v1437_v5 = vadd.f32 %v1436_v61, %v1434_v59  ;;  %v1441_v8 = vadd.f32 %v1440_v1, %v1438_v62  ;;  %v1427_v13 = vsub.f32 1.0, %v2423_v21 }
 0x1b8   : > { %2687 = vmatpush3.bf16.msra.mxu0 %v2926_v50  ;;  %v1341_v11 = vmul.f32 1.442695, %v1340_v2  ;;  %v1481_v14 = vmul.f32 %v2434_v60, %v1433_v3  ;;  %v2416_v17 = vsel %vm1380_vm8, 1.0, %v3135_v33  ;;  %v3501_v23 = vadd.f32 -0.16666667, %v3433_v22  ;;  %v2942_v50 = vld [vmem:[#allocation7 + $0x198] sm:$0xff]  }
 0x1b9   : > { %2688 = vmatprep.subr.bf16.mxu0 %v2928_v56  ;;  %v1483_v16 = vmul.f32 %v1482_v4, %v1437_v5  ;;  %v1485_v63 = vmul.f32 %v2435_v46, %v1437_v5  ;;  %v1487_v15 = vmul.f32 %v1486_v35, %v1441_v8  ;;  %v1428_v24 = vmul.f32 %v1427_v13, %v1389_v44  ;;  %v2944_v46 = vld [vmem:[#allocation7 + $0x1d0] sm:$0xff]   ;;  %v2954_v13 = vld [vmem:[#allocation7 + $0x180] sm:$0xff]  }
 0x1ba   : > { %2976 = vpow2.f32 %v1341_v11  ;;  %v1528_v27 = vsub.f32 1.0, %v2445_v52  ;;  %v3505_v30 = vmul.f32 %v3466_v9, %v3478_v28  ;;  %v1426_v43 = vmul.f32 %v3454_v54, %v3456_v48 }
 0x1bb   : > { %v1484_v7 = vadd.f32 %v1483_v16, %v1481_v14  ;;  %v1488_v25 = vadd.f32 %v1487_v15, %v1485_v63  ;;  %v2427_v31 = vadd.f32 -4.499999, %v3427_v18  ;;  %v1442_v36 = vmul.f32 %v2426_v42, %v1392_v53 }
 0x1bc   : > { %2689 = vmatpush3.bf16.msra.mxu0 %v2930_v39  ;;  %v1393_v44 = vsub.f32 %v3484_v34, %v2416_v17  ;;  %v1429_v40 = vadd.f32 %v1428_v24, %v1426_v43  ;;  %v2437_v9 = vadd.f32 -1.7499998, %v3430_v19  ;;  %v1489_v28 = vmul.f32 %v2436_v55, %v1441_v8  ;;  %v2946_v55 = vld [vmem:[#allocation7 + $0x190] sm:$0xff]   ;;  %v2952_v39 = vld [vmem:[#allocation7 + $0x1c0] sm:$0xff]   ;;  %v2943_v24 = vld [vmem:[#allocation7 + $0x138] sm:$0xff]  }
 0x1bd   : > { %2690 = vmatprep.subr.bf16.mxu0 %v2932_v10  ;;  %v1527_v21 = vmul.f32 %v3501_v23, %v1484_v7  ;;  %v1529_v37 = vmul.f32 %v1528_v27, %v1488_v25  ;;  %v1443_v41 = vsub.f32 1.0, %v2427_v31  ;;  %v1531_v47 = vmul.f32 %v2445_v52, %v1488_v25  ;;  %v2950_v52 = vld [vmem:[#allocation7 + $0x188] sm:$0xff]   ;;  %v2945_v25 = vld [vmem:[#allocation7 + $0x170] sm:$0xff]   ;;  %v2953_v31 = vld [vmem:[#allocation7 + $0x160] sm:$0xff]  }
 0x1be   : > { %v1478_v54 = vsub.f32 1.0, %v2434_v60  ;;  %v2433_v42 = vadd.f32 0.24999993, %v3430_v19  ;;  %v1490_v26 = vsub.f32 1.0, %v2437_v9  ;;  %v2446_v49 = vadd.f32 -0.83333313, %v3433_v22 }
 0x1bf   : > { %v1530_v20 = vadd.f32 %v1529_v37, %v1527_v21  ;;  %v1444_v48 = vmul.f32 %v1443_v41, %v1393_v44  ;;  %v2948_v60 = vld [vmem:[#allocation7 + $0x1c8] sm:$0xff]   ;;  %v1524_v1 = vsub.f32 1.0, %v3501_v23  ;;  %v2443_v2 = vadd.f32 0.16666661, %v3433_v22  ;;  %v2956_v21 = vld [vmem:[#allocation7 + $0x158] sm:$0xff]   ;;  %v2958_v37 = vld [vmem:[#allocation7 + $0x150] sm:$0xff]  }
 0x1c0   : > { %2691 = vmatpush3.bf16.msra.mxu0 %v2934_v32  ;;  %v1479_v51 = vmul.f32 %v1478_v54, %v1433_v3  ;;  %v1477_v34 = vmul.f32 %v2433_v42, %v1429_v40  ;;  %v1532_v61 = vsub.f32 1.0, %v2446_v49  ;;  %v1474_v62 = vsub.f32 1.0, %v2433_v42  ;;  %v2951_v43 = vld [vmem:[#allocation7 + $0x128] sm:$0xff]   ;;  %v2959_v44 = vld [vmem:[#allocation7 + $0x110] sm:$0xff]   ;;  %v2963_v9 = vld [vmem:[#allocation7 + $0x100] sm:$0xff]  }
 0x1c1   : > { %2692 = vmatprep.subr.bf16.mxu0 %v2936_v29  ;;  %v1541_v18 = vpack.c.bf16 %v1530_v20, %v1530_v20  ;;  %v1445_v53 = vadd.f32 %v1444_v48, %v1442_v36  ;;  %v1473_v4 = vmul.f32 %v3461_v0, %v3468_v12  ;;  %v1525_v8 = vmul.f32 %v1524_v1, %v1484_v7  ;;  %v2947_v29 = vld [vmem:[#allocation7 + $0x130] sm:$0xff]   ;;  %v2955_v36 = vld [vmem:[#allocation7 + $0x120] sm:$0xff]   ;;  %v2961_v41 = vld [vmem:[#allocation7 + $0x108] sm:$0xff]  }
 0x1c2   : > { %v1480_v59 = vadd.f32 %v1479_v51, %v1477_v34  ;;  %v1475_v35 = vmul.f32 %v1474_v62, %v1429_v40  ;;  %v2442_v16 = vadd.f32 0.4999999, %v3433_v22  ;;  %v1520_v63 = vsub.f32 1.0, %v2443_v2  ;;  %v2949_v22 = vld [vmem:[#allocation7 + $0x168] sm:$0xff]   ;;  %v2962_v20 = vld [vmem:[#allocation7 + $0x140] sm:$0xff]   ;;  %v2965_v48 = vld [vmem:[#allocation7 + $0x230] sm:$0xff]  }
 0x1c3   : > { %2127 = vmatprep.mubr.bf16.mxu0 %v1541_v18  ;;  %v1491_v56 = vmul.f32 %v1490_v26, %v1445_v53  ;;  %v2966_v18 = vld [vmem:[#allocation7 + $0x228] sm:$0xff]   ;;  %v2967_v42 = vld [vmem:[#allocation7 + $0x220] sm:$0xff]  }
 0x1c4   : > { %2693 = vmatpush3.bf16.msra.mxu0 %v2938_v38  ;;  %v1523_v5 = vmul.f32 %v2443_v2, %v1480_v59  ;;  %v1476_v11 = vadd.f32 %v1475_v35, %v1473_v4  ;;  %v1521_v17 = vmul.f32 %v1520_v63, %v1480_v59  ;;  %v2960_v38 = vld [vmem:[#allocation7 + $0x148] sm:$0xff]   ;;  %v1516_v40 = vsub.f32 1.0, %v2442_v16  ;;  %v2971_v34 = vld [vmem:[#allocation7 + $0x200] sm:$0xff]  }
 0x1c5   : > { %2694 = vmatprep.subr.bf16.mxu0 %v2940_v45  ;;  %v1492_v19 = vadd.f32 %v1491_v56, %v1489_v28  ;;  %v2970_v51 = vld [vmem:[#allocation7 + $0x208] sm:$0xff]  }
 0x1c6   : > { %v1526_v14 = vadd.f32 %v1525_v8, %v1523_v5  ;;  %v1519_v15 = vmul.f32 %v2442_v16, %v1476_v11  ;;  %v1517_v45 = vmul.f32 %v1516_v40, %v1476_v11 }
 0x1c7   : > { %v2977_v57 = vpop.eup %2976  ;;  %v1533_v3 = vmul.f32 %v1532_v61, %v1492_v19 }
 0x1c8   : > { %2695 = vmatpush3.bf16.msra.mxu0 %v2942_v50  ;;  %v1343_v58 = vadd.f32 1.0, %v2977_v57  ;;  %v1540_v0 = vpack.c.bf16 %v1526_v14, %v1526_v14  ;;  %v1522_v23 = vadd.f32 %v1521_v17, %v1519_v15  ;;  %v1518_v28 = vadd.f32 %v1517_v45, %v3505_v30  ;;  %v2968_v30 = vld [vmem:[#allocation7 + $0x218] sm:$0xff]   ;;  %v2969_v50 = vld [vmem:[#allocation7 + $0x210] sm:$0xff]  }
 0x1c9   : > { %2696 = vmatprep.subr.bf16.mxu0 %v2944_v46  ;;  %v3519_v10 = vadd.f32 %v1533_v3, %v1531_v47  ;;  %v2964_v47 = vld [vmem:[#allocation7 + $0x238] sm:$0xff]  }
 0x1ca   : > { %2978 = vrcp.f32 %v1343_v58  ;;  %v1539_v27 = vpack.c.bf16 %v1522_v23, %v1522_v23  ;;  %v1538_v54 = vpack.c.bf16 %v1518_v28, %v1518_v28 }
 0x1cb   : > { %v1542_v46 = vpack.c.bf16 %v3519_v10, %v3519_v10 }
 0x1cc   : > { %2697 = vmatpush3.bf16.msra.mxu0 %v2946_v55 }
 0x1cd   : > { %2698 = vmatprep.subr.bf16.mxu0 %v2948_v60 }
 0x1d0   : > { %2699 = vmatpush3.bf16.msra.mxu0 %v2950_v52 }
 0x1d1   : > { %2700 = vmatprep.subr.bf16.mxu0 %v2952_v39 }
 0x1d4   : > { %2701 = vmatpush3.bf16.msra.mxu0 %v2954_v13 }
 0x1d7   : > { %2128 = vmatmul.mubr.bf16.vlgmr.msra.gmra.mxu0 %v1540_v0  ;;  %v2979_v12 = vpop.eup %2978 }
 0x1d8   : > { %v1345_v32 = vmul.f32 %v2979_v12, %v3414_v6  ;;  %v2957_v6 = vld [vmem:[#allocation7 + $0x118] sm:$0xff]  }
 0x1da   : > { %v1346_v7 = vpack.c.bf16 %v1345_v32, %v1345_v32 }
 0x1dc   : > { %2008 = vmatmul.mubr.bf16.vlgmr.msra.gmra.mxu1 %v1346_v7 }
 0x1dd   : > { %2665 = vmatpush3.bf16.msra.mxu1 %v2943_v24  ;;  %2087 = vmatprep.mubr.bf16.mxu1 %v1539_v27 }
 0x1de   : > { %2666 = vmatprep.subr.bf16.mxu1 %v2945_v25 }
 0x1e1   : > { %2667 = vmatpush3.bf16.msra.mxu1 %v2947_v29 }
 0x1e2   : > { %2668 = vmatprep.subr.bf16.mxu1 %v2949_v22 }
 0x1e5   : > { %2669 = vmatpush3.bf16.msra.mxu1 %v2951_v43 }
 0x1e6   : > { %2670 = vmatprep.subr.bf16.mxu1 %v2953_v31 }
 0x1e9   : > { %2671 = vmatpush3.bf16.msra.mxu1 %v2955_v36 }
 0x1ea   : > { %2672 = vmatprep.subr.bf16.mxu1 %v2956_v21 }
 0x1ed   : > { %2673 = vmatpush3.bf16.msra.mxu1 %v2957_v6 }
 0x1ee   : > { %2674 = vmatprep.subr.bf16.mxu1 %v2958_v37 }
 0x1f1   : > { %2675 = vmatpush3.bf16.msra.mxu1 %v2959_v44 }
 0x1f2   : > { %2676 = vmatprep.subr.bf16.mxu1 %v2960_v38 }
 0x1f5   : > { %2677 = vmatpush3.bf16.msra.mxu1 %v2961_v41 }
 0x1f6   : > { %2678 = vmatprep.subr.bf16.mxu1 %v2962_v20 }
 0x1f9   : > { %2679 = vmatpush3.bf16.msra.mxu1 %v2963_v9 }
 0x1fa   : > { %2737 = vmatprep.subr.bf16.mxu1 %v3135_v33 }
 0x1fc   : > { %2088 = vmatmul.mubr.bf16.vlgmr.msra.gmra.mxu1 %v1538_v54 }
 0x1fd   : > { %2738 = vmatpush3.bf16.msra.mxu1 %v2964_v47  ;;  %2753 = vmatprep.mubr.msk.bf16.mxu1 %vm3136_vm12, %v3135_v33 }
 0x1fe   : > { %2739 = vmatprep.subr.bf16.mxu1 %v3135_v33 }
 0x201   : > { %2740 = vmatpush3.bf16.msra.mxu1 %v2965_v48 }
 0x202   : > { %2741 = vmatprep.subr.bf16.mxu1 %v3135_v33 }
 0x205   : > { %2742 = vmatpush3.bf16.msra.mxu1 %v2966_v18 }
 0x206   : > { %2743 = vmatprep.subr.bf16.mxu1 %v3135_v33 }
 0x209   : > { %2744 = vmatpush3.bf16.msra.mxu1 %v2967_v42 }
 0x20a   : > { %2745 = vmatprep.subr.bf16.mxu1 %v3135_v33 }
 0x20d   : > { %2746 = vmatpush3.bf16.msra.mxu1 %v2968_v30 }
 0x20e   : > { %2747 = vmatprep.subr.bf16.mxu1 %v3135_v33 }
 0x211   : > { %2748 = vmatpush3.bf16.msra.mxu1 %v2969_v50 }
 0x212   : > { %2749 = vmatprep.subr.bf16.mxu1 %v3135_v33 }
 0x215   : > { %2750 = vmatpush3.bf16.msra.mxu1 %v2970_v51 }
 0x216   : > { %2751 = vmatprep.subr.bf16.mxu1 %v3135_v33 }
 0x219   : > { %2752 = vmatpush3.bf16.msra.mxu1 %v2971_v34 }
 0x21c   : > { %2754 = vmatmul.mubr.bf16.vlgmr.msra.gmra.mxu1 %v1542_v46 }
 0x277   : > { %v2658_v53 = vpop.f32.mrf.mxu0 }
 0x279   : > { %v2659_v26 = vpop.f32.mrf.mxu0 }
 0x27a   : > { %v2660_v49 = vadd.f32 %v2659_v26, %v2658_v53 }
 0x27b   : > { %v2661_v56 = vpop.f32.mrf.mxu0 }
 0x27d   : > { %v2662_v57 = vpop.f32.mrf.mxu0 }
 0x297   : > { %v2702_v55 = vpop.f32.mrf.mxu0 }
 0x299   : > { %v2703_v58 = vpop.f32.mrf.mxu0 }
 0x29a   : > { %v2704_v59 = vadd.f32 %v2703_v58, %v2702_v55 }
 0x29b   : > { %v2705_v60 = vpop.f32.mrf.mxu0 }
 0x29c   : > { %v2636_v19 = vpop.f32.mrf.mxu1 }
 0x29d   : > { %v2706_v61 = vpop.f32.mrf.mxu0 }
 0x29e   : > { %v2637_v62 = vpop.f32.mrf.mxu1 }
 0x29f   : > { %v2638_v2 = vadd.f32 %v2637_v62, %v2636_v19 }
 0x2a0   : > { %v2639_v33 = vpop.f32.mrf.mxu1 }
 0x2a1   : > { %v2050_v35 = vadd.f32 %v2660_v49, %v2638_v2 }
 0x2a2   : > { %v2640_v1 = vpop.f32.mrf.mxu1 }
 0x2bc   : > { %v2680_v3 = vpop.f32.mrf.mxu1 }
 0x2be   : > { %v2681_v4 = vpop.f32.mrf.mxu1 }
 0x2bf   : > { %v2682_v52 = vadd.f32 %v2681_v4, %v2680_v3 }
 0x2c0   : > { %v2683_v39 = vpop.f32.mrf.mxu1 }
 0x2c1   : > { %v2090_v5 = vadd.f32 %v2682_v52, %v2050_v35 }
 0x2c2   : > { %v2684_v8 = vpop.f32.mrf.mxu1 }
 0x2c3   : > { %v2130_v10 = vadd.f32 %v2704_v59, %v2090_v5 }
 0x2dc   : > { %v2169_v11 = vpop.f32.mrf.mxu1 }
 0x2dd   : > { %v2170_v13 = vadd.f32 %v2169_v11, %v2130_v10 }
 0x2de   : > { %v2755_v14 = vpop.f32.mrf.mxu1 }
 0x2df   : > { %2175 = vst [vmem:[%s214_s20] sm:$0xff] %v2170_v13 }
 0x2e0   : > { %v2172_v16 = vpop.f32.mrf.mxu1 }
 0x2e1   : > { %3073 = shalt.err (!%p3070_p9)
}
 0x2e2   : > { %s3074_s21 = scalar_lea.hbm %s3542_s29, 128  ;;  %s3078_s23 = scalar_lea.hbm %s3588_s3, 256 }
 0x2e3   : > { %p3075_p13 = scmp.ne.s32.totalorder %s3542_s29, %s3074_s21  ;;  %p3079_p4 = scmp.lt.s32.totalorder %s3542_s29, %s3588_s3 }
 0x2e4   : > { %p3080_p8 = scmp.lt.s32.totalorder %s3078_s23, %s3074_s21 }
 0x2e5   : > { %p3076_p5 = pnand %p3075_p13, %p3604_p0 }
 0x2e6   : > { %p3081_p3 = por %p3080_p8, %p3079_p4 }
 0x2e7   : > { %p3077_p10 = pneg %p3076_p5 }
 0x2e9   : > { %p3082_p11 = pnand %p3081_p3, %p3077_p10 }
 0x2eb   : > { %3085 = shalt.err (!%p3082_p11)
}
 0x2ec   : > { %2767 = dma.vmem_to_hbm [thread:$0]  (%p3604_p0), %s3544_s25, 128, %s3542_s29, %s2177_s5   ;;  %v2756_v63 = vpop.f32.mrf.mxu1 }
 0x2ed PF: > { %s2202_s30 = sand.u32 1, %s3116_s12   ;;  %p3605_p1 = scmp.ne.s32.totalorder %s3594_s19, 0 }
 0x2ee   : > { %p3606_p2 = scmp.ge.s32.totalorder %s3128_s15, 2  ;;  %s2203_s4 = scalar_lea.sflag [#allocation4], %s2202_s30 }
 0x2f0   : > { %p2781_p6 = pnand %p3606_p2, %p3605_p1 }
 0x2f2   : > { %p2782_p12 = pneg %p2781_p6 }
 0x2f4   : > { %3111 = dma.done.wait (%p2782_p12), %s2203_s4, 128  }
 0x2f5   : > { %3113 = vsyncadd (%p2782_p12), %s2203_s4, 4294967168  ;;  %p17_p7 = scmp.ge.s32.totalorder %s3230_s7, 4   ;;  %s3607_s12 = smov %s3120_s13 }
 0x2f6   : > { %s3608_s13 = smov %s3124_s14  ;;  %s3609_s14 = smov %s3246_s11 }
 0x2f7   : > { %s3610_s15 = smov %s3230_s7  ;;  %19 = sbr.rel (!%p17_p7) target bundleno = 6 (0x6), region = 85 }
 0x2fc   :  { %2208 = vsyncpa [#allocation3], 1 }
 0x2fd   :  { %2210 = vsyncpa [#allocation3 + $0x1], 1 }
 0x2fe   :  { %2211 = vsyncpa [#allocation6], 1 }
 0x2ff   :  { %2212 = vsyncpa [#allocation4], 1 }
 0x300   :  { %2214 = vsyncpa [#allocation4 + $0x1], 1 }

</bundles_post_ra>
